<compile_context>
chip_gen: v6e
topology: v6e:2x2x1
jax: 0.10.0
libtpu: 0.0.40
codegen_flags: <defaults>
</compile_context>

<pallas_src>
import jax
import jax.numpy as jnp
from jax import lax
from jax.experimental import pallas as pl
from jax.experimental.pallas import tpu as pltpu


# -----------------------------------------------------------------------------
# Fused kernel: bf16 one-hot gather (MXU) -> masked mean pool (reshape +
# sublane reduction) -> MLP head.  One grid step = one batch tile of TB rows.
# -----------------------------------------------------------------------------
def _classifier_kernel(ids_ref, lens_ref, emb_ref,
                       s1_ref, b1_ref, w1_ref, bb1_ref,
                       s2_ref, b2_ref, w2_ref, bb2_ref,
                       o_ref):
    TBS = ids_ref.shape[0]          # TB * S
    V, H = emb_ref.shape
    TB = lens_ref.shape[0]
    S = TBS // TB                   # static python int

    # ---- embedding gather: masked one-hot (TB*S, V) @ bf16 table (V, H) -----
    # ids carry the validity mask already (-1 at padded positions), so the
    # one-hot row of an invalid token is all zeros -> zero embedding row.
    ids = ids_ref[...]                                               # (TB*S, 1) i32
    col_v = lax.broadcasted_iota(jnp.int32, (TBS, V), 1)
    onehot = jnp.where(col_v == ids, 1.0, 0.0).astype(jnp.bfloat16)  # exact in bf16
    emb_sel = jnp.dot(onehot, emb_ref[...],
                      preferred_element_type=jnp.float32)            # (TB*S, H) f32

    # ---- length-masked mean pool: relayout-free reshape + sublane reduce ----
    # (lane dim H unchanged; S is a multiple of 8 in the demo so the reshape is
    # a pure shape cast).  Scale by 1/len AFTER the reduction (binary weights).
    lens = lens_ref[...]                                             # (TB, 1) i32
    x = emb_sel.reshape(TB, S, H).sum(axis=1)                        # (TB, H)
    inv_len = 1.0 / jnp.maximum(lens, 1).astype(jnp.float32)         # (TB, 1)
    x = x * inv_len

    # ---- MLP head: BN1(eval) -> Linear1 -> ReLU -> BN2(eval) -> Linear2 -----
    h = x * s1_ref[...] + b1_ref[...]                                # folded BN1
    h = jnp.dot(h, w1_ref[...], preferred_element_type=jnp.float32) + bb1_ref[...]
    h = jnp.maximum(h, 0.0)                                          # ReLU
    h = h * s2_ref[...] + b2_ref[...]                                # folded BN2
    y = jnp.dot(h, w2_ref[...], preferred_element_type=jnp.float32) + bb2_ref[...]
    o_ref[...] = y.astype(o_ref.dtype)                               # lane-dense store


# -----------------------------------------------------------------------------
# Wrapper: batch tiling (large tiles, minimal grid), class-dim padding to 128
# lanes, single pallas_call.
# -----------------------------------------------------------------------------
def _round_up(x, m):
    return -(-x // m) * m


def _pick_batch_tile(B):
    # Single grid step whenever the (8-row padded) batch fits in <=128 rows;
    # otherwise 128-row tiles fill the MXU row dimension and amortize the
    # ~0.35us per-grid-step pipeline overhead.  Multi-tile grids shard across
    # the two v7x TensorCores via the "parallel" axis.
    b8 = _round_up(B, 8)
    return b8 if b8 <= 128 else 128


def classifier_forward_impl(params, token_ids, text_len, batch_tile=None):
    B, S = token_ids.shape
    emb = params["emb"]
    V, H = emb.shape
    w1 = params["w1"]
    M = w1.shape[1]
    w2 = params["w2"]
    C = w2.shape[1]

    TB = _pick_batch_tile(B) if batch_tile is None else batch_tile
    B_pad = _round_up(B, TB)
    if B_pad != B:
        token_ids = jnp.pad(token_ids, ((0, B_pad - B), (0, 0)))
        text_len = jnp.pad(text_len, (0, B_pad - B))

    token_ids = token_ids.astype(jnp.int32)
    text_len = text_len.astype(jnp.int32)

    # Fold the length mask into the id stream: positions >= text_len become -1,
    # which matches no vocab row -> zero one-hot row -> zero embedding.  This
    # also clamps correctly when text_len > S (all S tokens valid), matching
    # the reference, and makes padded batch rows (len 0) pool to exactly 0.
    pos = jnp.arange(S, dtype=jnp.int32)[None, :]
    ids_masked = jnp.where(pos < text_len[:, None], token_ids, -1)
    ids_flat = ids_masked.reshape(B_pad * S, 1)
    lens2d = text_len.reshape(B_pad, 1)

    # bf16 table: the one-hot gather is exact in bf16; accumulation stays f32.
    emb_bf16 = emb.astype(jnp.bfloat16)

    # Pad the class dimension to a multiple of 128 so output stores are
    # lane-dense full `vst`; slice the real logits back out after the kernel.
    CP = _round_up(C, 128)
    w2p = jnp.zeros((M, CP), jnp.float32).at[:, :C].set(w2)
    bb2p = jnp.zeros((1, CP), jnp.float32).at[:, :C].set(params["bb2"])

    tiled = lambda i: (i, 0)      # batch-tiled blocks
    const = lambda i: (0, 0)      # weights: resident across batch tiles

    grid = (B_pad // TB,)

    flops = (2 * B_pad * S * V * H        # one-hot gather matmul
             + 2 * B_pad * H * M          # fc1
             + 2 * B_pad * M * CP)        # fc2 (class-padded)
    bytes_accessed = (B_pad * S * 4 + B_pad * 4            # ids + lens
                      + V * H * 2                           # bf16 table
                      + (H * M + M * CP + 2 * H + 3 * M + CP) * 4
                      + B_pad * CP * 4)                     # output

    out = pl.pallas_call(
        _classifier_kernel,
        out_shape=jax.ShapeDtypeStruct((B_pad, CP), jnp.float32),
        grid=grid,
        in_specs=[
            pl.BlockSpec((TB * S, 1), tiled),   # masked token ids (flattened)
            pl.BlockSpec((TB, 1), tiled),       # lengths
            pl.BlockSpec((V, H), const),        # bf16 embedding table (in VMEM)
            pl.BlockSpec((1, H), const),        # BN1 scale
            pl.BlockSpec((1, H), const),        # BN1 bias
            pl.BlockSpec((H, M), const),        # Linear1 weight
            pl.BlockSpec((1, M), const),        # Linear1 bias
            pl.BlockSpec((1, M), const),        # BN2 scale
            pl.BlockSpec((1, M), const),        # BN2 bias
            pl.BlockSpec((M, CP), const),       # Linear2 weight (class-padded)
            pl.BlockSpec((1, CP), const),       # Linear2 bias   (class-padded)
        ],
        out_specs=pl.BlockSpec((TB, CP), tiled),
        compiler_params=pltpu.CompilerParams(
            dimension_semantics=("parallel",)),
        cost_estimate=pl.CostEstimate(flops=flops, transcendentals=0,
                                      bytes_accessed=bytes_accessed),
    )(ids_flat, lens2d, emb_bf16,
      params["s1"], params["b1"], w1, params["bb1"],
      params["s2"], params["b2"], w2p, bb2p)

    return out[:B, :C]


classifier_forward = jax.jit(classifier_forward_impl,
                             static_argnames=("batch_tile",))


# -----------------------------------------------------------------------------
# Pure-JAX reference (same semantics, f32 table) for a sanity check
# -----------------------------------------------------------------------------
def classifier_forward_ref(params, token_ids, text_len):
    emb = params["emb"][token_ids]                                     # (B, S, H)
    mask = jnp.arange(token_ids.shape[1])[None, :] < text_len[:, None]
    denom = jnp.maximum(text_len, 1).astype(jnp.float32)[:, None]
    x = (emb * mask[:, :, None]).sum(axis=1) / denom                   # (B, H)
    h = x * params["s1"] + params["b1"]
    h = h @ params["w1"] + params["bb1"]
    h = jnp.maximum(h, 0.0)
    h = h * params["s2"] + params["b2"]
    return h @ params["w2"] + params["bb2"]


# -----------------------------------------------------------------------------
# Parameter construction (deterministic, mirrors module __init__ / reset_params)
# -----------------------------------------------------------------------------
def make_params(key, vocab, hidden, mlp_size, class_size):
    ks = jax.random.split(key, 8)
    eps = 1e-5

    # word_emb (pretrained) + reset_params row 0 ~ U(-0.005, 0.005)
    emb = jax.random.normal(ks[0], (vocab, hidden), jnp.float32) * 0.1
    emb = emb.at[0].set(jax.random.uniform(ks[1], (hidden,), jnp.float32,
                                           -0.005, 0.005))

    # fc1: BatchNorm1d(hidden) + Linear(hidden, mlp_size)
    bn1_gamma = jnp.ones((hidden,), jnp.float32)
    bn1_beta = jnp.zeros((hidden,), jnp.float32)
    bn1_mean = jax.random.normal(ks[2], (hidden,), jnp.float32) * 0.01
    bn1_var = jnp.ones((hidden,), jnp.float32) * 0.9
    w1 = jax.random.normal(ks[3], (hidden, mlp_size), jnp.float32) * (hidden ** -0.5)
    b1 = jax.random.normal(ks[4], (mlp_size,), jnp.float32) * 0.01

    # fc2: BatchNorm1d(mlp_size) + Linear(mlp_size, class_size)
    bn2_gamma = jnp.ones((mlp_size,), jnp.float32)
    bn2_beta = jnp.zeros((mlp_size,), jnp.float32)
    bn2_mean = jax.random.normal(ks[5], (mlp_size,), jnp.float32) * 0.01
    bn2_var = jnp.ones((mlp_size,), jnp.float32) * 1.1
    # reset_params: fc2 linear weight ~ U(-0.005, 0.005)
    w2 = jax.random.uniform(ks[6], (mlp_size, class_size), jnp.float32,
                            -0.005, 0.005)
    b2 = jax.random.normal(ks[7], (class_size,), jnp.float32) * 0.01

    # fold eval-mode batchnorm into per-feature scale/bias (shape (1, F))
    s1 = (bn1_gamma / jnp.sqrt(bn1_var + eps)).reshape(1, hidden)
    bb = (bn1_beta - bn1_mean * s1[0]).reshape(1, hidden)
    s2 = (bn2_gamma / jnp.sqrt(bn2_var + eps)).reshape(1, mlp_size)
    cc = (bn2_beta - bn2_mean * s2[0]).reshape(1, mlp_size)

    return dict(
        emb=emb,
        s1=s1, b1=bb, w1=w1, bb1=b1.reshape(1, mlp_size),
        s2=s2, b2=cc, w2=w2, bb2=b2.reshape(1, class_size),
    )


if __name__ == "__main__":
    VOCAB, HIDDEN, MLP, CLASSES = 64, 32, 32, 4
    B, S = 64, 16          # B=64 -> single 64-row batch tile, grid=(1,)

    key = jax.random.PRNGKey(0)
    k_params, k_ids, k_len = jax.random.split(key, 3)

    params = make_params(k_params, VOCAB, HIDDEN, MLP, CLASSES)
    token_ids = jax.random.randint(k_ids, (B, S), 0, VOCAB, dtype=jnp.int32)
    text_len = jax.random.randint(k_len, (B,), 4, S + 1, dtype=jnp.int32)

    logits = classifier_forward(params, token_ids, text_len)
    jax.block_until_ready(logits)

    assert logits.shape == (B, CLASSES)
    assert logits.dtype == jnp.float32
    assert bool(jnp.all(jnp.isfinite(logits)))

    ref = classifier_forward_ref(params, token_ids, text_len)
    assert bool(jnp.allclose(logits, ref, rtol=1e-2, atol=1e-2)), (
        float(jnp.max(jnp.abs(logits - ref))))

    print("KERNEL_OK")
</pallas_src>

<mosaic_0001>
module attributes {stable_mosaic.version = 11 : i64} {
  func.func @_classifier_kernel(%arg0: i32, %arg1: memref<1024x1xi32, #tpu.memory_space<vmem>>, %arg2: memref<64x1xi32, #tpu.memory_space<vmem>>, %arg3: memref<64x32xbf16, #tpu.memory_space<vmem>>, %arg4: memref<1x32xf32, #tpu.memory_space<vmem>>, %arg5: memref<1x32xf32, #tpu.memory_space<vmem>>, %arg6: memref<32x32xf32, #tpu.memory_space<vmem>>, %arg7: memref<1x32xf32, #tpu.memory_space<vmem>>, %arg8: memref<1x32xf32, #tpu.memory_space<vmem>>, %arg9: memref<1x32xf32, #tpu.memory_space<vmem>>, %arg10: memref<32x128xf32, #tpu.memory_space<vmem>>, %arg11: memref<1x128xf32, #tpu.memory_space<vmem>>, %arg12: memref<64x128xf32, #tpu.memory_space<vmem>>) attributes {dimension_semantics = [#tpu.dimension_semantics<parallel>], iteration_bounds = array<i64: 1>, scalar_prefetch = 0 : i64, scratch_operands = 0 : i64, tpu.core_type = #tpu.core_type<tc>, window_params = [{transform_indices = @transform_0, window_bounds = array<i64: 1024, 1>}, {transform_indices = @transform_1, window_bounds = array<i64: 64, 1>}, {pipeline_mode = #tpu.pipeline_mode<synchronous>, transform_indices = @transform_2, window_bounds = array<i64: 64, 32>}, {pipeline_mode = #tpu.pipeline_mode<synchronous>, transform_indices = @transform_3, window_bounds = array<i64: 1, 32>}, {pipeline_mode = #tpu.pipeline_mode<synchronous>, transform_indices = @transform_4, window_bounds = array<i64: 1, 32>}, {pipeline_mode = #tpu.pipeline_mode<synchronous>, transform_indices = @transform_5, window_bounds = array<i64: 32, 32>}, {pipeline_mode = #tpu.pipeline_mode<synchronous>, transform_indices = @transform_6, window_bounds = array<i64: 1, 32>}, {pipeline_mode = #tpu.pipeline_mode<synchronous>, transform_indices = @transform_7, window_bounds = array<i64: 1, 32>}, {pipeline_mode = #tpu.pipeline_mode<synchronous>, transform_indices = @transform_8, window_bounds = array<i64: 1, 32>}, {pipeline_mode = #tpu.pipeline_mode<synchronous>, transform_indices = @transform_9, window_bounds = array<i64: 32, 128>}, {pipeline_mode = #tpu.pipeline_mode<synchronous>, transform_indices = @transform_10, window_bounds = array<i64: 1, 128>}, {transform_indices = @transform_11, window_bounds = array<i64: 64, 128>}]} {
    %c0 = arith.constant 0 : index
    %c0_0 = arith.constant 0 : index
    %0 = vector.load %arg1[%c0, %c0_0] : memref<1024x1xi32, #tpu.memory_space<vmem>>, vector<1024x1xi32>
    %1 = tpu.iota {dimensions = array<i32: 1>} : vector<1024x64xi32>
    %2 = vector.broadcast %0 : vector<1024x1xi32> to vector<1024x64xi32>
    %3 = arith.cmpi eq, %1, %2 : vector<1024x64xi32>
    %cst = arith.constant 1.000000e+00 : f32
    %cst_1 = arith.constant 0.000000e+00 : f32
    %4 = vector.broadcast %cst : f32 to vector<1024x64xf32>
    %5 = vector.broadcast %cst_1 : f32 to vector<1024x64xf32>
    %6 = arith.select %3, %4, %5 : vector<1024x64xi1>, vector<1024x64xf32>
    %7 = arith.truncf %6 : vector<1024x64xf32> to vector<1024x64xbf16>
    %c0_2 = arith.constant 0 : index
    %c0_3 = arith.constant 0 : index
    %8 = vector.load %arg3[%c0_2, %c0_3] : memref<64x32xbf16, #tpu.memory_space<vmem>>, vector<64x32xbf16>
    %cst_4 = arith.constant dense<0.000000e+00> : vector<1024x32xf32>
    %9 = tpu.matmul %7, %8, %cst_4 {dimension_numbers = #tpu.dot_dimension_numbers<[1], [0], [0], [1], [0, 0, 1, 1], [], []>} : vector<1024x64xbf16>, vector<64x32xbf16>, vector<1024x32xf32> -> vector<1024x32xf32>
    %c0_5 = arith.constant 0 : index
    %c0_6 = arith.constant 0 : index
    %10 = vector.load %arg2[%c0_5, %c0_6] : memref<64x1xi32, #tpu.memory_space<vmem>>, vector<64x1xi32>
    %11 = vector.shape_cast %9 : vector<1024x32xf32> to vector<64x16x32xf32>
    %cst_7 = arith.constant dense<0.000000e+00> : vector<64x32xf32>
    %12 = vector.multi_reduction <add>, %11, %cst_7 [1] : vector<64x16x32xf32> to vector<64x32xf32>
    %c1_i32 = arith.constant 1 : i32
    %13 = vector.broadcast %c1_i32 : i32 to vector<64x1xi32>
    %14 = arith.maxsi %10, %13 : vector<64x1xi32>
    %15 = arith.sitofp %14 : vector<64x1xi32> to vector<64x1xf32>
    %cst_8 = arith.constant 1.000000e+00 : f32
    %16 = vector.broadcast %cst_8 : f32 to vector<64x1xf32>
    %17 = arith.divf %16, %15 : vector<64x1xf32>
    %18 = vector.broadcast %17 : vector<64x1xf32> to vector<64x32xf32>
    %19 = arith.mulf %12, %18 : vector<64x32xf32>
    %c0_9 = arith.constant 0 : index
    %c0_10 = arith.constant 0 : index
    %20 = vector.load %arg4[%c0_9, %c0_10] : memref<1x32xf32, #tpu.memory_space<vmem>>, vector<1x32xf32>
    %21 = vector.broadcast %20 : vector<1x32xf32> to vector<64x32xf32>
    %22 = arith.mulf %19, %21 : vector<64x32xf32>
    %c0_11 = arith.constant 0 : index
    %c0_12 = arith.constant 0 : index
    %23 = vector.load %arg5[%c0_11, %c0_12] : memref<1x32xf32, #tpu.memory_space<vmem>>, vector<1x32xf32>
    %24 = vector.broadcast %23 : vector<1x32xf32> to vector<64x32xf32>
    %25 = arith.addf %22, %24 : vector<64x32xf32>
    %c0_13 = arith.constant 0 : index
    %c0_14 = arith.constant 0 : index
    %26 = vector.load %arg6[%c0_13, %c0_14] : memref<32x32xf32, #tpu.memory_space<vmem>>, vector<32x32xf32>
    %cst_15 = arith.constant dense<0.000000e+00> : vector<64x32xf32>
    %27 = tpu.matmul %25, %26, %cst_15 {dimension_numbers = #tpu.dot_dimension_numbers<[1], [0], [0], [1], [0, 0, 1, 1], [], []>} : vector<64x32xf32>, vector<32x32xf32>, vector<64x32xf32> -> vector<64x32xf32>
    %c0_16 = arith.constant 0 : index
    %c0_17 = arith.constant 0 : index
    %28 = vector.load %arg7[%c0_16, %c0_17] : memref<1x32xf32, #tpu.memory_space<vmem>>, vector<1x32xf32>
    %29 = vector.broadcast %28 : vector<1x32xf32> to vector<64x32xf32>
    %30 = arith.addf %27, %29 : vector<64x32xf32>
    %cst_18 = arith.constant 0.000000e+00 : f32
    %31 = vector.broadcast %cst_18 : f32 to vector<64x32xf32>
    %32 = arith.maximumf %30, %31 : vector<64x32xf32>
    %c0_19 = arith.constant 0 : index
    %c0_20 = arith.constant 0 : index
    %33 = vector.load %arg8[%c0_19, %c0_20] : memref<1x32xf32, #tpu.memory_space<vmem>>, vector<1x32xf32>
    %34 = vector.broadcast %33 : vector<1x32xf32> to vector<64x32xf32>
    %35 = arith.mulf %32, %34 : vector<64x32xf32>
    %c0_21 = arith.constant 0 : index
    %c0_22 = arith.constant 0 : index
    %36 = vector.load %arg9[%c0_21, %c0_22] : memref<1x32xf32, #tpu.memory_space<vmem>>, vector<1x32xf32>
    %37 = vector.broadcast %36 : vector<1x32xf32> to vector<64x32xf32>
    %38 = arith.addf %35, %37 : vector<64x32xf32>
    %c0_23 = arith.constant 0 : index
    %c0_24 = arith.constant 0 : index
    %39 = vector.load %arg10[%c0_23, %c0_24] : memref<32x128xf32, #tpu.memory_space<vmem>>, vector<32x128xf32>
    %cst_25 = arith.constant dense<0.000000e+00> : vector<64x128xf32>
    %40 = tpu.matmul %38, %39, %cst_25 {dimension_numbers = #tpu.dot_dimension_numbers<[1], [0], [0], [1], [0, 0, 1, 1], [], []>} : vector<64x32xf32>, vector<32x128xf32>, vector<64x128xf32> -> vector<64x128xf32>
    %c0_26 = arith.constant 0 : index
    %c0_27 = arith.constant 0 : index
    %41 = vector.load %arg11[%c0_26, %c0_27] : memref<1x128xf32, #tpu.memory_space<vmem>>, vector<1x128xf32>
    %42 = vector.broadcast %41 : vector<1x128xf32> to vector<64x128xf32>
    %43 = arith.addf %40, %42 : vector<64x128xf32>
    %c0_28 = arith.constant 0 : index
    %c0_29 = arith.constant 0 : index
    %44 = vector.load %arg12[%c0_28, %c0_29] : memref<64x128xf32, #tpu.memory_space<vmem>>, vector<64x128xf32>
    tpu.vector_store %arg12[%c0_28, %c0_29], %43 {strides = array<i32>} : memref<64x128xf32, #tpu.memory_space<vmem>>, vector<64x128xf32>,
    return
  }
  func.func @transform_0(%arg0: i32) -> (i32, i32) {
    %c0_i32 = arith.constant 0 : i32
    %c0_i32_0 = arith.constant 0 : i32
    return %arg0, %c0_i32 : i32, i32
  }
  func.func @transform_1(%arg0: i32) -> (i32, i32) {
    %c0_i32 = arith.constant 0 : i32
    %c0_i32_0 = arith.constant 0 : i32
    return %arg0, %c0_i32 : i32, i32
  }
  func.func @transform_2(%arg0: i32) -> (i32, i32) {
    %c0_i32 = arith.constant 0 : i32
    %c0_i32_0 = arith.constant 0 : i32
    %c0_i32_1 = arith.constant 0 : i32
    return %c0_i32, %c0_i32_0 : i32, i32
  }
  func.func @transform_3(%arg0: i32) -> (i32, i32) {
    %c0_i32 = arith.constant 0 : i32
    %c0_i32_0 = arith.constant 0 : i32
    %c0_i32_1 = arith.constant 0 : i32
    return %c0_i32, %c0_i32_0 : i32, i32
  }
  func.func @transform_4(%arg0: i32) -> (i32, i32) {
    %c0_i32 = arith.constant 0 : i32
    %c0_i32_0 = arith.constant 0 : i32
    %c0_i32_1 = arith.constant 0 : i32
    return %c0_i32, %c0_i32_0 : i32, i32
  }
  func.func @transform_5(%arg0: i32) -> (i32, i32) {
    %c0_i32 = arith.constant 0 : i32
    %c0_i32_0 = arith.constant 0 : i32
    %c0_i32_1 = arith.constant 0 : i32
    return %c0_i32, %c0_i32_0 : i32, i32
  }
  func.func @transform_6(%arg0: i32) -> (i32, i32) {
    %c0_i32 = arith.constant 0 : i32
    %c0_i32_0 = arith.constant 0 : i32
    %c0_i32_1 = arith.constant 0 : i32
    return %c0_i32, %c0_i32_0 : i32, i32
  }
  func.func @transform_7(%arg0: i32) -> (i32, i32) {
    %c0_i32 = arith.constant 0 : i32
    %c0_i32_0 = arith.constant 0 : i32
    %c0_i32_1 = arith.constant 0 : i32
    return %c0_i32, %c0_i32_0 : i32, i32
  }
  func.func @transform_8(%arg0: i32) -> (i32, i32) {
    %c0_i32 = arith.constant 0 : i32
    %c0_i32_0 = arith.constant 0 : i32
    %c0_i32_1 = arith.constant 0 : i32
    return %c0_i32, %c0_i32_0 : i32, i32
  }
  func.func @transform_9(%arg0: i32) -> (i32, i32) {
    %c0_i32 = arith.constant 0 : i32
    %c0_i32_0 = arith.constant 0 : i32
    %c0_i32_1 = arith.constant 0 : i32
    return %c0_i32, %c0_i32_0 : i32, i32
  }
  func.func @transform_10(%arg0: i32) -> (i32, i32) {
    %c0_i32 = arith.constant 0 : i32
    %c0_i32_0 = arith.constant 0 : i32
    %c0_i32_1 = arith.constant 0 : i32
    return %c0_i32, %c0_i32_0 : i32, i32
  }
  func.func @transform_11(%arg0: i32) -> (i32, i32) {
    %c0_i32 = arith.constant 0 : i32
    %c0_i32_0 = arith.constant 0 : i32
    return %arg0, %c0_i32 : i32, i32
  }
}

</mosaic_0001>

<bundles_post_ra>
// kernel: classifier_forward_impl.1
= control target key start
LH: loop header
LB: loop body
LE: loop exit
PB: predicated region body
PF: predicated region fallthrough
CT: control target
= control target key end

     0   :  { %v3523_v0 = vmov 0   ;;  %vm905_vm4 = vcmask 523264   ;;  %s5093_s0 = inlined_call_operand.vmem [shape: s32[1024,1], index: 0, kind: input, shape index: {}]   ;;  %s5094_s2 = inlined_call_operand.vmem [shape: bf16[64,32], index: 2, kind: input, shape index: {}]   ;;  %s5095_s1 = inlined_call_operand.vmem [shape: s32[64,1], index: 1, kind: input, shape index: {}]   ;;  %s5096_s5 = inlined_call_operand.vmem [shape: f32[32,32], index: 5, kind: input, shape index: {}]   ;;  %s5097_s3 = inlined_call_operand.vmem [shape: f32[1,32], index: 3, kind: input, shape index: {}]   ;;  %s5098_s4 = inlined_call_operand.vmem [shape: f32[1,32], index: 4, kind: input, shape index: {}]   ;;  %s5099_s9 = inlined_call_operand.vmem [shape: f32[32,128], index: 9, kind: input, shape index: {}]   ;;  %s5100_s6 = inlined_call_operand.vmem [shape: f32[1,32], index: 6, kind: input, shape index: {}]   ;;  %s5101_s7 = inlined_call_operand.vmem [shape: f32[1,32], index: 7, kind: input, shape index: {}]   ;;  %s5102_s8 = inlined_call_operand.vmem [shape: f32[1,32], index: 8, kind: input, shape index: {}]   ;;  %s5103_s10 = inlined_call_operand.vmem [shape: f32[1,128], index: 10, kind: input, shape index: {}]   ;;  %s5104_s11 = inlined_call_operand.vmem [shape: f32[64,128], index: 11, kind: output, shape index: {}]  }
   0x1   :  { %3500 = vset.pattern.permute.xlu1 %v3523_v0  ;;  %3499 = vset.pattern.permute.xlu0 %v3523_v0  ;;  %v41_v1 = vld [vmem:[%s5093_s0 + $0x10] sm:$0xff]  ;;  %v39_v2 = vld [vmem:[%s5093_s0] sm:$0xff]  ;;  %v42_v3 = vld [vmem:[%s5093_s0 + $0x18] sm:$0xff] }
   0x2   :  { %176 = vperm.xlu1 %3500, %v41_v1   ;;  %170 = vperm.xlu0 %3499, %v39_v2   ;;  %v40_v4 = vld [vmem:[%s5093_s0 + $0x8] sm:$0xff]  ;;  %v43_v6 = vld [vmem:[%s5093_s0 + $0x20] sm:$0xff]  ;;  %v46_v7 = vld [vmem:[%s5093_s0 + $0x38] sm:$0xff] }
   0x3   :  { %v44_v5 = vld [vmem:[%s5093_s0 + $0x28] sm:$0xff]  ;;  %v45_v8 = vld [vmem:[%s5093_s0 + $0x30] sm:$0xff]  ;;  %v47_v10 = vld [vmem:[%s5093_s0 + $0x40] sm:$0xff] }
   0x4   :  { %v48_v9 = vld [vmem:[%s5093_s0 + $0x48] sm:$0xff]  ;;  %v50_v11 = vld [vmem:[%s5093_s0 + $0x58] sm:$0xff]  ;;  %v49_v12 = vld [vmem:[%s5093_s0 + $0x50] sm:$0xff] }
   0x5   :  { %v3501_v13 = vld [vmem:[%s5094_s2 + $0x18] sm:$0xff]   ;;  %v52_v14 = vld [vmem:[%s5093_s0 + $0x68] sm:$0xff]  ;;  %v51_v15 = vld [vmem:[%s5093_s0 + $0x60] sm:$0xff] }
   0x6   :  { %179 = vperm.xlu1 %3500, %v42_v3   ;;  %173 = vperm.xlu0 %3499, %v40_v4   ;;  %v3502_v16 = vld [vmem:[%s5094_s2 + $0x10] sm:$0xff]   ;;  %v3503_v17 = vld [vmem:[%s5094_s2 + $0x8] sm:$0xff]   ;;  %v54_v18 = vld [vmem:[%s5093_s0 + $0x78] sm:$0xff]  ;;  %v167_v3 = vlaneseq }
   0x7   :  { %3313 = vmatprep.subr.bf16.mxu0 %v3501_v13  ;;  %3489 = vmatprep.subr.bf16.mxu1 %v3501_v13  ;;  %v53_v19 = vld [vmem:[%s5093_s0 + $0x70] sm:$0xff]  ;;  %v3504_v20 = vld [vmem:[%s5094_s2] sm:$0xff]   ;;  %v56_v21 = vld [vmem:[%s5093_s0 + $0x88] sm:$0xff] }
   0x8   :  { %3314 = vmatpush3.bf16.msra.mxu0 %v3501_v13  ;;  %3493 = vmatpush3.bf16.msra.mxu1 %v3501_v13  ;;  %v55_v22 = vld [vmem:[%s5093_s0 + $0x80] sm:$0xff]  ;;  %v58_v23 = vld [vmem:[%s5093_s0 + $0x98] sm:$0xff]  ;;  %v57_v24 = vld [vmem:[%s5093_s0 + $0x90] sm:$0xff]  ;;  %v3524_v13 = vmov 0.0  }
   0x9   :  { %3315 = vmatprep.subr.bf16.mxu0 %v3502_v16  ;;  %3490 = vmatprep.subr.bf16.mxu1 %v3502_v16  ;;  %v60_v25 = vld [vmem:[%s5093_s0 + $0xa8] sm:$0xff]  ;;  %v59_v26 = vld [vmem:[%s5093_s0 + $0xa0] sm:$0xff]  ;;  %v62_v27 = vld [vmem:[%s5093_s0 + $0xb8] sm:$0xff] }
   0xa   :  { %185 = vperm.xlu1 %3500, %v44_v5   ;;  %182 = vperm.xlu0 %3499, %v43_v6   ;;  %v61_v28 = vld [vmem:[%s5093_s0 + $0xb0] sm:$0xff]  ;;  %v112_v29 = vld [vmem:[%s5093_s0 + $0x248] sm:$0xff]  ;;  %v111_v30 = vld [vmem:[%s5093_s0 + $0x240] sm:$0xff]  ;;  %v3789_v6 = vand.u32 127, %v167_v3 }
   0xb   :  { %v114_v31 = vld [vmem:[%s5093_s0 + $0x258] sm:$0xff]  ;;  %v113_v32 = vld [vmem:[%s5093_s0 + $0x250] sm:$0xff]  ;;  %v64_v33 = vld [vmem:[%s5093_s0 + $0xc8] sm:$0xff] }
   0xc   :  { %3316 = vmatpush3.bf16.msra.mxu0 %v3502_v16  ;;  %3494 = vmatpush3.bf16.msra.mxu1 %v3502_v16  ;;  %v63_v34 = vld [vmem:[%s5093_s0 + $0xc0] sm:$0xff]  ;;  %v66_v35 = vld [vmem:[%s5093_s0 + $0xd8] sm:$0xff]  ;;  %v65_v36 = vld [vmem:[%s5093_s0 + $0xd0] sm:$0xff] }
   0xd   :  { %3317 = vmatprep.subr.bf16.mxu0 %v3503_v17  ;;  %3491 = vmatprep.subr.bf16.mxu1 %v3503_v17  ;;  %v116_v37 = vld [vmem:[%s5093_s0 + $0x268] sm:$0xff]  ;;  %v115_v38 = vld [vmem:[%s5093_s0 + $0x260] sm:$0xff]  ;;  %v118_v39 = vld [vmem:[%s5093_s0 + $0x278] sm:$0xff] }
   0xe   :  { %191 = vperm.xlu1 %3500, %v46_v7   ;;  %188 = vperm.xlu0 %3499, %v45_v8   ;;  %v117_v40 = vld [vmem:[%s5093_s0 + $0x270] sm:$0xff]  ;;  %v68_v41 = vld [vmem:[%s5093_s0 + $0xe8] sm:$0xff]  ;;  %v67_v42 = vld [vmem:[%s5093_s0 + $0xe0] sm:$0xff] }
   0xf   :  { %v70_v43 = vld [vmem:[%s5093_s0 + $0xf8] sm:$0xff]  ;;  %v69_v44 = vld [vmem:[%s5093_s0 + $0xf0] sm:$0xff]  ;;  %v120_v45 = vld [vmem:[%s5093_s0 + $0x288] sm:$0xff] }
  0x10   :  { %3318 = vmatpush3.bf16.msra.mxu0 %v3503_v17  ;;  %3495 = vmatpush3.bf16.msra.mxu1 %v3503_v17  ;;  %v119_v46 = vld [vmem:[%s5093_s0 + $0x280] sm:$0xff]  ;;  %v122_v47 = vld [vmem:[%s5093_s0 + $0x298] sm:$0xff]  ;;  %v121_v48 = vld [vmem:[%s5093_s0 + $0x290] sm:$0xff] }
  0x11   :  { %3319 = vmatprep.subr.bf16.mxu0 %v3504_v20  ;;  %3492 = vmatprep.subr.bf16.mxu1 %v3504_v20  ;;  %v72_v49 = vld [vmem:[%s5093_s0 + $0x108] sm:$0xff]  ;;  %v71_v50 = vld [vmem:[%s5093_s0 + $0x100] sm:$0xff]  ;;  %v74_v51 = vld [vmem:[%s5093_s0 + $0x118] sm:$0xff] }
  0x12   :  { %197 = vperm.xlu1 %3500, %v48_v9   ;;  %194 = vperm.xlu0 %3499, %v47_v10   ;;  %v73_v52 = vld [vmem:[%s5093_s0 + $0x110] sm:$0xff]  ;;  %v124_v53 = vld [vmem:[%s5093_s0 + $0x2a8] sm:$0xff]  ;;  %v123_v54 = vld [vmem:[%s5093_s0 + $0x2a0] sm:$0xff] }
  0x13   :  { %v126_v55 = vld [vmem:[%s5093_s0 + $0x2b8] sm:$0xff]  ;;  %v125_v56 = vld [vmem:[%s5093_s0 + $0x2b0] sm:$0xff]  ;;  %v76_v57 = vld [vmem:[%s5093_s0 + $0x128] sm:$0xff] }
  0x14   :  { %3320 = vmatpush3.bf16.msra.mxu0 %v3504_v20  ;;  %3496 = vmatpush3.bf16.msra.mxu1 %v3504_v20  ;;  %v75_v58 = vld [vmem:[%s5093_s0 + $0x120] sm:$0xff]  ;;  %v78_v59 = vld [vmem:[%s5093_s0 + $0x138] sm:$0xff]  ;;  %v77_v60 = vld [vmem:[%s5093_s0 + $0x130] sm:$0xff] }
  0x15   :  { %v128_v61 = vld [vmem:[%s5093_s0 + $0x2c8] sm:$0xff]  ;;  %v127_v62 = vld [vmem:[%s5093_s0 + $0x2c0] sm:$0xff]  ;;  %v130_v63 = vld [vmem:[%s5093_s0 + $0x2d8] sm:$0xff] }
  0x16   :  { %203 = vperm.xlu1 %3500, %v50_v11   ;;  %200 = vperm.xlu0 %3499, %v49_v12   ;;  %v129_v0 = vld [vmem:[%s5093_s0 + $0x2d0] sm:$0xff]  ;;  %v80_v1 = vld [vmem:[%s5093_s0 + $0x148] sm:$0xff]  ;;  %v79_v2 = vld [vmem:[%s5093_s0 + $0x140] sm:$0xff] }
  0x17   :  { %v82_v4 = vld [vmem:[%s5093_s0 + $0x158] sm:$0xff]  ;;  %v81_v5 = vld [vmem:[%s5093_s0 + $0x150] sm:$0xff]  ;;  %v132_v9 = vld [vmem:[%s5093_s0 + $0x2e8] sm:$0xff] }
  0x18   :  { %v131_v10 = vld [vmem:[%s5093_s0 + $0x2e0] sm:$0xff]  ;;  %v134_v16 = vld [vmem:[%s5093_s0 + $0x2f8] sm:$0xff]  ;;  %v133_v17 = vld [vmem:[%s5093_s0 + $0x2f0] sm:$0xff] }
  0x1a   :  { %209 = vperm.xlu1 %3500, %v52_v14   ;;  %206 = vperm.xlu0 %3499, %v51_v15  }
  0x1e   :  { %215 = vperm.xlu1 %3500, %v54_v18   ;;  %212 = vperm.xlu0 %3499, %v53_v19  }
  0x22   :  { %221 = vperm.xlu1 %3500, %v56_v21   ;;  %218 = vperm.xlu0 %3499, %v55_v22  }
  0x26   :  { %227 = vperm.xlu1 %3500, %v58_v23   ;;  %224 = vperm.xlu0 %3499, %v57_v24  }
  0x2a   :  { %233 = vperm.xlu1 %3500, %v60_v25   ;;  %230 = vperm.xlu0 %3499, %v59_v26   ;;  %v84_v26 = vld [vmem:[%s5093_s0 + $0x168] sm:$0xff] }
  0x2e   :  { %239 = vperm.xlu1 %3500, %v62_v27   ;;  %236 = vperm.xlu0 %3499, %v61_v28   ;;  %v83_v27 = vld [vmem:[%s5093_s0 + $0x160] sm:$0xff] }
  0x32   :  { %389 = vperm.xlu1 %3500, %v112_v29   ;;  %386 = vperm.xlu0 %3499, %v111_v30  }
  0x36   :  { %395 = vperm.xlu1 %3500, %v114_v31   ;;  %392 = vperm.xlu0 %3499, %v113_v32  }
  0x3a   :  { %245 = vperm.xlu1 %3500, %v64_v33   ;;  %242 = vperm.xlu0 %3499, %v63_v34   ;;  %v86_v33 = vld [vmem:[%s5093_s0 + $0x178] sm:$0xff]  ;;  %v85_v34 = vld [vmem:[%s5093_s0 + $0x170] sm:$0xff] }
  0x3e   :  { %251 = vperm.xlu1 %3500, %v66_v35   ;;  %248 = vperm.xlu0 %3499, %v65_v36  }
  0x42   :  { %401 = vperm.xlu1 %3500, %v116_v37   ;;  %398 = vperm.xlu0 %3499, %v115_v38  }
  0x46   :  { %407 = vperm.xlu1 %3500, %v118_v39   ;;  %404 = vperm.xlu0 %3499, %v117_v40   ;;  %v136_v40 = vld [vmem:[%s5093_s0 + $0x308] sm:$0xff] }
  0x4a   :  { %257 = vperm.xlu1 %3500, %v68_v41   ;;  %254 = vperm.xlu0 %3499, %v67_v42   ;;  %v135_v41 = vld [vmem:[%s5093_s0 + $0x300] sm:$0xff] }
  0x4e   :  { %263 = vperm.xlu1 %3500, %v70_v43   ;;  %260 = vperm.xlu0 %3499, %v69_v44  }
  0x52   :  { %413 = vperm.xlu1 %3500, %v120_v45   ;;  %410 = vperm.xlu0 %3499, %v119_v46  }
  0x56   :  { %419 = vperm.xlu1 %3500, %v122_v47   ;;  %416 = vperm.xlu0 %3499, %v121_v48   ;;  %v138_v47 = vld [vmem:[%s5093_s0 + $0x318] sm:$0xff]  ;;  %v137_v48 = vld [vmem:[%s5093_s0 + $0x310] sm:$0xff] }
  0x5a   :  { %269 = vperm.xlu1 %3500, %v72_v49   ;;  %266 = vperm.xlu0 %3499, %v71_v50  }
  0x5e   :  { %275 = vperm.xlu1 %3500, %v74_v51   ;;  %272 = vperm.xlu0 %3499, %v73_v52  }
  0x62   :  { %425 = vperm.xlu1 %3500, %v124_v53   ;;  %422 = vperm.xlu0 %3499, %v123_v54   ;;  %v88_v54 = vld [vmem:[%s5093_s0 + $0x188] sm:$0xff] }
  0x66   :  { %431 = vperm.xlu1 %3500, %v126_v55   ;;  %428 = vperm.xlu0 %3499, %v125_v56   ;;  %v87_v55 = vld [vmem:[%s5093_s0 + $0x180] sm:$0xff] }
  0x6a   :  { %281 = vperm.xlu1 %3500, %v76_v57   ;;  %278 = vperm.xlu0 %3499, %v75_v58  }
  0x6e   :  { %287 = vperm.xlu1 %3500, %v78_v59   ;;  %284 = vperm.xlu0 %3499, %v77_v60  }
  0x72   :  { %437 = vperm.xlu1 %3500, %v128_v61   ;;  %434 = vperm.xlu0 %3499, %v127_v62   ;;  %v90_v61 = vld [vmem:[%s5093_s0 + $0x198] sm:$0xff]  ;;  %v89_v62 = vld [vmem:[%s5093_s0 + $0x190] sm:$0xff] }
  0x76   :  { %443 = vperm.xlu1 %3500, %v130_v63   ;;  %440 = vperm.xlu0 %3499, %v129_v0  }
  0x7a   :  { %293 = vperm.xlu1 %3500, %v80_v1   ;;  %290 = vperm.xlu0 %3499, %v79_v2  }
  0x7d   :  { %v177_v7 = vpop.permute.xlu1 %176  ;;  %v171_v8 = vpop.permute.xlu0 %170 }
  0x7e   :  { %299 = vperm.xlu1 %3500, %v82_v4   ;;  %296 = vperm.xlu0 %3499, %v81_v5   ;;  %vm555_vm0 = vcmp.eq.s32.totalorder %v3789_v6, %v177_v7  ;;  %vm553_vm1 = vcmp.eq.s32.totalorder %v3789_v6, %v171_v8  ;;  %v140_v4 = vld [vmem:[%s5093_s0 + $0x328] sm:$0xff]  ;;  %v139_v5 = vld [vmem:[%s5093_s0 + $0x320] sm:$0xff] }
  0x7f   :  { %v683_v14 = vsel %vm555_vm0, 1.0, %v3524_v13  ;;  %v681_v18 = vsel %vm553_vm1, 1.0, %v3524_v13 }
  0x81   :  { %v180_v11 = vpop.permute.xlu1 %179  ;;  %v174_v12 = vpop.permute.xlu0 %173 }
  0x82   :  { %vm556_vm2 = vcmp.eq.s32.totalorder %v3789_v6, %v180_v11  ;;  %vm554_vm3 = vcmp.eq.s32.totalorder %v3789_v6, %v174_v12  ;;  %449 = vperm.xlu1 %3500, %v132_v9   ;;  %446 = vperm.xlu0 %3499, %v131_v10   ;;  %v142_v12 = vld [vmem:[%s5093_s0 + $0x338] sm:$0xff] }
  0x83   :  { %v684_v15 = vsel %vm556_vm2, 1.0, %v3524_v13  ;;  %v682_v19 = vsel %vm554_vm3, 1.0, %v3524_v13 }
  0x84   :  { %v810_v20 = vpack.c.bf16 %v684_v15, %v683_v14  ;;  %v809_v21 = vpack.c.bf16 %v682_v19, %v681_v18  ;;  %v141_v14 = vld [vmem:[%s5093_s0 + $0x330] sm:$0xff] }
  0x85   :  { %v186_v22 = vpop.permute.xlu1 %185  ;;  %v183_v23 = vpop.permute.xlu0 %182 }
  0x86   :  { %vm558_vm5 = vcmp.eq.s32.totalorder %v3789_v6, %v186_v22  ;;  %vm557_vm6 = vcmp.eq.s32.totalorder %v3789_v6, %v183_v23  ;;  %455 = vperm.xlu1 %3500, %v134_v16   ;;  %452 = vperm.xlu0 %3499, %v133_v17  }
  0x87   :  { %v686_v24 = vsel %vm558_vm5, 1.0, %v3524_v13  ;;  %v685_v25 = vsel %vm557_vm6, 1.0, %v3524_v13  ;;  %3321 = vmatprep.mubr.msk.bf16.mxu0 %vm905_vm4, %v809_v21  ;;  %v91_v21 = vld [vmem:[%s5093_s0 + $0x1a0] sm:$0xff] }
  0x88   :  { %v811_v28 = vpack.c.bf16 %v686_v24, %v685_v25  ;;  %3322 = vmatmul.mubr.msk.bf16.vlgmr.msra.gmra.mxu0 %vm905_vm4, %v810_v20  ;;  %v92_v20 = vld [vmem:[%s5093_s0 + $0x1a8] sm:$0xff] }
  0x89   :  { %v192_v29 = vpop.permute.xlu1 %191  ;;  %v189_v30 = vpop.permute.xlu0 %188 }
  0x8a   :  { %vm560_vm7 = vcmp.eq.s32.totalorder %v3789_v6, %v192_v29  ;;  %vm559_vm8 = vcmp.eq.s32.totalorder %v3789_v6, %v189_v30  ;;  %305 = vperm.xlu1 %3500, %v84_v26   ;;  %302 = vperm.xlu0 %3499, %v83_v27   ;;  %v94_v27 = vld [vmem:[%s5093_s0 + $0x1b8] sm:$0xff] }
  0x8b   :  { %v688_v31 = vsel %vm560_vm7, 1.0, %v3524_v13  ;;  %v687_v32 = vsel %vm559_vm8, 1.0, %v3524_v13  ;;  %3325 = vmatprep.mubr.msk.bf16.mxu0 %vm905_vm4, %v811_v28  ;;  %v93_v28 = vld [vmem:[%s5093_s0 + $0x1b0] sm:$0xff] }
  0x8c   :  { %v812_v35 = vpack.c.bf16 %v688_v31, %v687_v32  ;;  %v144_v32 = vld [vmem:[%s5093_s0 + $0x348] sm:$0xff] }
  0x8d   :  { %v198_v36 = vpop.permute.xlu1 %197  ;;  %v195_v37 = vpop.permute.xlu0 %194 }
  0x8e   :  { %vm562_vm9 = vcmp.eq.s32.totalorder %v3789_v6, %v198_v36  ;;  %vm561_vm10 = vcmp.eq.s32.totalorder %v3789_v6, %v195_v37  ;;  %311 = vperm.xlu1 %3500, %v86_v33   ;;  %308 = vperm.xlu0 %3499, %v85_v34   ;;  %v143_v33 = vld [vmem:[%s5093_s0 + $0x340] sm:$0xff] }
  0x8f   :  { %v690_v38 = vsel %vm562_vm9, 1.0, %v3524_v13  ;;  %v689_v39 = vsel %vm561_vm10, 1.0, %v3524_v13 }
  0x90   :  { %v813_v42 = vpack.c.bf16 %v690_v38, %v689_v39  ;;  %3326 = vmatmul.mubr.msk.bf16.gmra.mxu0 %vm905_vm4, %v812_v35 }
  0x91   :  { %v204_v43 = vpop.permute.xlu1 %203  ;;  %v201_v44 = vpop.permute.xlu0 %200 }
  0x92   :  { %vm564_vm11 = vcmp.eq.s32.totalorder %v3789_v6, %v204_v43  ;;  %vm563_vm12 = vcmp.eq.s32.totalorder %v3789_v6, %v201_v44  ;;  %461 = vperm.xlu1 %3500, %v136_v40   ;;  %458 = vperm.xlu0 %3499, %v135_v41   ;;  %v146_v41 = vld [vmem:[%s5093_s0 + $0x358] sm:$0xff] }
  0x93   :  { %v692_v45 = vsel %vm564_vm11, 1.0, %v3524_v13  ;;  %v691_v46 = vsel %vm563_vm12, 1.0, %v3524_v13  ;;  %3329 = vmatprep.mubr.msk.bf16.mxu0 %vm905_vm4, %v813_v42  ;;  %v145_v42 = vld [vmem:[%s5093_s0 + $0x350] sm:$0xff] }
  0x94   :  { %v814_v49 = vpack.c.bf16 %v692_v45, %v691_v46 }
  0x95   :  { %v210_v50 = vpop.permute.xlu1 %209  ;;  %v207_v51 = vpop.permute.xlu0 %206 }
  0x96   :  { %vm566_vm13 = vcmp.eq.s32.totalorder %v3789_v6, %v210_v50  ;;  %vm565_vm14 = vcmp.eq.s32.totalorder %v3789_v6, %v207_v51  ;;  %467 = vperm.xlu1 %3500, %v138_v47   ;;  %464 = vperm.xlu0 %3499, %v137_v48   ;;  %v96_v48 = vld [vmem:[%s5093_s0 + $0x1c8] sm:$0xff] }
  0x97   :  { %v694_v52 = vsel %vm566_vm13, 1.0, %v3524_v13  ;;  %v693_v53 = vsel %vm565_vm14, 1.0, %v3524_v13 }
  0x98   :  { %v815_v56 = vpack.c.bf16 %v694_v52, %v693_v53  ;;  %3330 = vmatmul.mubr.msk.bf16.gmra.mxu0 %vm905_vm4, %v814_v49  ;;  %v95_v49 = vld [vmem:[%s5093_s0 + $0x1c0] sm:$0xff] }
  0x99   :  { %v216_v57 = vpop.permute.xlu1 %215  ;;  %v213_v58 = vpop.permute.xlu0 %212 }
  0x9a   :  { %vm568_vm15 = vcmp.eq.s32.totalorder %v3789_v6, %v216_v57  ;;  %vm567_vm0 = vcmp.eq.s32.totalorder %v3789_v6, %v213_v58  ;;  %317 = vperm.xlu1 %3500, %v88_v54   ;;  %314 = vperm.xlu0 %3499, %v87_v55   ;;  %v98_v55 = vld [vmem:[%s5093_s0 + $0x1d8] sm:$0xff] }
  0x9b   :  { %v696_v59 = vsel %vm568_vm15, 1.0, %v3524_v13  ;;  %v695_v60 = vsel %vm567_vm0, 1.0, %v3524_v13  ;;  %3333 = vmatprep.mubr.msk.bf16.mxu0 %vm905_vm4, %v815_v56  ;;  %v97_v56 = vld [vmem:[%s5093_s0 + $0x1d0] sm:$0xff] }
  0x9c   :  { %v816_v63 = vpack.c.bf16 %v696_v59, %v695_v60 }
  0x9d   :  { %v222_v0 = vpop.permute.xlu1 %221  ;;  %v219_v1 = vpop.permute.xlu0 %218 }
  0x9e   :  { %vm570_vm1 = vcmp.eq.s32.totalorder %v3789_v6, %v222_v0  ;;  %vm569_vm2 = vcmp.eq.s32.totalorder %v3789_v6, %v219_v1  ;;  %323 = vperm.xlu1 %3500, %v90_v61   ;;  %320 = vperm.xlu0 %3499, %v89_v62   ;;  %v148_v62 = vld [vmem:[%s5093_s0 + $0x368] sm:$0xff] }
  0x9f   :  { %v698_v2 = vsel %vm570_vm1, 1.0, %v3524_v13  ;;  %v697_v3 = vsel %vm569_vm2, 1.0, %v3524_v13 }
  0xa0   :  { %v817_v7 = vpack.c.bf16 %v698_v2, %v697_v3  ;;  %3334 = vmatmul.mubr.msk.bf16.gmra.mxu0 %vm905_vm4, %v816_v63  ;;  %v147_v63 = vld [vmem:[%s5093_s0 + $0x360] sm:$0xff] }
  0xa1   :  { %v228_v8 = vpop.permute.xlu1 %227  ;;  %v225_v9 = vpop.permute.xlu0 %224 }
  0xa2   :  { %vm572_vm3 = vcmp.eq.s32.totalorder %v3789_v6, %v228_v8  ;;  %vm571_vm5 = vcmp.eq.s32.totalorder %v3789_v6, %v225_v9  ;;  %473 = vperm.xlu1 %3500, %v140_v4   ;;  %470 = vperm.xlu0 %3499, %v139_v5   ;;  %v150_v5 = vld [vmem:[%s5093_s0 + $0x378] sm:$0xff] }
  0xa3   :  { %v700_v10 = vsel %vm572_vm3, 1.0, %v3524_v13  ;;  %v699_v11 = vsel %vm571_vm5, 1.0, %v3524_v13  ;;  %3337 = vmatprep.mubr.msk.bf16.mxu0 %vm905_vm4, %v817_v7  ;;  %v149_v7 = vld [vmem:[%s5093_s0 + $0x370] sm:$0xff] }
  0xa4   :  { %v818_v15 = vpack.c.bf16 %v700_v10, %v699_v11 }
  0xa5   :  { %v234_v16 = vpop.permute.xlu1 %233  ;;  %v231_v17 = vpop.permute.xlu0 %230 }
  0xa6   :  { %vm574_vm6 = vcmp.eq.s32.totalorder %v3789_v6, %v234_v16  ;;  %vm573_vm7 = vcmp.eq.s32.totalorder %v3789_v6, %v231_v17  ;;  %479 = vperm.xlu1 %3500, %v142_v12   ;;  %476 = vperm.xlu0 %3499, %v141_v14   ;;  %v100_v14 = vld [vmem:[%s5093_s0 + $0x1e8] sm:$0xff] }
  0xa7   :  { %v702_v18 = vsel %vm574_vm6, 1.0, %v3524_v13  ;;  %v701_v19 = vsel %vm573_vm7, 1.0, %v3524_v13 }
  0xa8   :  { %v819_v22 = vpack.c.bf16 %v702_v18, %v701_v19  ;;  %3338 = vmatmul.mubr.msk.bf16.gmra.mxu0 %vm905_vm4, %v818_v15  ;;  %v99_v15 = vld [vmem:[%s5093_s0 + $0x1e0] sm:$0xff] }
  0xa9   :  { %v240_v23 = vpop.permute.xlu1 %239  ;;  %v237_v24 = vpop.permute.xlu0 %236 }
  0xaa   :  { %vm576_vm8 = vcmp.eq.s32.totalorder %v3789_v6, %v240_v23  ;;  %vm575_vm9 = vcmp.eq.s32.totalorder %v3789_v6, %v237_v24  ;;  %329 = vperm.xlu1 %3500, %v92_v20   ;;  %326 = vperm.xlu0 %3499, %v91_v21   ;;  %v102_v21 = vld [vmem:[%s5093_s0 + $0x1f8] sm:$0xff] }
  0xab   :  { %v704_v25 = vsel %vm576_vm8, 1.0, %v3524_v13  ;;  %v703_v26 = vsel %vm575_vm9, 1.0, %v3524_v13  ;;  %3341 = vmatprep.mubr.msk.bf16.mxu0 %vm905_vm4, %v819_v22  ;;  %v101_v22 = vld [vmem:[%s5093_s0 + $0x1f0] sm:$0xff] }
  0xac   :  { %v820_v29 = vpack.c.bf16 %v704_v25, %v703_v26 }
  0xad   :  { %v390_v30 = vpop.permute.xlu1 %389  ;;  %v387_v31 = vpop.permute.xlu0 %386 }
  0xae   :  { %vm626_vm10 = vcmp.eq.s32.totalorder %v3789_v6, %v390_v30  ;;  %vm625_vm11 = vcmp.eq.s32.totalorder %v3789_v6, %v387_v31  ;;  %335 = vperm.xlu1 %3500, %v94_v27   ;;  %332 = vperm.xlu0 %3499, %v93_v28   ;;  %v152_v28 = vld [vmem:[%s5093_s0 + $0x388] sm:$0xff] }
  0xaf   :  { %v753_v34 = vsel %vm625_vm11, 1.0, %v3524_v13  ;;  %v754_v35 = vsel %vm626_vm10, 1.0, %v3524_v13 }
  0xb0   :  { %3342 = vmatmul.mubr.msk.bf16.gmra.mxu0 %vm905_vm4, %v820_v29  ;;  %v845_v36 = vpack.c.bf16 %v754_v35, %v753_v34  ;;  %v151_v29 = vld [vmem:[%s5093_s0 + $0x380] sm:$0xff]  ;;  %v154_v35 = vld [vmem:[%s5093_s0 + $0x398] sm:$0xff] }
  0xb1   :  { %v396_v37 = vpop.permute.xlu1 %395  ;;  %v393_v38 = vpop.permute.xlu0 %392 }
  0xb2   :  { %vm628_vm12 = vcmp.eq.s32.totalorder %v3789_v6, %v396_v37  ;;  %vm627_vm13 = vcmp.eq.s32.totalorder %v3789_v6, %v393_v38  ;;  %485 = vperm.xlu1 %3500, %v144_v32   ;;  %482 = vperm.xlu0 %3499, %v143_v33  }
  0xb3   :  { %v756_v39 = vsel %vm628_vm12, 1.0, %v3524_v13  ;;  %v755_v40 = vsel %vm627_vm13, 1.0, %v3524_v13  ;;  %3393 = vmatprep.mubr.msk.bf16.mxu1 %vm905_vm4, %v845_v36  ;;  %v153_v36 = vld [vmem:[%s5093_s0 + $0x390] sm:$0xff] }
  0xb4   :  { %v846_v43 = vpack.c.bf16 %v756_v39, %v755_v40 }
  0xb5   :  { %v246_v44 = vpop.permute.xlu1 %245  ;;  %v243_v45 = vpop.permute.xlu0 %242 }
  0xb6   :  { %vm578_vm14 = vcmp.eq.s32.totalorder %v3789_v6, %v246_v44  ;;  %vm577_vm15 = vcmp.eq.s32.totalorder %v3789_v6, %v243_v45  ;;  %491 = vperm.xlu1 %3500, %v146_v41   ;;  %488 = vperm.xlu0 %3499, %v145_v42   ;;  %v104_v42 = vld [vmem:[%s5093_s0 + $0x208] sm:$0xff] }
  0xb7   :  { %v706_v46 = vsel %vm578_vm14, 1.0, %v3524_v13  ;;  %v705_v47 = vsel %vm577_vm15, 1.0, %v3524_v13  ;;  %3394 = vmatmul.mubr.msk.bf16.vlgmr.msra.gmra.mxu1 %vm905_vm4, %v846_v43  ;;  %v103_v43 = vld [vmem:[%s5093_s0 + $0x200] sm:$0xff] }
  0xb8   :  { %v821_v50 = vpack.c.bf16 %v706_v46, %v705_v47 }
  0xb9   :  { %v252_v51 = vpop.permute.xlu1 %251  ;;  %v249_v52 = vpop.permute.xlu0 %248 }
  0xba   :  { %vm580_vm0 = vcmp.eq.s32.totalorder %v3789_v6, %v252_v51  ;;  %vm579_vm1 = vcmp.eq.s32.totalorder %v3789_v6, %v249_v52  ;;  %341 = vperm.xlu1 %3500, %v96_v48   ;;  %338 = vperm.xlu0 %3499, %v95_v49   ;;  %v106_v49 = vld [vmem:[%s5093_s0 + $0x218] sm:$0xff] }
  0xbb   :  { %v708_v53 = vsel %vm580_vm0, 1.0, %v3524_v13  ;;  %v707_v54 = vsel %vm579_vm1, 1.0, %v3524_v13  ;;  %3345 = vmatprep.mubr.msk.bf16.mxu0 %vm905_vm4, %v821_v50  ;;  %v105_v50 = vld [vmem:[%s5093_s0 + $0x210] sm:$0xff] }
  0xbc   :  { %v822_v57 = vpack.c.bf16 %v708_v53, %v707_v54 }
  0xbd   :  { %v402_v58 = vpop.permute.xlu1 %401  ;;  %v399_v59 = vpop.permute.xlu0 %398 }
  0xbe   :  { %vm630_vm2 = vcmp.eq.s32.totalorder %v3789_v6, %v402_v58  ;;  %vm629_vm3 = vcmp.eq.s32.totalorder %v3789_v6, %v399_v59  ;;  %347 = vperm.xlu1 %3500, %v98_v55   ;;  %344 = vperm.xlu0 %3499, %v97_v56   ;;  %v156_v56 = vld [vmem:[%s5093_s0 + $0x3a8] sm:$0xff] }
  0xbf   :  { %v758_v60 = vsel %vm630_vm2, 1.0, %v3524_v13  ;;  %v757_v61 = vsel %vm629_vm3, 1.0, %v3524_v13  ;;  %3346 = vmatmul.mubr.msk.bf16.gmra.mxu0 %vm905_vm4, %v822_v57  ;;  %v155_v57 = vld [vmem:[%s5093_s0 + $0x3a0] sm:$0xff] }
  0xc0   :  { %v847_v0 = vpack.c.bf16 %v758_v60, %v757_v61 }
  0xc1   :  { %v408_v1 = vpop.permute.xlu1 %407  ;;  %v405_v2 = vpop.permute.xlu0 %404 }
  0xc2   :  { %vm632_vm5 = vcmp.eq.s32.totalorder %v3789_v6, %v408_v1  ;;  %vm631_vm6 = vcmp.eq.s32.totalorder %v3789_v6, %v405_v2  ;;  %497 = vperm.xlu1 %3500, %v148_v62   ;;  %494 = vperm.xlu0 %3499, %v147_v63   ;;  %v158_v63 = vld [vmem:[%s5093_s0 + $0x3b8] sm:$0xff]  ;;  %v1644_v2 = vld [vmem:[%s5095_s1 + $0x8] sm:$0xff] }
  0xc3   :  { %v760_v3 = vsel %vm632_vm5, 1.0, %v3524_v13  ;;  %v759_v4 = vsel %vm631_vm6, 1.0, %v3524_v13  ;;  %3397 = vmatprep.mubr.msk.bf16.mxu1 %vm905_vm4, %v847_v0  ;;  %v157_v0 = vld [vmem:[%s5093_s0 + $0x3b0] sm:$0xff] }
  0xc4   :  { %v848_v8 = vpack.c.bf16 %v760_v3, %v759_v4 }
  0xc5   :  { %v258_v9 = vpop.permute.xlu1 %257  ;;  %v255_v10 = vpop.permute.xlu0 %254 }
  0xc6   :  { %vm582_vm7 = vcmp.eq.s32.totalorder %v3789_v6, %v258_v9  ;;  %vm581_vm8 = vcmp.eq.s32.totalorder %v3789_v6, %v255_v10  ;;  %503 = vperm.xlu1 %3500, %v150_v5   ;;  %500 = vperm.xlu0 %3499, %v149_v7   ;;  %v1643_v5 = vld [vmem:[%s5095_s1] sm:$0xff]  ;;  %v108_v9 = vld [vmem:[%s5093_s0 + $0x228] sm:$0xff] }
  0xc7   :  { %v710_v11 = vsel %vm582_vm7, 1.0, %v3524_v13  ;;  %v709_v12 = vsel %vm581_vm8, 1.0, %v3524_v13  ;;  %3398 = vmatmul.mubr.msk.bf16.gmra.mxu1 %vm905_vm4, %v848_v8  ;;  %v107_v10 = vld [vmem:[%s5093_s0 + $0x220] sm:$0xff] }
  0xc8   :  { %v823_v16 = vpack.c.bf16 %v710_v11, %v709_v12  ;;  %v1646_v11 = vld [vmem:[%s5095_s1 + $0x18] sm:$0xff] }
  0xc9   :  { %v264_v17 = vpop.permute.xlu1 %263  ;;  %v261_v18 = vpop.permute.xlu0 %260 }
  0xca   :  { %vm584_vm9 = vcmp.eq.s32.totalorder %v3789_v6, %v264_v17  ;;  %vm583_vm10 = vcmp.eq.s32.totalorder %v3789_v6, %v261_v18  ;;  %353 = vperm.xlu1 %3500, %v100_v14   ;;  %350 = vperm.xlu0 %3499, %v99_v15   ;;  %v1645_v14 = vld [vmem:[%s5095_s1 + $0x10] sm:$0xff] }
  0xcb   :  { %v712_v19 = vsel %vm584_vm9, 1.0, %v3524_v13  ;;  %v711_v20 = vsel %vm583_vm10, 1.0, %v3524_v13  ;;  %3349 = vmatprep.mubr.msk.bf16.mxu0 %vm905_vm4, %v823_v16  ;;  %vm2230_vm10 = vcmp.gt.s32.totalorder %v1644_v2, 1 }
  0xcc   :  { %v824_v23 = vpack.c.bf16 %v712_v19, %v711_v20  ;;  %v2231_v17 = vsel %vm2230_vm10, %v1644_v2, 1  ;;  %v110_v20 = vld [vmem:[%s5093_s0 + $0x238] sm:$0xff] }
  0xcd   :  { %v414_v24 = vpop.permute.xlu1 %413  ;;  %v411_v25 = vpop.permute.xlu0 %410 }
  0xce   :  { %vm634_vm11 = vcmp.eq.s32.totalorder %v3789_v6, %v414_v24  ;;  %vm633_vm12 = vcmp.eq.s32.totalorder %v3789_v6, %v411_v25  ;;  %359 = vperm.xlu1 %3500, %v102_v21   ;;  %356 = vperm.xlu0 %3499, %v101_v22   ;;  %v109_v21 = vld [vmem:[%s5093_s0 + $0x230] sm:$0xff]  ;;  %v1648_v24 = vld [vmem:[%s5095_s1 + $0x28] sm:$0xff] }
  0xcf   :  { %v762_v26 = vsel %vm634_vm11, 1.0, %v3524_v13  ;;  %v761_v27 = vsel %vm633_vm12, 1.0, %v3524_v13  ;;  %3350 = vmatmul.mubr.msk.bf16.gmra.mxu0 %vm905_vm4, %v824_v23  ;;  %vm2228_vm11 = vcmp.gt.s32.totalorder %v1643_v5, 1 }
  0xd0   :  { %v849_v30 = vpack.c.bf16 %v762_v26, %v761_v27  ;;  %v2229_v22 = vsel %vm2228_vm11, %v1643_v5, 1  ;;  %v2245_v27 = vcvt.s32.f32 %v2231_v17 }
  0xd1   :  { %v420_v31 = vpop.permute.xlu1 %419  ;;  %v417_v32 = vpop.permute.xlu0 %416 }
  0xd2   :  { %vm636_vm13 = vcmp.eq.s32.totalorder %v3789_v6, %v420_v31  ;;  %vm635_vm14 = vcmp.eq.s32.totalorder %v3789_v6, %v417_v32  ;;  %509 = vperm.xlu1 %3500, %v152_v28   ;;  %506 = vperm.xlu0 %3499, %v151_v29   ;;  %v1647_v29 = vld [vmem:[%s5095_s1 + $0x20] sm:$0xff]  ;;  %3505 = vrcp.f32 %v2245_v27 }
  0xd3   :  { %v764_v33 = vsel %vm636_vm13, 1.0, %v3524_v13  ;;  %v763_v34 = vsel %vm635_vm14, 1.0, %v3524_v13  ;;  %3401 = vmatprep.mubr.msk.bf16.mxu1 %vm905_vm4, %v849_v30  ;;  %vm2234_vm14 = vcmp.gt.s32.totalorder %v1646_v11, 1  ;;  %v2244_v30 = vcvt.s32.f32 %v2229_v22 }
  0xd4   :  { %v850_v37 = vpack.c.bf16 %v764_v33, %v763_v34  ;;  %v2235_v28 = vsel %vm2234_vm14, %v1646_v11, 1  ;;  %v160_v34 = vld [vmem:[%s5093_s0 + $0x3c8] sm:$0xff] }
  0xd5   :  { %v270_v38 = vpop.permute.xlu1 %269  ;;  %v267_v39 = vpop.permute.xlu0 %266  ;;  %3507 = vrcp.f32 %v2244_v30 }
  0xd6   :  { %vm586_vm15 = vcmp.eq.s32.totalorder %v3789_v6, %v270_v38  ;;  %vm585_vm0 = vcmp.eq.s32.totalorder %v3789_v6, %v267_v39  ;;  %515 = vperm.xlu1 %3500, %v154_v35   ;;  %512 = vperm.xlu0 %3499, %v153_v36   ;;  %v159_v35 = vld [vmem:[%s5093_s0 + $0x3c0] sm:$0xff]  ;;  %v1650_v38 = vld [vmem:[%s5095_s1 + $0x38] sm:$0xff] }
  0xd7   :  { %v714_v40 = vsel %vm586_vm15, 1.0, %v3524_v13  ;;  %v713_v41 = vsel %vm585_vm0, 1.0, %v3524_v13  ;;  %3402 = vmatmul.mubr.msk.bf16.gmra.mxu1 %vm905_vm4, %v850_v37  ;;  %vm2232_vm15 = vcmp.gt.s32.totalorder %v1645_v14, 1  ;;  %v2247_v37 = vcvt.s32.f32 %v2235_v28 }
  0xd8   :  { %v825_v44 = vpack.c.bf16 %v714_v40, %v713_v41  ;;  %v2233_v31 = vsel %vm2232_vm15, %v1645_v14, 1 }
  0xd9   :  { %v276_v45 = vpop.permute.xlu1 %275  ;;  %v273_v46 = vpop.permute.xlu0 %272  ;;  %v2246_v41 = vcvt.s32.f32 %v2233_v31  ;;  %3509 = vrcp.f32 %v2247_v37 }
  0xda   :  { %vm588_vm1 = vcmp.eq.s32.totalorder %v3789_v6, %v276_v45  ;;  %vm587_vm2 = vcmp.eq.s32.totalorder %v3789_v6, %v273_v46  ;;  %365 = vperm.xlu1 %3500, %v104_v42   ;;  %362 = vperm.xlu0 %3499, %v103_v43   ;;  %v1649_v42 = vld [vmem:[%s5095_s1 + $0x30] sm:$0xff]  ;;  %v162_v46 = vld [vmem:[%s5093_s0 + $0x3d8] sm:$0xff] }
  0xdb   :  { %v716_v47 = vsel %vm588_vm1, 1.0, %v3524_v13  ;;  %v715_v48 = vsel %vm587_vm2, 1.0, %v3524_v13  ;;  %3353 = vmatprep.mubr.msk.bf16.mxu0 %vm905_vm4, %v825_v44  ;;  %vm2238_vm2 = vcmp.gt.s32.totalorder %v1648_v24, 1  ;;  %3511 = vrcp.f32 %v2246_v41 }
  0xdc   :  { %v826_v51 = vpack.c.bf16 %v716_v47, %v715_v48  ;;  %v2239_v43 = vsel %vm2238_vm2, %v1648_v24, 1  ;;  %v161_v47 = vld [vmem:[%s5093_s0 + $0x3d0] sm:$0xff] }
  0xdd   :  { %v426_v52 = vpop.permute.xlu1 %425  ;;  %v423_v53 = vpop.permute.xlu0 %422 }
  0xde   :  { %vm638_vm3 = vcmp.eq.s32.totalorder %v3789_v6, %v426_v52  ;;  %vm637_vm5 = vcmp.eq.s32.totalorder %v3789_v6, %v423_v53  ;;  %371 = vperm.xlu1 %3500, %v106_v49   ;;  %368 = vperm.xlu0 %3499, %v105_v50   ;;  %v2249_v52 = vcvt.s32.f32 %v2239_v43 }
  0xdf   :  { %v766_v54 = vsel %vm638_vm3, 1.0, %v3524_v13  ;;  %v765_v55 = vsel %vm637_vm5, 1.0, %v3524_v13  ;;  %3354 = vmatmul.mubr.msk.bf16.gmra.mxu0 %vm905_vm4, %v826_v51  ;;  %vm2236_vm3 = vcmp.gt.s32.totalorder %v1647_v29, 1 }
  0xe0   :  { %v851_v58 = vpack.c.bf16 %v766_v54, %v765_v55  ;;  %v2237_v48 = vsel %vm2236_vm3, %v1647_v29, 1  ;;  %3513 = vrcp.f32 %v2249_v52 }
  0xe1   :  { %v432_v59 = vpop.permute.xlu1 %431  ;;  %v429_v60 = vpop.permute.xlu0 %428  ;;  %v2248_v53 = vcvt.s32.f32 %v2237_v48 }
  0xe2   :  { %vm640_vm6 = vcmp.eq.s32.totalorder %v3789_v6, %v432_v59  ;;  %vm639_vm7 = vcmp.eq.s32.totalorder %v3789_v6, %v429_v60  ;;  %521 = vperm.xlu1 %3500, %v156_v56   ;;  %518 = vperm.xlu0 %3499, %v155_v57   ;;  %v164_v57 = vld [vmem:[%s5093_s0 + $0x3e8] sm:$0xff] }
  0xe3   :  { %v768_v61 = vsel %vm640_vm6, 1.0, %v3524_v13  ;;  %v767_v62 = vsel %vm639_vm7, 1.0, %v3524_v13  ;;  %3405 = vmatprep.mubr.msk.bf16.mxu1 %vm905_vm4, %v851_v58  ;;  %vm2242_vm7 = vcmp.gt.s32.totalorder %v1650_v38, 1  ;;  %v163_v58 = vld [vmem:[%s5093_s0 + $0x3e0] sm:$0xff]  ;;  %3515 = vrcp.f32 %v2248_v53 }
  0xe4   :  { %v852_v1 = vpack.c.bf16 %v768_v61, %v767_v62  ;;  %v2243_v54 = vsel %vm2242_vm7, %v1650_v38, 1 }
  0xe5   :  { %v282_v3 = vpop.permute.xlu1 %281  ;;  %v279_v4 = vpop.permute.xlu0 %278 }
  0xe6   :  { %vm590_vm8 = vcmp.eq.s32.totalorder %v3789_v6, %v282_v3  ;;  %vm589_vm9 = vcmp.eq.s32.totalorder %v3789_v6, %v279_v4  ;;  %527 = vperm.xlu1 %3500, %v158_v63   ;;  %524 = vperm.xlu0 %3499, %v157_v0   ;;  %v2251_v63 = vcvt.s32.f32 %v2243_v54  ;;  %v166_v3 = vld [vmem:[%s5093_s0 + $0x3f8] sm:$0xff]  ;;  %v165_v4 = vld [vmem:[%s5093_s0 + $0x3f0] sm:$0xff] }
  0xe7   :  { %v718_v7 = vsel %vm590_vm8, 1.0, %v3524_v13  ;;  %v717_v8 = vsel %vm589_vm9, 1.0, %v3524_v13  ;;  %3406 = vmatmul.mubr.msk.bf16.gmra.mxu1 %vm905_vm4, %v852_v1  ;;  %vm2240_vm8 = vcmp.gt.s32.totalorder %v1649_v42, 1 }
  0xe8   :  { %v827_v12 = vpack.c.bf16 %v718_v7, %v717_v8  ;;  %v2241_v59 = vsel %vm2240_vm8, %v1649_v42, 1  ;;  %3517 = vrcp.f32 %v2251_v63 }
  0xe9   :  { %v288_v15 = vpop.permute.xlu1 %287  ;;  %v285_v16 = vpop.permute.xlu0 %284  ;;  %v2250_v0 = vcvt.s32.f32 %v2241_v59 }
  0xea   :  { %vm592_vm12 = vcmp.eq.s32.totalorder %v3789_v6, %v288_v15  ;;  %vm591_vm13 = vcmp.eq.s32.totalorder %v3789_v6, %v285_v16  ;;  %377 = vperm.xlu1 %3500, %v108_v9   ;;  %374 = vperm.xlu0 %3499, %v107_v10   ;;  %v3506_v9 = vpop.eup %3505 }
  0xeb   :  { %v720_v18 = vsel %vm592_vm12, 1.0, %v3524_v13  ;;  %v719_v19 = vsel %vm591_vm13, 1.0, %v3524_v13  ;;  %3357 = vmatprep.mubr.msk.bf16.mxu0 %vm905_vm4, %v827_v12  ;;  %3519 = vrcp.f32 %v2250_v0  ;;  %v3508_v10 = vpop.eup %3507 }
  0xec   :  { %v828_v23 = vpack.c.bf16 %v720_v18, %v719_v19  ;;  %v3510_v15 = vpop.eup %3509 }
  0xed   :  { %v438_v25 = vpop.permute.xlu1 %437  ;;  %v435_v26 = vpop.permute.xlu0 %434 }
  0xee   :  { %vm642_vm0 = vcmp.eq.s32.totalorder %v3789_v6, %v438_v25  ;;  %vm641_vm1 = vcmp.eq.s32.totalorder %v3789_v6, %v435_v26  ;;  %383 = vperm.xlu1 %3500, %v110_v20   ;;  %380 = vperm.xlu0 %3499, %v109_v21   ;;  %v3512_v18 = vpop.eup %3511 }
  0xef   :  { %v770_v32 = vsel %vm642_vm0, 1.0, %v3524_v13  ;;  %v769_v33 = vsel %vm641_vm1, 1.0, %v3524_v13  ;;  %3358 = vmatmul.mubr.msk.bf16.gmra.mxu0 %vm905_vm4, %v828_v23  ;;  %v3514_v24 = vpop.eup %3513 }
  0xf0   :  { %v853_v36 = vpack.c.bf16 %v770_v32, %v769_v33  ;;  %v3516_v25 = vpop.eup %3515 }
  0xf1   :  { %v444_v39 = vpop.permute.xlu1 %443  ;;  %v441_v40 = vpop.permute.xlu0 %440 }
  0xf2   :  { %vm644_vm5 = vcmp.eq.s32.totalorder %v3789_v6, %v444_v39  ;;  %vm643_vm6 = vcmp.eq.s32.totalorder %v3789_v6, %v441_v40  ;;  %533 = vperm.xlu1 %3500, %v160_v34   ;;  %530 = vperm.xlu0 %3499, %v159_v35  }
  0xf3   :  { %v772_v44 = vsel %vm644_vm5, 1.0, %v3524_v13  ;;  %v771_v45 = vsel %vm643_vm6, 1.0, %v3524_v13  ;;  %3409 = vmatprep.mubr.msk.bf16.mxu1 %vm905_vm4, %v853_v36 }
  0xf4   :  { %v854_v49 = vpack.c.bf16 %v772_v44, %v771_v45 }
  0xf5   :  { %v294_v50 = vpop.permute.xlu1 %293  ;;  %v291_v51 = vpop.permute.xlu0 %290 }
  0xf6   :  { %vm594_vm9 = vcmp.eq.s32.totalorder %v3789_v6, %v294_v50  ;;  %vm593_vm10 = vcmp.eq.s32.totalorder %v3789_v6, %v291_v51  ;;  %539 = vperm.xlu1 %3500, %v162_v46   ;;  %536 = vperm.xlu0 %3499, %v161_v47   ;;  %v3518_v31 = vpop.eup %3517 }
  0xf7   :  { %v722_v55 = vsel %vm594_vm9, 1.0, %v3524_v13  ;;  %v721_v56 = vsel %vm593_vm10, 1.0, %v3524_v13  ;;  %3410 = vmatmul.mubr.msk.bf16.gmra.mxu1 %vm905_vm4, %v854_v49 }
  0xf8   :  { %v829_v60 = vpack.c.bf16 %v722_v55, %v721_v56  ;;  %v3520_v32 = vpop.eup %3519 }
  0xf9   :  { %v300_v61 = vpop.permute.xlu1 %299  ;;  %v297_v62 = vpop.permute.xlu0 %296 }
  0xfa   :  { %vm596_vm11 = vcmp.eq.s32.totalorder %v3789_v6, %v300_v61  ;;  %vm595_vm12 = vcmp.eq.s32.totalorder %v3789_v6, %v297_v62  ;;  %545 = vperm.xlu1 %3500, %v164_v57   ;;  %542 = vperm.xlu0 %3499, %v163_v58  }
  0xfb   :  { %v724_v1 = vsel %vm596_vm11, 1.0, %v3524_v13  ;;  %v723_v2 = vsel %vm595_vm12, 1.0, %v3524_v13  ;;  %3361 = vmatprep.mubr.msk.bf16.mxu0 %vm905_vm4, %v829_v60 }
  0xfc   :  { %v830_v5 = vpack.c.bf16 %v724_v1, %v723_v2 }
  0xfd   :  { %v450_v7 = vpop.permute.xlu1 %449  ;;  %v447_v8 = vpop.permute.xlu0 %446 }
  0xfe   :  { %vm646_vm13 = vcmp.eq.s32.totalorder %v3789_v6, %v450_v7  ;;  %vm645_vm14 = vcmp.eq.s32.totalorder %v3789_v6, %v447_v8  ;;  %551 = vperm.xlu1 %3500, %v166_v3   ;;  %548 = vperm.xlu0 %3499, %v165_v4  }
  0xff   :  { %v774_v11 = vsel %vm646_vm13, 1.0, %v3524_v13  ;;  %v773_v12 = vsel %vm645_vm14, 1.0, %v3524_v13  ;;  %3362 = vmatmul.mubr.msk.bf16.gmra.mxu0 %vm905_vm4, %v830_v5 }
 0x100   :  { %v855_v14 = vpack.c.bf16 %v774_v11, %v773_v12 }
 0x101   :  { %v456_v16 = vpop.permute.xlu1 %455  ;;  %v453_v17 = vpop.permute.xlu0 %452 }
 0x102   :  { %vm648_vm15 = vcmp.eq.s32.totalorder %v3789_v6, %v456_v16  ;;  %vm647_vm0 = vcmp.eq.s32.totalorder %v3789_v6, %v453_v17  ;;  %2274 = vperm.xlu1 %3500, %v3506_v9   ;;  %2270 = vperm.xlu0 %3499, %v3508_v10  }
 0x103   :  { %v776_v19 = vsel %vm648_vm15, 1.0, %v3524_v13  ;;  %v775_v20 = vsel %vm647_vm0, 1.0, %v3524_v13  ;;  %3413 = vmatprep.mubr.msk.bf16.mxu1 %vm905_vm4, %v855_v14 }
 0x104   :  { %v856_v21 = vpack.c.bf16 %v776_v19, %v775_v20 }
 0x105   :  { %v306_v22 = vpop.permute.xlu1 %305  ;;  %v303_v23 = vpop.permute.xlu0 %302 }
 0x106   :  { %vm598_vm1 = vcmp.eq.s32.totalorder %v3789_v6, %v306_v22  ;;  %vm597_vm2 = vcmp.eq.s32.totalorder %v3789_v6, %v303_v23  ;;  %2282 = vperm.xlu1 %3500, %v3510_v15   ;;  %2278 = vperm.xlu0 %3499, %v3512_v18  }
 0x107   :  { %v726_v26 = vsel %vm598_vm1, 1.0, %v3524_v13  ;;  %v725_v27 = vsel %vm597_vm2, 1.0, %v3524_v13  ;;  %3414 = vmatmul.mubr.msk.bf16.gmra.mxu1 %vm905_vm4, %v856_v21 }
 0x108   :  { %v831_v28 = vpack.c.bf16 %v726_v26, %v725_v27 }
 0x109   :  { %v312_v29 = vpop.permute.xlu1 %311  ;;  %v309_v30 = vpop.permute.xlu0 %308 }
 0x10a   :  { %vm600_vm3 = vcmp.eq.s32.totalorder %v3789_v6, %v312_v29  ;;  %vm599_vm5 = vcmp.eq.s32.totalorder %v3789_v6, %v309_v30  ;;  %2290 = vperm.xlu1 %3500, %v3514_v24   ;;  %2286 = vperm.xlu0 %3499, %v3516_v25  }
 0x10b   :  { %v728_v33 = vsel %vm600_vm3, 1.0, %v3524_v13  ;;  %v727_v34 = vsel %vm599_vm5, 1.0, %v3524_v13  ;;  %3365 = vmatprep.mubr.msk.bf16.mxu0 %vm905_vm4, %v831_v28 }
 0x10c   :  { %v832_v35 = vpack.c.bf16 %v728_v33, %v727_v34  ;;  %v2629_v33 = vld [vmem:[%s5096_s5 + $0x18] sm:$0xff]  ;;  %v2628_v34 = vld [vmem:[%s5096_s5 + $0x10] sm:$0xff] }
 0x10d   :  { %v462_v36 = vpop.permute.xlu1 %461  ;;  %v459_v37 = vpop.permute.xlu0 %458  ;;  %3449 = vmatprep.subr.mxu1 %v2629_v33 }
 0x10e   :  { %vm650_vm6 = vcmp.eq.s32.totalorder %v3789_v6, %v462_v36  ;;  %vm649_vm7 = vcmp.eq.s32.totalorder %v3789_v6, %v459_v37  ;;  %2298 = vperm.xlu1 %3500, %v3518_v31   ;;  %2294 = vperm.xlu0 %3499, %v3520_v32  }
 0x10f   :  { %v778_v38 = vsel %vm650_vm6, 1.0, %v3524_v13  ;;  %v777_v39 = vsel %vm649_vm7, 1.0, %v3524_v13  ;;  %3366 = vmatmul.mubr.msk.bf16.gmra.mxu0 %vm905_vm4, %v832_v35  ;;  %3450 = vmatpush3.msra.mxu1 %v2629_v33 }
 0x110   :  { %v857_v40 = vpack.c.bf16 %v778_v38, %v777_v39  ;;  %3451 = vmatprep.subr.mxu1 %v2628_v34 }
 0x111   :  { %v468_v41 = vpop.permute.xlu1 %467  ;;  %v465_v42 = vpop.permute.xlu0 %464  ;;  %3452 = vmatpush3.msra.mxu1 %v2628_v34 }
 0x112   :  { %vm652_vm8 = vcmp.eq.s32.totalorder %v3789_v6, %v468_v41  ;;  %vm651_vm9 = vcmp.eq.s32.totalorder %v3789_v6, %v465_v42  ;;  %3417 = vmatprep.mubr.msk.bf16.mxu1 %vm905_vm4, %v857_v40 }
 0x113   :  { %v780_v43 = vsel %vm652_vm8, 1.0, %v3524_v13  ;;  %v779_v44 = vsel %vm651_vm9, 1.0, %v3524_v13 }
 0x114   :  { %v858_v45 = vpack.c.bf16 %v780_v43, %v779_v44  ;;  %v2627_v43 = vld [vmem:[%s5096_s5 + $0x8] sm:$0xff] }
 0x115   :  { %v318_v46 = vpop.permute.xlu1 %317  ;;  %v315_v47 = vpop.permute.xlu0 %314  ;;  %3453 = vmatprep.subr.mxu1 %v2627_v43 }
 0x116   :  { %vm602_vm10 = vcmp.eq.s32.totalorder %v3789_v6, %v318_v46  ;;  %vm601_vm11 = vcmp.eq.s32.totalorder %v3789_v6, %v315_v47  ;;  %3418 = vmatmul.mubr.msk.bf16.gmra.mxu1 %vm905_vm4, %v858_v45  ;;  %v2626_v47 = vld [vmem:[%s5096_s5] sm:$0xff] }
 0x117   :  { %v730_v48 = vsel %vm602_vm10, 1.0, %v3524_v13  ;;  %v729_v49 = vsel %vm601_vm11, 1.0, %v3524_v13  ;;  %3454 = vmatpush3.msra.mxu1 %v2627_v43 }
 0x118   :  { %v833_v50 = vpack.c.bf16 %v730_v48, %v729_v49  ;;  %3455 = vmatprep.subr.mxu1 %v2626_v47 }
 0x119   :  { %v324_v51 = vpop.permute.xlu1 %323  ;;  %v321_v52 = vpop.permute.xlu0 %320  ;;  %3456 = vmatpush3.msra.mxu1 %v2626_v47 }
 0x11a   :  { %vm604_vm12 = vcmp.eq.s32.totalorder %v3789_v6, %v324_v51  ;;  %vm603_vm13 = vcmp.eq.s32.totalorder %v3789_v6, %v321_v52  ;;  %3369 = vmatprep.mubr.msk.bf16.mxu0 %vm905_vm4, %v833_v50 }
 0x11b   :  { %v732_v53 = vsel %vm604_vm12, 1.0, %v3524_v13  ;;  %v731_v54 = vsel %vm603_vm13, 1.0, %v3524_v13 }
 0x11c   :  { %v834_v55 = vpack.c.bf16 %v732_v53, %v731_v54 }
 0x11d   :  { %v474_v56 = vpop.permute.xlu1 %473  ;;  %v471_v57 = vpop.permute.xlu0 %470 }
 0x11e   :  { %vm654_vm14 = vcmp.eq.s32.totalorder %v3789_v6, %v474_v56  ;;  %vm653_vm15 = vcmp.eq.s32.totalorder %v3789_v6, %v471_v57  ;;  %3370 = vmatmul.mubr.msk.bf16.gmra.mxu0 %vm905_vm4, %v834_v55 }
 0x11f   :  { %v782_v58 = vsel %vm654_vm14, 1.0, %v3524_v13  ;;  %v781_v59 = vsel %vm653_vm15, 1.0, %v3524_v13 }
 0x120   :  { %v859_v60 = vpack.c.bf16 %v782_v58, %v781_v59 }
 0x121   :  { %v480_v61 = vpop.permute.xlu1 %479  ;;  %v477_v62 = vpop.permute.xlu0 %476 }
 0x122   :  { %vm656_vm0 = vcmp.eq.s32.totalorder %v3789_v6, %v480_v61  ;;  %vm655_vm1 = vcmp.eq.s32.totalorder %v3789_v6, %v477_v62  ;;  %3421 = vmatprep.mubr.msk.bf16.mxu1 %vm905_vm4, %v859_v60 }
 0x123   :  { %v784_v63 = vsel %vm656_vm0, 1.0, %v3524_v13  ;;  %v783_v0 = vsel %vm655_vm1, 1.0, %v3524_v13 }
 0x124   :  { %v860_v1 = vpack.c.bf16 %v784_v63, %v783_v0 }
 0x125   :  { %v330_v2 = vpop.permute.xlu1 %329  ;;  %v327_v3 = vpop.permute.xlu0 %326 }
 0x126   :  { %vm606_vm2 = vcmp.eq.s32.totalorder %v3789_v6, %v330_v2  ;;  %vm605_vm3 = vcmp.eq.s32.totalorder %v3789_v6, %v327_v3  ;;  %3422 = vmatmul.mubr.msk.bf16.gmra.mxu1 %vm905_vm4, %v860_v1 }
 0x127   :  { %v734_v4 = vsel %vm606_vm2, 1.0, %v3524_v13  ;;  %v733_v5 = vsel %vm605_vm3, 1.0, %v3524_v13 }
 0x128   :  { %v835_v7 = vpack.c.bf16 %v734_v4, %v733_v5 }
 0x129   :  { %v336_v8 = vpop.permute.xlu1 %335  ;;  %v333_v9 = vpop.permute.xlu0 %332 }
 0x12a   :  { %vm608_vm5 = vcmp.eq.s32.totalorder %v3789_v6, %v336_v8  ;;  %vm607_vm6 = vcmp.eq.s32.totalorder %v3789_v6, %v333_v9  ;;  %3373 = vmatprep.mubr.msk.bf16.mxu0 %vm905_vm4, %v835_v7 }
 0x12b   :  { %v736_v10 = vsel %vm608_vm5, 1.0, %v3524_v13  ;;  %v735_v11 = vsel %vm607_vm6, 1.0, %v3524_v13 }
 0x12c   :  { %v836_v12 = vpack.c.bf16 %v736_v10, %v735_v11 }
 0x12d   :  { %v486_v14 = vpop.permute.xlu1 %485  ;;  %v483_v15 = vpop.permute.xlu0 %482 }
 0x12e   :  { %vm658_vm7 = vcmp.eq.s32.totalorder %v3789_v6, %v486_v14  ;;  %vm657_vm8 = vcmp.eq.s32.totalorder %v3789_v6, %v483_v15  ;;  %3374 = vmatmul.mubr.msk.bf16.gmra.mxu0 %vm905_vm4, %v836_v12 }
 0x12f   :  { %v786_v16 = vsel %vm658_vm7, 1.0, %v3524_v13  ;;  %v785_v17 = vsel %vm657_vm8, 1.0, %v3524_v13 }
 0x130   :  { %v861_v18 = vpack.c.bf16 %v786_v16, %v785_v17 }
 0x131   :  { %v492_v19 = vpop.permute.xlu1 %491  ;;  %v489_v20 = vpop.permute.xlu0 %488 }
 0x132   :  { %vm660_vm9 = vcmp.eq.s32.totalorder %v3789_v6, %v492_v19  ;;  %vm659_vm10 = vcmp.eq.s32.totalorder %v3789_v6, %v489_v20  ;;  %3425 = vmatprep.mubr.msk.bf16.mxu1 %vm905_vm4, %v861_v18 }
 0x133   :  { %v788_v21 = vsel %vm660_vm9, 1.0, %v3524_v13  ;;  %v787_v22 = vsel %vm659_vm10, 1.0, %v3524_v13 }
 0x134   :  { %v862_v23 = vpack.c.bf16 %v788_v21, %v787_v22 }
 0x135   :  { %v342_v24 = vpop.permute.xlu1 %341  ;;  %v339_v25 = vpop.permute.xlu0 %338 }
 0x136   :  { %vm610_vm11 = vcmp.eq.s32.totalorder %v3789_v6, %v342_v24  ;;  %vm609_vm12 = vcmp.eq.s32.totalorder %v3789_v6, %v339_v25  ;;  %3426 = vmatmul.mubr.msk.bf16.gmra.mxu1 %vm905_vm4, %v862_v23 }
 0x137   :  { %v738_v26 = vsel %vm610_vm11, 1.0, %v3524_v13  ;;  %v737_v27 = vsel %vm609_vm12, 1.0, %v3524_v13 }
 0x138   :  { %v837_v28 = vpack.c.bf16 %v738_v26, %v737_v27 }
 0x139   :  { %v348_v29 = vpop.permute.xlu1 %347  ;;  %v345_v30 = vpop.permute.xlu0 %344 }
 0x13a   :  { %vm612_vm13 = vcmp.eq.s32.totalorder %v3789_v6, %v348_v29  ;;  %vm611_vm14 = vcmp.eq.s32.totalorder %v3789_v6, %v345_v30  ;;  %3377 = vmatprep.mubr.msk.bf16.mxu0 %vm905_vm4, %v837_v28 }
 0x13b   :  { %v740_v31 = vsel %vm612_vm13, 1.0, %v3524_v13  ;;  %v739_v32 = vsel %vm611_vm14, 1.0, %v3524_v13 }
 0x13c   :  { %v838_v35 = vpack.c.bf16 %v740_v31, %v739_v32 }
 0x13d   :  { %v498_v36 = vpop.permute.xlu1 %497  ;;  %v495_v37 = vpop.permute.xlu0 %494 }
 0x13e   :  { %vm662_vm15 = vcmp.eq.s32.totalorder %v3789_v6, %v498_v36  ;;  %vm661_vm0 = vcmp.eq.s32.totalorder %v3789_v6, %v495_v37  ;;  %3378 = vmatmul.mubr.msk.bf16.gmra.mxu0 %vm905_vm4, %v838_v35 }
 0x13f   :  { %v790_v38 = vsel %vm662_vm15, 1.0, %v3524_v13  ;;  %v789_v39 = vsel %vm661_vm0, 1.0, %v3524_v13  ;;  %vm1651_vm0 = vcmask 261120  }
 0x140   :  { %v863_v40 = vpack.c.bf16 %v790_v38, %v789_v39 }
 0x141   :  { %v504_v41 = vpop.permute.xlu1 %503  ;;  %v501_v42 = vpop.permute.xlu0 %500 }
 0x142   :  { %vm664_vm1 = vcmp.eq.s32.totalorder %v3789_v6, %v504_v41  ;;  %vm663_vm2 = vcmp.eq.s32.totalorder %v3789_v6, %v501_v42  ;;  %3429 = vmatprep.mubr.msk.bf16.mxu1 %vm905_vm4, %v863_v40 }
 0x143   :  { %v792_v44 = vsel %vm664_vm1, 1.0, %v3524_v13  ;;  %v791_v45 = vsel %vm663_vm2, 1.0, %v3524_v13 }
 0x144   :  { %v864_v46 = vpack.c.bf16 %v792_v44, %v791_v45 }
 0x145   :  { %v354_v48 = vpop.permute.xlu1 %353  ;;  %v351_v49 = vpop.permute.xlu0 %350 }
 0x146   :  { %vm614_vm3 = vcmp.eq.s32.totalorder %v3789_v6, %v354_v48  ;;  %vm613_vm5 = vcmp.eq.s32.totalorder %v3789_v6, %v351_v49  ;;  %3430 = vmatmul.mubr.msk.bf16.gmra.mxu1 %vm905_vm4, %v864_v46 }
 0x147   :  { %v742_v50 = vsel %vm614_vm3, 1.0, %v3524_v13  ;;  %v741_v51 = vsel %vm613_vm5, 1.0, %v3524_v13 }
 0x148   :  { %v839_v52 = vpack.c.bf16 %v742_v50, %v741_v51  ;;  %v3323_v53 = vpop.f32.mrf.mxu0 }
 0x149   :  { %v360_v54 = vpop.permute.xlu1 %359  ;;  %v357_v55 = vpop.permute.xlu0 %356  ;;  %v1661_v31 = vsel %vm1651_vm0, %v3323_v53, 0.0 }
 0x14a   :  { %vm616_vm6 = vcmp.eq.s32.totalorder %v3789_v6, %v360_v54  ;;  %v4276_v56 = vpop.f32.mrf.mxu0  ;;  %vm615_vm7 = vcmp.eq.s32.totalorder %v3789_v6, %v357_v55  ;;  %3381 = vmatprep.mubr.msk.bf16.mxu0 %vm905_vm4, %v839_v52 }
 0x14b   :  { %v744_v57 = vsel %vm616_vm6, 1.0, %v3524_v13  ;;  %v743_v58 = vsel %vm615_vm7, 1.0, %v3524_v13  ;;  %v1652_v44 = vsel %vm1651_vm0, %v4276_v56, 0.0 }
 0x14c   :  { %v840_v59 = vpack.c.bf16 %v744_v57, %v743_v58  ;;  %v3324_v60 = vpop.f32.mrf.mxu0 }
 0x14d   :  { %v510_v61 = vpop.permute.xlu1 %509  ;;  %v507_v62 = vpop.permute.xlu0 %506  ;;  %v1662_v28 = vsel %vm1651_vm0, %v3324_v60, 0.0 }
 0x14e   :  { %vm666_vm8 = vcmp.eq.s32.totalorder %v3789_v6, %v510_v61  ;;  %v1135_v63 = vpop.f32.mrf.mxu0  ;;  %vm665_vm9 = vcmp.eq.s32.totalorder %v3789_v6, %v507_v62  ;;  %3382 = vmatmul.mubr.msk.bf16.gmra.mxu0 %vm905_vm4, %v840_v59  ;;  %v1663_v34 = vadd.f32 %v1662_v28, %v1661_v31 }
 0x14f   :  { %v794_v0 = vsel %vm666_vm8, 1.0, %v3524_v13  ;;  %v793_v1 = vsel %vm665_vm9, 1.0, %v3524_v13  ;;  %v1653_v40 = vsel %vm1651_vm0, %v1135_v63, 0.0 }
 0x150   :  { %v865_v2 = vpack.c.bf16 %v794_v0, %v793_v1  ;;  %v4287_v3 = vpop.f32.mrf.mxu0  ;;  %v1664_v45 = vrot.slane %v1663_v34, 4  ;;  %v1654_v49 = vadd.f32 %v1653_v40, %v1652_v44 }
 0x151   :  { %v516_v4 = vpop.permute.xlu1 %515  ;;  %v513_v5 = vpop.permute.xlu0 %512  ;;  %v1679_v56 = vsel %vm1651_vm0, %v4287_v3, 0.0 }
 0x152   :  { %vm668_vm10 = vcmp.eq.s32.totalorder %v3789_v6, %v516_v4  ;;  %v4290_v7 = vpop.f32.mrf.mxu0  ;;  %vm667_vm11 = vcmp.eq.s32.totalorder %v3789_v6, %v513_v5  ;;  %3433 = vmatprep.mubr.msk.bf16.mxu1 %vm905_vm4, %v865_v2  ;;  %v4332_v55 = vadd.f32 %v1664_v45, %v1663_v34  ;;  %v1655_v61 = vrot.slane %v1654_v49, 4 }
 0x153   :  { %v796_v8 = vsel %vm668_vm10, 1.0, %v3524_v13  ;;  %v795_v9 = vsel %vm667_vm11, 1.0, %v3524_v13  ;;  %v1670_v62 = vsel %vm1651_vm0, %v4290_v7, 0.0 }
 0x154   :  { %v866_v10 = vpack.c.bf16 %v796_v8, %v795_v9  ;;  %v3328_v11 = vpop.f32.mrf.mxu0 }
 0x155   :  { %v366_v12 = vpop.permute.xlu1 %365  ;;  %v363_v14 = vpop.permute.xlu0 %362  ;;  %v1680_v57 = vsel %vm1651_vm0, %v3328_v11, 0.0 }
 0x156   :  { %vm618_vm12 = vcmp.eq.s32.totalorder %v3789_v6, %v366_v12  ;;  %v1151_v15 = vpop.f32.mrf.mxu0  ;;  %3434 = vmatmul.mubr.msk.bf16.gmra.mxu1 %vm905_vm4, %v866_v10  ;;  %vm617_vm13 = vcmp.eq.s32.totalorder %v3789_v6, %v363_v14  ;;  %v1681_v4 = vadd.f32 %v1680_v57, %v1679_v56 }
 0x157   :  { %v746_v16 = vsel %vm618_vm12, 1.0, %v3524_v13  ;;  %v745_v18 = vsel %vm617_vm13, 1.0, %v3524_v13  ;;  %v1671_v58 = vsel %vm1651_vm0, %v1151_v15, 0.0 }
 0x158   :  { %v4300_v17 = vpop.f32.mrf.mxu0  ;;  %v841_v22 = vpack.c.bf16 %v746_v16, %v745_v18  ;;  %v1672_v5 = vadd.f32 %v1671_v58, %v1670_v62 }
 0x159   :  { %v372_v19 = vpop.permute.xlu1 %371  ;;  %v369_v20 = vpop.permute.xlu0 %368  ;;  %v1697_v7 = vsel %vm1651_vm0, %v4300_v17, 0.0  ;;  %v1666_v17 = vrot.slane %v4332_v55, 2 }
 0x15a   :  { %v4303_v21 = vpop.f32.mrf.mxu0  ;;  %vm620_vm14 = vcmp.eq.s32.totalorder %v3789_v6, %v372_v19  ;;  %vm619_vm15 = vcmp.eq.s32.totalorder %v3789_v6, %v369_v20  ;;  %3385 = vmatprep.mubr.msk.bf16.mxu0 %vm905_vm4, %v841_v22 }
 0x15b   :  { %v748_v23 = vsel %vm620_vm14, 1.0, %v3524_v13  ;;  %v747_v25 = vsel %vm619_vm15, 1.0, %v3524_v13  ;;  %v1688_v10 = vsel %vm1651_vm0, %v4303_v21, 0.0  ;;  %v1656_v21 = vadd.f32 %v1655_v61, %v1654_v49 }
 0x15c   :  { %v3332_v24 = vpop.f32.mrf.mxu0  ;;  %v842_v29 = vpack.c.bf16 %v748_v23, %v747_v25  ;;  %v1682_v23 = vrot.slane %v1681_v4, 4  ;;  %v1667_v57 = vadd.f32 %v1666_v17, %v4332_v55 }
 0x15d   :  { %v522_v26 = vpop.permute.xlu1 %521  ;;  %v519_v27 = vpop.permute.xlu0 %518  ;;  %v1698_v63 = vsel %vm1651_vm0, %v3332_v24, 0.0 }
 0x15e   :  { %v1167_v30 = vpop.f32.mrf.mxu0  ;;  %vm670_vm1 = vcmp.eq.s32.totalorder %v3789_v6, %v522_v26  ;;  %vm669_vm2 = vcmp.eq.s32.totalorder %v3789_v6, %v519_v27  ;;  %3386 = vmatmul.mubr.msk.bf16.gmra.mxu0 %vm905_vm4, %v842_v29  ;;  %v1699_v11 = vadd.f32 %v1698_v63, %v1697_v7  ;;  %v1673_v26 = vrot.slane %v1672_v5, 4 }
 0x15f   :  { %v798_v32 = vsel %vm670_vm1, 1.0, %v3524_v13  ;;  %v797_v35 = vsel %vm669_vm2, 1.0, %v3524_v13  ;;  %v1689_v1 = vsel %vm1651_vm0, %v1167_v30, 0.0  ;;  %v1683_v40 = vadd.f32 %v1682_v23, %v1681_v4 }
 0x160   :  { %v3335_v33 = vpop.f32.mrf.mxu0  ;;  %v867_v38 = vpack.c.bf16 %v798_v32, %v797_v35  ;;  %v1690_v18 = vadd.f32 %v1689_v1, %v1688_v10  ;;  %v1700_v27 = vrot.slane %v1699_v11, 4 }
 0x161   :  { %v528_v36 = vpop.permute.xlu1 %527  ;;  %v525_v37 = vpop.permute.xlu0 %524  ;;  %v1715_v12 = vsel %vm1651_vm0, %v3335_v33, 0.0  ;;  %v1684_v61 = vrot.slane %v1683_v40, 2 }
 0x162   :  { %v4317_v39 = vpop.f32.mrf.mxu0  ;;  %vm672_vm3 = vcmp.eq.s32.totalorder %v3789_v6, %v528_v36  ;;  %vm671_vm5 = vcmp.eq.s32.totalorder %v3789_v6, %v525_v37  ;;  %3437 = vmatprep.mubr.msk.bf16.mxu1 %vm905_vm4, %v867_v38  ;;  %v1691_v32 = vrot.slane %v1690_v18, 4  ;;  %v1657_v38 = vrot.slane %v1656_v21, 2 }
 0x163   :  { %v800_v41 = vsel %vm672_vm3, 1.0, %v3524_v13  ;;  %v799_v42 = vsel %vm671_vm5, 1.0, %v3524_v13  ;;  %v1706_v28 = vsel %vm1651_vm0, %v4317_v39, 0.0  ;;  %v1701_v49 = vadd.f32 %v1700_v27, %v1699_v11 }
 0x164   :  { %v3336_v43 = vpop.f32.mrf.mxu0  ;;  %v868_v46 = vpack.c.bf16 %v800_v41, %v799_v42  ;;  %v1658_v58 = vadd.f32 %v1657_v38, %v1656_v21  ;;  %vm2705_vm3 = vcmask 1042434   ;;  %vm2708_vm5 = vcmask 1043459  }
 0x165   :  { %v378_v47 = vpop.permute.xlu1 %377  ;;  %v375_v48 = vpop.permute.xlu0 %374  ;;  %v1716_v2 = vsel %vm1651_vm0, %v3336_v43, 0.0  ;;  %v1674_v43 = vadd.f32 %v1673_v26, %v1672_v5 }
 0x166   :  { %vm622_vm6 = vcmp.eq.s32.totalorder %v3789_v6, %v378_v47  ;;  %v1183_v50 = vpop.f32.mrf.mxu0  ;;  %vm621_vm7 = vcmp.eq.s32.totalorder %v3789_v6, %v375_v48  ;;  %3438 = vmatmul.mubr.msk.bf16.gmra.mxu1 %vm905_vm4, %v868_v46  ;;  %v1717_v19 = vadd.f32 %v1716_v2, %v1715_v12 }
 0x167   :  { %v750_v51 = vsel %vm622_vm6, 1.0, %v3524_v13  ;;  %v749_v52 = vsel %vm621_vm7, 1.0, %v3524_v13  ;;  %v1707_v22 = vsel %vm1651_vm0, %v1183_v50, 0.0  ;;  %v1692_v50 = vadd.f32 %v1691_v32, %v1690_v18 }
 0x168   :  { %v843_v53 = vpack.c.bf16 %v750_v51, %v749_v52  ;;  %v3339_v54 = vpop.f32.mrf.mxu0  ;;  %v1718_v33 = vrot.slane %v1717_v19, 4  ;;  %v1708_v34 = vadd.f32 %v1707_v22, %v1706_v28  ;;  %v1675_v62 = vrot.slane %v1674_v43, 2 }
 0x169   :  { %v384_v59 = vpop.permute.xlu1 %383  ;;  %v381_v60 = vpop.permute.xlu0 %380  ;;  %v1733_v39 = vsel %vm1651_vm0, %v3339_v54, 0.0  ;;  %v1693_v4 = vrot.slane %v1692_v50, 2  ;;  %v1668_v32 = vrot.slane %v1667_v57, 1  ;;  %vm2711_vm6 = vcmask 1044484  }
 0x16a   :  { %vm624_vm8 = vcmp.eq.s32.totalorder %v3789_v6, %v384_v59  ;;  %v1196_v0 = vpop.f32.mrf.mxu0  ;;  %3389 = vmatprep.mubr.msk.bf16.mxu0 %vm905_vm4, %v843_v53  ;;  %vm623_vm9 = vcmp.eq.s32.totalorder %v3789_v6, %v381_v60  ;;  %v1719_v53 = vadd.f32 %v1718_v33, %v1717_v19  ;;  %v1709_v54 = vrot.slane %v1708_v34, 4 }
 0x16b   :  { %v752_v3 = vsel %vm624_vm8, 1.0, %v3524_v13  ;;  %v751_v8 = vsel %vm623_vm9, 1.0, %v3524_v13  ;;  %v1724_v44 = vsel %vm1651_vm0, %v1196_v0, 0.0  ;;  %v1676_v26 = vadd.f32 %v1675_v62, %v1674_v43 }
 0x16c   :  { %v3340_v9 = vpop.f32.mrf.mxu0  ;;  %v844_v14 = vpack.c.bf16 %v752_v3, %v751_v8  ;;  %v1702_v3 = vrot.slane %v1701_v49, 2  ;;  %v1710_v55 = vadd.f32 %v1709_v54, %v1708_v34  ;;  %vm2714_vm7 = vcmask 1045509  }
 0x16d   :  { %v534_v15 = vpop.permute.xlu1 %533  ;;  %v531_v16 = vpop.permute.xlu0 %530  ;;  %v1734_v35 = vsel %vm1651_vm0, %v3340_v9, 0.0  ;;  %v1720_v9 = vrot.slane %v1719_v53, 2  ;;  %vm2717_vm8 = vcmask 1046534   ;;  %vm2720_vm9 = vcmask 1047559  }
 0x16e   :  { %vm674_vm10 = vcmp.eq.s32.totalorder %v3789_v6, %v534_v15  ;;  %v1199_v20 = vpop.f32.mrf.mxu0  ;;  %vm673_vm11 = vcmp.eq.s32.totalorder %v3789_v6, %v531_v16  ;;  %3390 = vmatmul.mubr.msk.bf16.gmra.mxu0 %vm905_vm4, %v844_v14  ;;  %v1735_v45 = vadd.f32 %v1734_v35, %v1733_v39  ;;  %v1711_v34 = vrot.slane %v1710_v55, 2 }
 0x16f   :  { %v802_v24 = vsel %vm674_vm10, 1.0, %v3524_v13  ;;  %v801_v29 = vsel %vm673_vm11, 1.0, %v3524_v13  ;;  %v1725_v36 = vsel %vm1651_vm0, %v1199_v20, 0.0  ;;  %v1721_v33 = vadd.f32 %v1720_v9, %v1719_v53 }
 0x170   :  { %v3343_v25 = vpop.f32.mrf.mxu0  ;;  %v869_v37 = vpack.c.bf16 %v802_v24, %v801_v29  ;;  %v1726_v51 = vadd.f32 %v1725_v36, %v1724_v44  ;;  %v1736_v63 = vrot.slane %v1735_v45, 4  ;;  %v1703_v29 = vadd.f32 %v1702_v3, %v1701_v49 }
 0x171   :  { %v540_v30 = vpop.permute.xlu1 %539  ;;  %v537_v31 = vpop.permute.xlu0 %536  ;;  %v1751_v11 = vsel %vm1651_vm0, %v3343_v25, 0.0  ;;  %v1685_v25 = vadd.f32 %v1684_v61, %v1683_v40  ;;  %v1659_v36 = vrot.slane %v1658_v58, 1  ;;  %v1712_v49 = vadd.f32 %v1711_v34, %v1710_v55 }
 0x172   :  { %vm676_vm12 = vcmp.eq.s32.totalorder %v3789_v6, %v540_v30  ;;  %vm675_vm13 = vcmp.eq.s32.totalorder %v3789_v6, %v537_v31  ;;  %v4368_v42 = vpop.f32.mrf.mxu0  ;;  %3441 = vmatprep.mubr.msk.bf16.mxu1 %vm905_vm4, %v869_v37  ;;  %v1727_v5 = vrot.slane %v1726_v51, 4  ;;  %v1737_v16 = vadd.f32 %v1736_v63, %v1735_v45 }
 0x173   :  { %v804_v41 = vsel %vm676_vm12, 1.0, %v3524_v13  ;;  %v803_v46 = vsel %vm675_vm13, 1.0, %v3524_v13  ;;  %v1694_v30 = vadd.f32 %v1693_v4, %v1692_v50  ;;  %v1742_v40 = vsel %vm1651_vm0, %v4368_v42, 0.0 }
 0x174   :  { %v870_v52 = vpack.c.bf16 %v804_v41, %v803_v46  ;;  %v3344_v59 = vpop.f32.mrf.mxu0  ;;  %v1738_v37 = vrot.slane %v1737_v16, 2  ;;  %v1686_v39 = vrot.slane %v1685_v25, 1  ;;  %v1677_v41 = vrot.slane %v1676_v26, 1 }
 0x175   :  { %v546_v47 = vpop.permute.xlu1 %545  ;;  %v543_v48 = vpop.permute.xlu0 %542  ;;  %v1752_v12 = vsel %vm1651_vm0, %v3344_v59, 0.0  ;;  %v1704_v46 = vrot.slane %v1703_v29, 1  ;;  %v1669_v50 = vadd.f32 %v1668_v32, %v1667_v57  ;;  %v1713_v4 = vrot.slane %v1712_v49, 1 }
 0x176   :  { %vm678_vm14 = vcmp.eq.s32.totalorder %v3789_v6, %v546_v47  ;;  %vm677_vm15 = vcmp.eq.s32.totalorder %v3789_v6, %v543_v48  ;;  %3442 = vmatmul.mubr.msk.bf16.gmra.mxu1 %vm905_vm4, %v870_v52  ;;  %v1215_v18 = vpop.f32.mrf.mxu0  ;;  %v1695_v47 = vrot.slane %v1694_v30, 1  ;;  %v1722_v48 = vrot.slane %v1721_v33, 1 }
 0x177   :  { %v3395_v56 = vpop.f32.mrf.mxu1  ;;  %v806_v60 = vsel %vm678_vm14, 1.0, %v3524_v13  ;;  %v805_v0 = vsel %vm677_vm15, 1.0, %v3524_v13  ;;  %v1743_v31 = vsel %vm1651_vm0, %v1215_v18, 0.0  ;;  %v1739_v52 = vadd.f32 %v1738_v37, %v1737_v16 }
 0x178   :  { %v871_v7 = vpack.c.bf16 %v806_v60, %v805_v0  ;;  %v1985_v19 = vsel %vm1651_vm0, %v3395_v56, 0.0  ;;  %v1744_v44 = vadd.f32 %v1743_v31, %v1742_v40  ;;  %v1687_v56 = vadd.f32 %v1686_v39, %v1685_v25  ;;  %v4425_v39 = vld [vmem:[%s5097_s3] ss:$0 sm:$0xff] }
 0x179   :  { %v1420_v1 = vpop.f32.mrf.mxu1  ;;  %v552_v2 = vpop.permute.xlu1 %551  ;;  %v1678_v59 = vadd.f32 %v1677_v41, %v1676_v26  ;;  %v1705_v63 = vadd.f32 %v1704_v46, %v1703_v29  ;;  %v1696_v0 = vadd.f32 %v1695_v47, %v1694_v30  ;;  %v1723_v3 = vadd.f32 %v1722_v48, %v1721_v33 }
 0x17a   :  { %v549_v8 = vpop.permute.xlu0 %548  ;;  %vm680_vm1 = vcmp.eq.s32.totalorder %v3789_v6, %v552_v2  ;;  %3445 = vmatprep.mubr.msk.bf16.mxu1 %vm905_vm4, %v871_v7  ;;  %v1976_v21 = vsel %vm1651_vm0, %v1420_v1, 0.0  ;;  %v1745_v61 = vrot.slane %v1744_v44, 4  ;;  %v1740_v7 = vrot.slane %v1739_v52, 1 }
 0x17b   :  { %vm679_vm2 = vcmp.eq.s32.totalorder %v3789_v6, %v549_v8  ;;  %v3396_v10 = vpop.f32.mrf.mxu1  ;;  %v808_v14 = vsel %vm680_vm1, 1.0, %v3524_v13  ;;  %v1728_v6 = vadd.f32 %v1727_v5, %v1726_v51  ;;  %v1660_v51 = vadd.f32 %v1659_v36, %v1658_v58 }
 0x17c   :  { %v807_v15 = vsel %vm679_vm2, 1.0, %v3524_v13  ;;  %v1986_v22 = vsel %vm1651_vm0, %v3396_v10, 0.0  ;;  %v1753_v13 = vadd.f32 %v1752_v12, %v1751_v11  ;;  %v1746_v11 = vadd.f32 %v1745_v61, %v1744_v44 }
 0x17d   :  { %v872_v20 = vpack.c.bf16 %v808_v14, %v807_v15  ;;  %v1423_v17 = vpop.f32.mrf.mxu1  ;;  %v4389_v23 = vadd.f32 %v1986_v22, %v1985_v19  ;;  %v1729_v38 = vrot.slane %v1728_v6, 2  ;;  %v1714_v29 = vadd.f32 %v1713_v4, %v1712_v49  ;;  %v4419_v34 = vpop.permute.xlu1 %2274 }
 0x17e   :  { %v1977_v24 = vsel %vm1651_vm0, %v1423_v17, 0.0  ;;  %v1754_v43 = vrot.slane %v1753_v13, 4  ;;  %v4398_v54 = vpop.permute.xlu0 %2270  ;;  %v1741_v33 = vadd.f32 %v1740_v7, %v1739_v52  ;;  %v1747_v40 = vrot.slane %v1746_v11, 2 }
 0x17f   :  { %v4392_v27 = vadd.f32 %v1977_v24, %v1976_v21  ;;  %v3347_v28 = vpop.f32.mrf.mxu0  ;;  %3446 = vmatmul.mubr.msk.bf16.gmra.mxu1 %vm905_vm4, %v872_v20  ;;  %v1730_v53 = vadd.f32 %v1729_v38, %v1728_v6  ;;  %v2300_v57 = vrot.slane %v4398_v54, 1  ;;  %v2301_v9 = vrot.slane %v4398_v54, 2 }
 0x180   :  { %v1755_v60 = vadd.f32 %v1754_v43, %v1753_v13  ;;  %v1769_v1 = vsel %vm1651_vm0, %v3347_v28, 0.0  ;;  %v2302_v12 = vrot.slane %v4398_v54, 3  ;;  %v2303_v14 = vrot.slane %v4398_v54, 4 }
 0x181   :  { %v1228_v35 = vpop.f32.mrf.mxu0  ;;  %v1731_v8 = vrot.slane %v1730_v53, 1  ;;  %v2421_v22 = vmul.f32 %v2300_v57, %v1669_v50  ;;  %v2304_v24 = vrot.slane %v4398_v54, 5  ;;  %v2422_v25 = vmul.f32 %v2301_v9, %v1678_v59 }
 0x182   :  { %v1756_v10 = vrot.slane %v1755_v60, 2  ;;  %v1760_v16 = vsel %vm1651_vm0, %v1228_v35, 0.0  ;;  %v2305_v28 = vrot.slane %v4398_v54, 6  ;;  %v2306_v31 = vrot.slane %v4398_v54, 7 }
 0x183   :  { %v3348_v45 = vpop.f32.mrf.mxu0  ;;  %v2423_v32 = vmul.f32 %v2302_v12, %v1687_v56  ;;  %vm2702_vm4 = vcmask 1041409   ;;  %v2420_v35 = vmul.f32 %v4398_v54, %v1660_v51  ;;  %v2424_v37 = vmul.f32 %v2303_v14, %v1696_v0 }
 0x184   :  { %v1770_v2 = vsel %vm1651_vm0, %v3348_v45, 0.0  ;;  %v1757_v38 = vadd.f32 %v1756_v10, %v1755_v60  ;;  %v2425_v44 = vmul.f32 %v2304_v24, %v1705_v63  ;;  %v1732_v45 = vadd.f32 %v1731_v8, %v1730_v53 }
 0x185   :  { %v1231_v42 = vpop.f32.mrf.mxu0  ;;  %v1771_v58 = vadd.f32 %v1770_v2, %v1769_v1  ;;  %v2492_v46 = vmul.f32 %v4425_v39, %v2421_v22  ;;  %v2426_v47 = vmul.f32 %v2305_v28, %v1714_v29  ;;  %v2493_v48 = vmul.f32 %v4425_v39, %v2422_v25 }
 0x186   :  { %v1761_v55 = vsel %vm1651_vm0, %v1231_v42, 0.0  ;;  %v2307_v49 = vrot.slane %v4419_v34, 1  ;;  %v2308_v50 = vrot.slane %v4419_v34, 2  ;;  %v2427_v51 = vmul.f32 %v2306_v31, %v1723_v3  ;;  %v4440_v42 = vld [vmem:[%s5098_s4] ss:$0 sm:$0xff] }
 0x187   :  { %v3399_v62 = vpop.f32.mrf.mxu1  ;;  %v1772_v18 = vrot.slane %v1771_v58, 4  ;;  %v1762_v17 = vadd.f32 %v1761_v55, %v1760_v16  ;;  %v2494_v52 = vmul.f32 %v4425_v39, %v2423_v32  ;;  %v2309_v54 = vrot.slane %v4419_v34, 3 }
 0x188   :  { %v2003_v19 = vsel %vm1651_vm0, %v3399_v62, 0.0  ;;  %v2491_v56 = vmul.f32 %v4425_v39, %v2420_v35  ;;  %v2495_v53 = vmul.f32 %v4425_v39, %v2424_v37  ;;  %v1758_v60 = vrot.slane %v1757_v38, 1 }
 0x189   :  { %v1436_v5 = vpop.f32.mrf.mxu1  ;;  %v1773_v36 = vadd.f32 %v1772_v18, %v1771_v58  ;;  %v1763_v41 = vrot.slane %v1762_v17, 4  ;;  %v1748_v61 = vadd.f32 %v1747_v40, %v1746_v11  ;;  %v2496_v63 = vmul.f32 %v4425_v39, %v2425_v44 }
 0x18a   :  { %v1994_v26 = vsel %vm1651_vm0, %v1436_v5, 0.0  ;;  %v1988_v1 = vrot.slane %v4389_v23, 4  ;;  %v2497_v2 = vmul.f32 %v4425_v39, %v2426_v47  ;;  %v2563_v3 = vadd.f32 %v4440_v42, %v2492_v46 }
 0x18b   :  { %v3400_v15 = vpop.f32.mrf.mxu1  ;;  %v1774_v59 = vrot.slane %v1773_v36, 2  ;;  %v1764_v62 = vadd.f32 %v1763_v41, %v1762_v17  ;;  %v2564_v4 = vadd.f32 %v4440_v42, %v2493_v48  ;;  %v1979_v57 = vrot.slane %v4392_v27, 4 }
 0x18c   :  { %v2004_v20 = vsel %vm1651_vm0, %v3400_v15, 0.0  ;;  %v2428_v58 = vmul.f32 %v4419_v34, %v1732_v45  ;;  %v2498_v5 = vmul.f32 %v4425_v39, %v2427_v51  ;;  %v2565_v7 = vadd.f32 %v4440_v42, %v2494_v52 }
 0x18d   :  { %v4410_v6 = vadd.f32 %v2004_v20, %v2003_v19  ;;  %v1439_v21 = vpop.f32.mrf.mxu1  ;;  %v1775_v9 = vadd.f32 %v1774_v59, %v1773_v36  ;;  %v2562_v55 = vadd.f32 %v4440_v42, %v2491_v56  ;;  %v2566_v10 = vadd.f32 %v4440_v42, %v2495_v53 }
 0x18e   :  { %v1995_v13 = vsel %vm1651_vm0, %v1439_v21, 0.0  ;;  %v2701_v11 = vrot.slane %v2563_v3, 7  ;;  %v1749_v12 = vrot.slane %v1748_v61, 1  ;;  %v2429_v14 = vmul.f32 %v2307_v49, %v1741_v33 }
 0x18f   :  { %v4416_v30 = vadd.f32 %v1995_v13, %v1994_v26  ;;  %v4427_v43 = vpop.f32.mrf.mxu0  ;;  %v1765_v15 = vrot.slane %v1764_v62, 2  ;;  %v2567_v16 = vadd.f32 %v4440_v42, %v2496_v63  ;;  %v1759_v20 = vadd.f32 %v1758_v60, %v1757_v38 }
 0x190   :  { %v2568_v22 = vadd.f32 %v4440_v42, %v2497_v2  ;;  %v2703_v17 = vsel %vm2702_vm4, %v2701_v11, %v2562_v55  ;;  %v2704_v21 = vrot.slane %v2564_v4, 6  ;;  %v1989_v24 = vadd.f32 %v1988_v1, %v4389_v23 }
 0x191   :  { %v1244_v0 = vpop.f32.mrf.mxu0  ;;  %v2499_v25 = vmul.f32 %v4425_v39, %v2428_v58  ;;  %v2569_v26 = vadd.f32 %v4440_v42, %v2498_v5  ;;  %v2707_v13 = vrot.slane %v2565_v7, 5  ;;  %v4460_v29 = vadd.f32 %v1979_v57, %v4392_v27 }
 0x192   :  { %v1776_v31 = vrot.slane %v1775_v9, 1  ;;  %v2706_v32 = vsel %vm2705_vm3, %v2704_v21, %v2703_v17  ;;  %v2710_v33 = vrot.slane %v2566_v10, 4  ;;  %v1750_v35 = vadd.f32 %v1749_v12, %v1748_v61 }
 0x193   :  { %v3352_v18 = vpop.f32.mrf.mxu0  ;;  %v1766_v36 = vadd.f32 %v1765_v15, %v1764_v62  ;;  %v2709_v37 = vsel %vm2708_vm5, %v2707_v13, %v2706_v32  ;;  %v2713_v38 = vrot.slane %v2567_v16, 3  ;;  %v1787_v23 = vsel %vm1651_vm0, %v4427_v43, 0.0 }
 0x194   :  { %v2712_v41 = vsel %vm2711_vm6, %v2710_v33, %v2709_v37  ;;  %v2716_v44 = vrot.slane %v2568_v22, 2  ;;  %v1788_v45 = vsel %vm1651_vm0, %v3352_v18, 0.0  ;;  %v2006_v27 = vrot.slane %v4410_v6, 4 }
 0x195   :  { %v1247_v40 = vpop.f32.mrf.mxu0  ;;  %v2715_v46 = vsel %vm2714_vm7, %v2713_v38, %v2712_v41  ;;  %v2719_v47 = vrot.slane %v2569_v26, 1  ;;  %v1789_v48 = vadd.f32 %v1788_v45, %v1787_v23  ;;  %v1777_v52 = vadd.f32 %v1776_v31, %v1775_v9 }
 0x196   :  { %v2718_v56 = vsel %vm2717_vm8, %v2716_v44, %v2715_v46  ;;  %v1778_v59 = vsel %vm1651_vm0, %v1244_v0, 0.0  ;;  %v1779_v43 = vsel %vm1651_vm0, %v1247_v40, 0.0  ;;  %v1767_v53 = vrot.slane %v1766_v36, 1 }
 0x197   :  { %v3403_v8 = vpop.f32.mrf.mxu1  ;;  %v2721_v60 = vsel %vm2720_vm9, %v2719_v47, %v2718_v56  ;;  %v1790_v61 = vrot.slane %v1789_v48, 4  ;;  %v1780_v62 = vadd.f32 %v1779_v43, %v1778_v59  ;;  %v1990_v9 = vrot.slane %v1989_v24, 2 }
 0x198   :  { %3457 = vmatprep.mubr.msk.f32.mxu1 %vm1651_vm0, %v2721_v60  ;;  %v2021_v1 = vsel %vm1651_vm0, %v3403_v8, 0.0  ;;  %v2431_v55 = vmul.f32 %v2309_v54, %v1759_v20  ;;  %v2500_v10 = vmul.f32 %v4425_v39, %v2429_v14  ;;  %v4485_v8 = vadd.f32 %v4440_v42, %v2499_v25 }
 0x199   :  { %v1452_v19 = vpop.f32.mrf.mxu1  ;;  %v1791_v57 = vadd.f32 %v1790_v61, %v1789_v48  ;;  %v1781_v0 = vrot.slane %v1780_v62, 4  ;;  %v1981_v11 = vrot.slane %v4460_v29, 2  ;;  %v2311_v12 = vrot.slane %v4419_v34, 5 }
 0x19a   :  { %v2012_v2 = vsel %vm1651_vm0, %v1452_v19, 0.0  ;;  %v2430_v18 = vmul.f32 %v2308_v50, %v1750_v35  ;;  %v2007_v19 = vadd.f32 %v2006_v27, %v4410_v6  ;;  %v1997_v22 = vrot.slane %v4416_v30, 4 }
 0x19b   :  { %v3404_v28 = vpop.f32.mrf.mxu1  ;;  %v1792_v15 = vrot.slane %v1791_v57, 2  ;;  %v1782_v16 = vadd.f32 %v1781_v0, %v1780_v62  ;;  %v2433_v20 = vmul.f32 %v2311_v12, %v1777_v52  ;;  %v1768_v14 = vadd.f32 %v1767_v53, %v1766_v36 }
 0x19c   :  { %v2022_v3 = vsel %vm1651_vm0, %v3404_v28, 0.0  ;;  %v1991_v26 = vadd.f32 %v1990_v9, %v1989_v24  ;;  %v2502_v13 = vmul.f32 %v4425_v39, %v2431_v55  ;;  %v4496_v28 = vadd.f32 %v4440_v42, %v2500_v10 }
 0x19d   :  { %v1455_v49 = vpop.f32.mrf.mxu1  ;;  %v2023_v58 = vadd.f32 %v2022_v3, %v2021_v1  ;;  %v1793_v17 = vadd.f32 %v1792_v15, %v1791_v57  ;;  %v1783_v21 = vrot.slane %v1782_v16, 2  ;;  %v2310_v6 = vrot.slane %v4419_v34, 4 }
 0x19e   :  { %v2013_v4 = vsel %vm1651_vm0, %v1455_v49, 0.0  ;;  %v4501_v36 = vadd.f32 %v1981_v11, %v4460_v29  ;;  %v2501_v38 = vmul.f32 %v4425_v39, %v2430_v18  ;;  %v2008_v24 = vrot.slane %v2007_v19, 2 }
 0x19f   :  { %v3355_v51 = vpop.f32.mrf.mxu0  ;;  %v4479_v5 = vadd.f32 %v2013_v4, %v2012_v2  ;;  %v1794_v32 = vrot.slane %v1793_v17, 1  ;;  %v1784_v33 = vadd.f32 %v1783_v21, %v1782_v16  ;;  %v1998_v40 = vadd.f32 %v1997_v22, %v4416_v30 }
 0x1a0   :  { %v1805_v31 = vsel %vm1651_vm0, %v3355_v51, 0.0  ;;  %v2504_v23 = vmul.f32 %v4425_v39, %v2433_v20  ;;  %v2432_v41 = vmul.f32 %v2310_v6, %v1768_v14  ;;  %v2312_v47 = vrot.slane %v4419_v34, 6 }
 0x1a1   :  { %v1260_v63 = vpop.f32.mrf.mxu0  ;;  %v1785_v44 = vrot.slane %v1784_v33, 1  ;;  %v1795_v46 = vadd.f32 %v1794_v32, %v1793_v17  ;;  %v2024_v48 = vrot.slane %v2023_v58, 4  ;;  %v2313_v59 = vrot.slane %v4419_v34, 7 }
 0x1a2   :  { %v1796_v51 = vsel %vm1651_vm0, %v1260_v63, 0.0  ;;  %v2503_v61 = vmul.f32 %v4425_v39, %v2432_v41  ;;  %v2572_v3 = vadd.f32 %v4440_v42, %v2501_v38  ;;  %v2015_v57 = vrot.slane %v4479_v5, 4 }
 0x1a3   :  { %v3356_v7 = vpop.f32.mrf.mxu0  ;;  %v1786_v29 = vadd.f32 %v1785_v44, %v1784_v33  ;;  %v2435_v4 = vmul.f32 %v2313_v59, %v1795_v46  ;;  %v2025_v63 = vadd.f32 %v2024_v48, %v2023_v58  ;;  %v4517_v9 = vadd.f32 %v2008_v24, %v2007_v19  ;;  %v4537_v46 = vpop.permute.xlu1 %2282 }
 0x1a4   :  { %v1806_v54 = vsel %vm1651_vm0, %v3356_v7, 0.0  ;;  %v1992_v7 = vrot.slane %v1991_v26, 1  ;;  %v2722_v11 = vrot.slane %v4496_v28, 7  ;;  %v2575_v12 = vadd.f32 %v4440_v42, %v2504_v23  ;;  %v4529_v28 = vpop.permute.xlu0 %2278 }
 0x1a5   :  { %v1263_v50 = vpop.f32.mrf.mxu0  ;;  %v1807_v35 = vadd.f32 %v1806_v54, %v1805_v31  ;;  %v2434_v62 = vmul.f32 %v2312_v47, %v1786_v29  ;;  %v1999_v15 = vrot.slane %v1998_v40, 2  ;;  %v1983_v18 = vrot.slane %v4501_v36, 1 }
 0x1a6   :  { %v1797_v45 = vsel %vm1651_vm0, %v1263_v50, 0.0  ;;  %v2574_v58 = vadd.f32 %v4440_v42, %v2503_v61  ;;  %v2724_v54 = vrot.slane %v2572_v3, 6  ;;  %v2506_v19 = vmul.f32 %v4425_v39, %v2435_v4 }
 0x1a7   :  { %v3407_v25 = vpop.f32.mrf.mxu1  ;;  %v1808_v52 = vrot.slane %v1807_v35, 4  ;;  %v1798_v43 = vadd.f32 %v1797_v45, %v1796_v51  ;;  %v2505_v34 = vmul.f32 %v4425_v39, %v2434_v62  ;;  %v2026_v14 = vrot.slane %v2025_v63, 2 }
 0x1a8   :  { %v2039_v56 = vsel %vm1651_vm0, %v3407_v25, 0.0  ;;  %v2016_v17 = vadd.f32 %v2015_v57, %v4479_v5  ;;  %v2573_v21 = vadd.f32 %v4440_v42, %v2502_v13  ;;  %v4527_v25 = vadd.f32 %v1992_v7, %v1991_v26 }
 0x1a9   :  { %v1468_v37 = vpop.f32.mrf.mxu1  ;;  %v1809_v55 = vadd.f32 %v1808_v52, %v1807_v35  ;;  %v1799_v16 = vrot.slane %v1798_v43, 4  ;;  %v2010_v31 = vrot.slane %v4517_v9, 1  ;;  %v2576_v50 = vadd.f32 %v4440_v42, %v2505_v34 }
 0x1aa   :  { %v2030_v1 = vsel %vm1651_vm0, %v1468_v37, 0.0  ;;  %v2730_v32 = vrot.slane %v2575_v12, 3  ;;  %v2000_v33 = vadd.f32 %v1999_v15, %v1998_v40  ;;  %v2723_v37 = vsel %vm2702_vm4, %v2722_v11, %v4485_v8  ;;  %v4556_v12 = vpop.permute.xlu1 %2290 }
 0x1ab   :  { %v3408_v27 = vpop.f32.mrf.mxu1  ;;  %v1810_v6 = vrot.slane %v1809_v55, 2  ;;  %v1800_v35 = vadd.f32 %v1799_v16, %v1798_v43  ;;  %v2728_v24 = vrot.slane %v2574_v58, 4  ;;  %v2725_v26 = vsel %vm2705_vm3, %v2724_v54, %v2723_v37 }
 0x1ac   :  { %v2040_v49 = vsel %vm1651_vm0, %v3408_v27, 0.0  ;;  %v2027_v41 = vadd.f32 %v2026_v14, %v2025_v63  ;;  %v2017_v44 = vrot.slane %v2016_v17, 2  ;;  %v2577_v45 = vadd.f32 %v4440_v42, %v2506_v19 }
 0x1ad   :  { %v1471_v30 = vpop.f32.mrf.mxu1  ;;  %v2041_v53 = vadd.f32 %v2040_v49, %v2039_v56  ;;  %v2726_v27 = vrot.slane %v2573_v21, 5  ;;  %v2732_v47 = vrot.slane %v2576_v50, 2  ;;  %v1811_v40 = vadd.f32 %v1810_v6, %v1809_v55 }
 0x1ae   :  { %v2031_v60 = vsel %vm1651_vm0, %v1471_v30, 0.0  ;;  %v1801_v49 = vrot.slane %v1800_v35, 2  ;;  %v4546_v30 = vpop.permute.xlu0 %2286  ;;  %v2018_v61 = vadd.f32 %v2017_v44, %v2016_v17  ;;  %v2028_v4 = vrot.slane %v2027_v41, 1 }
 0x1af   :  { %v3359_v2 = vpop.f32.mrf.mxu0  ;;  %v2032_v0 = vadd.f32 %v2031_v60, %v2030_v1  ;;  %v2042_v22 = vrot.slane %v2041_v53, 4  ;;  %v2727_v51 = vsel %vm2708_vm5, %v2726_v27, %v2725_v26  ;;  %v2734_v1 = vrot.slane %v2577_v45, 1 }
 0x1b0   :  { %v1823_v29 = vsel %vm1651_vm0, %v3359_v2, 0.0  ;;  %v1812_v2 = vrot.slane %v1811_v40, 1  ;;  %v2331_v7 = vrot.slane %v4546_v30, 4  ;;  %v2001_v34 = vrot.slane %v2000_v33, 1 }
 0x1b1   :  { %v1276_v10 = vpop.f32.mrf.mxu0  ;;  %v2043_v5 = vadd.f32 %v2042_v22, %v2041_v53  ;;  %v2033_v23 = vrot.slane %v2032_v0, 4  ;;  %v2729_v53 = vsel %vm2711_vm6, %v2728_v24, %v2727_v51  ;;  %v1802_v55 = vadd.f32 %v1801_v49, %v1800_v35 }
 0x1b2   :  { %v1814_v52 = vsel %vm1651_vm0, %v1276_v10, 0.0  ;;  %v2731_v62 = vsel %vm2714_vm7, %v2730_v32, %v2729_v53  ;;  %v4554_v11 = vadd.f32 %v1983_v18, %v4501_v36  ;;  %v2011_v54 = vadd.f32 %v2010_v31, %v4517_v9 }
 0x1b3   :  { %v3360_v20 = vpop.f32.mrf.mxu0  ;;  %v2044_v59 = vrot.slane %v2043_v5, 2  ;;  %v2034_v43 = vadd.f32 %v2033_v23, %v2032_v0  ;;  %v2733_v63 = vsel %vm2717_vm8, %v2732_v47, %v2731_v62  ;;  %v2333_v19 = vrot.slane %v4546_v30, 6 }
 0x1b4   :  { %v1824_v48 = vsel %vm1651_vm0, %v3360_v20, 0.0  ;;  %v2735_v10 = vsel %vm2720_vm9, %v2734_v1, %v2733_v63  ;;  %v2334_v20 = vrot.slane %v4546_v30, 7  ;;  %v2029_v17 = vadd.f32 %v2028_v4, %v2027_v41 }
 0x1b5   :  { %v1279_v38 = vpop.f32.mrf.mxu0  ;;  %v1825_v3 = vadd.f32 %v1824_v48, %v1823_v29  ;;  %v2045_v15 = vadd.f32 %v2044_v59, %v2043_v5  ;;  %v2035_v16 = vrot.slane %v2034_v43, 2  ;;  %3458 = vmatmul.mubr.msk.f32.vlgmr.msra.gmra.mxu1 %vm1651_vm0, %v2735_v10  ;;  %v2019_v21 = vrot.slane %v2018_v61, 1 }
 0x1b6   :  { %v1815_v8 = vsel %vm1651_vm0, %v1279_v38, 0.0  ;;  %v1813_v50 = vadd.f32 %v1812_v2, %v1811_v40  ;;  %v2002_v6 = vadd.f32 %v2001_v34, %v2000_v33  ;;  %v2335_v32 = vrot.slane %v4556_v12, 1 }
 0x1b7   :  { %v3411_v13 = vpop.f32.mrf.mxu1  ;;  %v1816_v60 = vadd.f32 %v1815_v8, %v1814_v52  ;;  %v1826_v14 = vrot.slane %v1825_v3, 4  ;;  %v1803_v35 = vrot.slane %v1802_v55, 1  ;;  %v2314_v38 = vrot.slane %v4529_v28, 1 }
 0x1b8   :  { %v2046_v24 = vrot.slane %v2045_v15, 1  ;;  %v2036_v9 = vadd.f32 %v2035_v16, %v2034_v43  ;;  %v2057_v31 = vsel %vm1651_vm0, %v3411_v13, 0.0  ;;  %v2337_v23 = vrot.slane %v4556_v12, 3 }
 0x1b9   :  { %v4544_v56 = vpop.f32.mrf.mxu1  ;;  %v1817_v57 = vrot.slane %v1816_v60, 4  ;;  %v1827_v26 = vadd.f32 %v1826_v14, %v1825_v3  ;;  %v2461_v27 = vmul.f32 %v2335_v32, %v2029_v17  ;;  %v2020_v33 = vadd.f32 %v2019_v21, %v2018_v61 }
 0x1ba   :  { %v2437_v47 = vmul.f32 %v2314_v38, %v1813_v50  ;;  %v1804_v8 = vadd.f32 %v1803_v35, %v1802_v55  ;;  %v2047_v13 = vadd.f32 %v2046_v24, %v2045_v15  ;;  %v2037_v52 = vrot.slane %v2036_v9, 1 }
 0x1bb   :  { %v3412_v0 = vpop.f32.mrf.mxu1  ;;  %v1818_v58 = vadd.f32 %v1817_v57, %v1816_v60  ;;  %v1828_v60 = vrot.slane %v1827_v26, 2  ;;  %v2532_v3 = vmul.f32 %v4425_v39, %v2461_v27  ;;  %v2460_v4 = vmul.f32 %v4556_v12, %v2020_v33 }
 0x1bc   :  { %v2058_v36 = vsel %vm1651_vm0, %v3412_v0, 0.0  ;;  %v2508_v2 = vmul.f32 %v4425_v39, %v2437_v47  ;;  %v2048_v63 = vsel %vm1651_vm0, %v4544_v56, 0.0  ;;  %v2458_v15 = vmul.f32 %v2333_v19, %v2002_v6 }
 0x1bd   :  { %v1819_v37 = vrot.slane %v1818_v58, 2  ;;  %v2059_v41 = vadd.f32 %v2058_v36, %v2057_v31  ;;  %v1487_v44 = vpop.f32.mrf.mxu1  ;;  %v2436_v16 = vmul.f32 %v4529_v28, %v1804_v8  ;;  %v4580_v14 = vmul.f32 %v2334_v20, %v2011_v54 }
 0x1be   :  { %v2049_v59 = vsel %vm1651_vm0, %v1487_v44, 0.0  ;;  %v1829_v17 = vadd.f32 %v1828_v60, %v1827_v26  ;;  %v4583_v36 = vadd.f32 %v4440_v42, %v2532_v3  ;;  %v2531_v56 = vmul.f32 %v4425_v39, %v2460_v4 }
 0x1bf   :  { %v3363_v22 = vpop.f32.mrf.mxu0  ;;  %v1820_v49 = vadd.f32 %v1819_v37, %v1818_v58  ;;  %v2060_v62 = vrot.slane %v2059_v41, 4  ;;  %v2050_v34 = vadd.f32 %v2049_v59, %v2048_v63  ;;  %v2463_v58 = vmul.f32 %v2337_v23, %v2047_v13 }
 0x1c0   :  { %v1841_v40 = vsel %vm1651_vm0, %v3363_v22, 0.0  ;;  %v2038_v22 = vadd.f32 %v2037_v52, %v2036_v9  ;;  %v4588_v35 = vadd.f32 %v4440_v42, %v2508_v2  ;;  %v4591_v54 = vmul.f32 %v4425_v39, %v2458_v15 }
 0x1c1   :  { %v1292_v18 = vpop.f32.mrf.mxu0  ;;  %v1821_v57 = vrot.slane %v1820_v49, 1  ;;  %v2061_v21 = vadd.f32 %v2060_v62, %v2059_v41  ;;  %v2051_v6 = vrot.slane %v2050_v34, 4  ;;  %v2507_v20 = vmul.f32 %v4425_v39, %v2436_v16 }
 0x1c2   :  { %v1832_v43 = vsel %vm1651_vm0, %v1292_v18, 0.0  ;;  %v2336_v18 = vrot.slane %v4556_v12, 2  ;;  %v2534_v24 = vmul.f32 %v4425_v39, %v2463_v58  ;;  %v2315_v23 = vrot.slane %v4529_v28, 2 }
 0x1c3   :  { %v3364_v5 = vpop.f32.mrf.mxu0  ;;  %v1822_v19 = vadd.f32 %v1821_v57, %v1820_v49  ;;  %v2062_v26 = vrot.slane %v2061_v21, 2  ;;  %v2778_v44 = vrot.slane %v4583_v36, 7  ;;  %v2316_v27 = vrot.slane %v4529_v28, 3 }
 0x1c4   :  { %v1842_v45 = vsel %vm1651_vm0, %v3364_v5, 0.0  ;;  %v2462_v9 = vmul.f32 %v2336_v18, %v2038_v22  ;;  %v1830_v5 = vrot.slane %v1829_v17, 1  ;;  %v2052_v8 = vadd.f32 %v2051_v6, %v2050_v34 }
 0x1c5   :  { %v1295_v48 = vpop.f32.mrf.mxu0  ;;  %v1843_v29 = vadd.f32 %v1842_v45, %v1841_v40  ;;  %v4598_v45 = vadd.f32 %v4440_v42, %v2531_v56  ;;  %v2736_v40 = vrot.slane %v4588_v35, 7  ;;  %v4606_v13 = vadd.f32 %v4440_v42, %v2534_v24 }
 0x1c6   :  { %v1833_v51 = vsel %vm1651_vm0, %v1295_v48, 0.0  ;;  %v2438_v48 = vmul.f32 %v2315_v23, %v1822_v19  ;;  %v4609_v52 = vmul.f32 %v4425_v39, %v2462_v9  ;;  %v2339_v59 = vrot.slane %v4556_v12, 5 }
 0x1c7   :  { %v4572_v53 = vpop.f32.mrf.mxu1  ;;  %v1844_v61 = vrot.slane %v1843_v29, 4  ;;  %v1834_v1 = vadd.f32 %v1833_v51, %v1832_v43  ;;  %v4603_v51 = vadd.f32 %v4440_v42, %v2507_v20  ;;  %v1831_v60 = vadd.f32 %v1830_v5, %v1829_v17 }
 0x1c8   :  { %v2063_v62 = vadd.f32 %v2062_v26, %v2061_v21  ;;  %v2509_v34 = vmul.f32 %v4425_v39, %v2438_v48  ;;  %v2318_v26 = vrot.slane %v4529_v28, 5 }
 0x1c9   :  { %v1845_v55 = vadd.f32 %v1844_v61, %v1843_v29  ;;  %v1835_v10 = vrot.slane %v1834_v1, 4  ;;  %v1500_v0 = vpop.f32.mrf.mxu1  ;;  %v2338_v61 = vrot.slane %v4556_v12, 4  ;;  %v2439_v56 = vmul.f32 %v2316_v27, %v1831_v60 }
 0x1ca   :  { %v2064_v24 = vrot.slane %v2063_v62, 1  ;;  %v2580_v23 = vadd.f32 %v4440_v42, %v2509_v34  ;;  %v2320_v27 = vrot.slane %v4529_v28, 7 }
 0x1cb   :  { %v1836_v50 = vadd.f32 %v1835_v10, %v1834_v1  ;;  %v1846_v32 = vrot.slane %v1845_v55, 2  ;;  %v3416_v38 = vpop.f32.mrf.mxu1  ;;  %v2317_v1 = vrot.slane %v4529_v28, 4  ;;  %v2066_v10 = vsel %vm1651_vm0, %v1500_v0, 0.0 }
 0x1cc   :  { %v2076_v58 = vsel %vm1651_vm0, %v3416_v38, 0.0  ;;  %v2075_v0 = vsel %vm1651_vm0, %v4572_v53, 0.0 }
 0x1cd   :  { %v1837_v37 = vrot.slane %v1836_v50, 2  ;;  %v1847_v33 = vadd.f32 %v1846_v32, %v1845_v55  ;;  %v1503_v29 = vpop.f32.mrf.mxu1  ;;  %v2053_v55 = vrot.slane %v2052_v8, 2  ;;  %v2077_v38 = vadd.f32 %v2076_v58, %v2075_v0 }
 0x1ce   :  { %v2067_v2 = vsel %vm1651_vm0, %v1503_v29, 0.0 }
 0x1cf   :  { %v3367_v31 = vpop.f32.mrf.mxu0  ;;  %v1838_v41 = vadd.f32 %v1837_v37, %v1836_v50  ;;  %v1848_v3 = vrot.slane %v1847_v33, 1  ;;  %v2782_v50 = vrot.slane %v4606_v13, 5  ;;  %v2068_v18 = vadd.f32 %v2067_v2, %v2066_v10 }
 0x1d0   :  { %v1859_v15 = vsel %vm1651_vm0, %v3367_v31, 0.0  ;;  %v2054_v9 = vadd.f32 %v2053_v55, %v2052_v8 }
 0x1d1   :  { %v1308_v47 = vpop.f32.mrf.mxu0  ;;  %v1839_v49 = vrot.slane %v1838_v41, 1  ;;  %v1849_v6 = vadd.f32 %v1848_v3, %v1847_v33  ;;  %v2069_v33 = vrot.slane %v2068_v18, 4 }
 0x1d2   :  { %v1850_v22 = vsel %vm1651_vm0, %v1308_v47, 0.0  ;;  %v2510_v47 = vmul.f32 %v4425_v39, %v2439_v56  ;;  %v2055_v3 = vrot.slane %v2054_v9, 1 }
 0x1d3   :  { %v3368_v43 = vpop.f32.mrf.mxu0  ;;  %v1840_v4 = vadd.f32 %v1839_v49, %v1838_v41  ;;  %v2319_v49 = vrot.slane %v4529_v28, 6  ;;  %v2441_v29 = vmul.f32 %v2318_v26, %v1849_v6 }
 0x1d4   :  { %v1860_v63 = vsel %vm1651_vm0, %v3368_v43, 0.0  ;;  %v2581_v28 = vadd.f32 %v4440_v42, %v2510_v47 }
 0x1d5   :  { %v1311_v57 = vpop.f32.mrf.mxu0  ;;  %v1861_v17 = vadd.f32 %v1860_v63, %v1859_v15  ;;  %v2440_v37 = vmul.f32 %v2317_v1, %v1840_v4  ;;  %v2065_v1 = vadd.f32 %v2064_v24, %v2063_v62  ;;  %v2078_v4 = vrot.slane %v2077_v38, 4 }
 0x1d6   :  { %v3419_v16 = vpop.f32.mrf.mxu1  ;;  %v1851_v21 = vsel %vm1651_vm0, %v1311_v57, 0.0  ;;  %v2738_v57 = vrot.slane %v2580_v23, 6  ;;  %v2070_v15 = vadd.f32 %v2069_v33, %v2068_v18 }
 0x1d7   :  { %v1852_v32 = vadd.f32 %v1851_v21, %v1850_v22  ;;  %v1862_v20 = vrot.slane %v1861_v17, 4  ;;  %v2511_v8 = vmul.f32 %v4425_v39, %v2440_v37  ;;  %v2093_v55 = vsel %vm1651_vm0, %v3419_v16, 0.0 }
 0x1d8   :  { %v1516_v19 = vpop.f32.mrf.mxu1  ;;  %v2512_v21 = vmul.f32 %v4425_v39, %v2441_v29  ;;  %v2079_v6 = vadd.f32 %v2078_v4, %v2077_v38  ;;  %v2737_v16 = vsel %vm2702_vm4, %v2736_v40, %v4603_v51  ;;  %v2071_v23 = vrot.slane %v2070_v15, 2 }
 0x1d9   :  { %v1853_v31 = vrot.slane %v1852_v32, 4  ;;  %v1863_v41 = vadd.f32 %v1862_v20, %v1861_v17  ;;  %v2582_v62 = vadd.f32 %v4440_v42, %v2511_v8 }
 0x1da   :  { %v3420_v5 = vpop.f32.mrf.mxu1  ;;  %v2583_v35 = vadd.f32 %v4440_v42, %v2512_v21 }
 0x1db   :  { %v1854_v48 = vadd.f32 %v1853_v31, %v1852_v32  ;;  %v1864_v43 = vrot.slane %v1863_v41, 2  ;;  %v2094_v60 = vsel %vm1651_vm0, %v3420_v5, 0.0  ;;  %v2084_v32 = vsel %vm1651_vm0, %v1516_v19, 0.0 }
 0x1dc   :  { %v1519_v53 = vpop.f32.mrf.mxu1  ;;  %v2095_v22 = vadd.f32 %v2094_v60, %v2093_v55  ;;  %v2739_v5 = vsel %vm2705_vm3, %v2738_v57, %v2737_v16  ;;  %v2742_v47 = vrot.slane %v2582_v62, 4  ;;  %v2740_v60 = vrot.slane %v2581_v28, 5 }
 0x1dd   :  { %v1855_v2 = vrot.slane %v1854_v48, 2  ;;  %v1865_v34 = vadd.f32 %v1864_v43, %v1863_v41  ;;  %v2085_v10 = vsel %vm1651_vm0, %v1519_v53, 0.0  ;;  %v4650_v43 = vadd.f32 %v4440_v42, %v4609_v52 }
 0x1de   :  { %v3371_v63 = vpop.f32.mrf.mxu0  ;;  %v2086_v0 = vadd.f32 %v2085_v10, %v2084_v32  ;;  %v2096_v41 = vrot.slane %v2095_v22, 4  ;;  %v2072_v10 = vadd.f32 %v2071_v23, %v2070_v15 }
 0x1df   :  { %v1856_v58 = vadd.f32 %v1855_v2, %v1854_v48  ;;  %v1866_v56 = vrot.slane %v1865_v34, 1  ;;  %v1877_v24 = vsel %vm1651_vm0, %v3371_v63, 0.0  ;;  %v2056_v63 = vadd.f32 %v2055_v3, %v2054_v9 }
 0x1e0   :  { %v1324_v17 = vpop.f32.mrf.mxu0  ;;  %v2087_v40 = vrot.slane %v2086_v0, 4 }
 0x1e1   :  { %v1857_v37 = vrot.slane %v1856_v58, 1  ;;  %v1867_v18 = vadd.f32 %v1866_v56, %v1865_v34  ;;  %v1868_v51 = vsel %vm1651_vm0, %v1324_v17, 0.0  ;;  %v2097_v34 = vadd.f32 %v2096_v41, %v2095_v22 }
 0x1e2   :  { %v3372_v20 = vpop.f32.mrf.mxu0  ;;  %v2744_v17 = vrot.slane %v2583_v35, 3  ;;  %v2088_v21 = vadd.f32 %v2087_v40, %v2086_v0  ;;  %v2341_v35 = vrot.slane %v4556_v12, 7 }
 0x1e3   :  { %v1878_v31 = vsel %vm1651_vm0, %v3372_v20, 0.0  ;;  %v1858_v26 = vadd.f32 %v1857_v37, %v1856_v58  ;;  %v2443_v33 = vmul.f32 %v2320_v27, %v1867_v18  ;;  %v2080_v27 = vrot.slane %v2079_v6, 2 }
 0x1e4   :  { %v1879_v19 = vadd.f32 %v1878_v31, %v1877_v24  ;;  %v1327_v38 = vpop.f32.mrf.mxu0  ;;  %v2741_v58 = vsel %vm2708_vm5, %v2740_v60, %v2739_v5  ;;  %v2098_v15 = vrot.slane %v2097_v34, 2  ;;  %v2073_v20 = vrot.slane %v2072_v10, 1 }
 0x1e5   :  { %v1869_v48 = vsel %vm1651_vm0, %v1327_v38, 0.0  ;;  %v2442_v53 = vmul.f32 %v2319_v49, %v1858_v26  ;;  %v2514_v2 = vmul.f32 %v4425_v39, %v2443_v33  ;;  %v2465_v49 = vmul.f32 %v2339_v59, %v2065_v1 }
 0x1e6   :  { %v1880_v29 = vrot.slane %v1879_v19, 4  ;;  %v3423_v8 = vpop.f32.mrf.mxu1  ;;  %v1870_v4 = vadd.f32 %v1869_v48, %v1868_v51  ;;  %v2743_v56 = vsel %vm2711_vm6, %v2742_v47, %v2741_v58  ;;  %v2464_v59 = vmul.f32 %v2338_v61, %v2056_v63 }
 0x1e7   :  { %v2513_v57 = vmul.f32 %v4425_v39, %v2442_v53  ;;  %v2111_v3 = vsel %vm1651_vm0, %v3423_v8, 0.0  ;;  %v2585_v32 = vadd.f32 %v4440_v42, %v2514_v2  ;;  %v2081_v1 = vadd.f32 %v2080_v27, %v2079_v6 }
 0x1e8   :  { %v1532_v55 = vpop.f32.mrf.mxu1  ;;  %v1881_v52 = vadd.f32 %v1880_v29, %v1879_v19  ;;  %v1871_v9 = vrot.slane %v1870_v4, 4  ;;  %v2745_v18 = vsel %vm2714_vm7, %v2744_v17, %v2743_v56  ;;  %v2089_v31 = vrot.slane %v2088_v21, 2  ;;  %v4667_v19 = vpop.permute.xlu0 %2294 }
 0x1e9   :  { %v2584_v28 = vadd.f32 %v4440_v42, %v2513_v57  ;;  %v2102_v23 = vsel %vm1651_vm0, %v1532_v55, 0.0  ;;  %v2748_v47 = vrot.slane %v2585_v32, 1  ;;  %v2780_v33 = vrot.slane %v4650_v43, 6 }
 0x1ea   :  { %v3424_v62 = vpop.f32.mrf.mxu1  ;;  %v1882_v5 = vrot.slane %v1881_v52, 2  ;;  %v1872_v38 = vadd.f32 %v1871_v9, %v1870_v4  ;;  %v2535_v48 = vmul.f32 %v4425_v39, %v2464_v59  ;;  %v2099_v53 = vadd.f32 %v2098_v15, %v2097_v34 }
 0x1eb   :  { %v2112_v22 = vsel %vm1651_vm0, %v3424_v62, 0.0  ;;  %v2746_v24 = vrot.slane %v2584_v28, 2  ;;  %v2340_v51 = vrot.slane %v4556_v12, 6  ;;  %v4676_v4 = vmul.f32 %v4425_v39, %v2465_v49 }
 0x1ec   :  { %v2113_v37 = vadd.f32 %v2112_v22, %v2111_v3  ;;  %v1535_v0 = vpop.f32.mrf.mxu1  ;;  %v2342_v2 = vrot.slane %v4667_v19, 1  ;;  %v2090_v63 = vadd.f32 %v2089_v31, %v2088_v21  ;;  %v1883_v27 = vadd.f32 %v1882_v5, %v1881_v52 }
 0x1ed   :  { %v2103_v16 = vsel %vm1651_vm0, %v1535_v0, 0.0  ;;  %v2747_v6 = vsel %vm2717_vm8, %v2746_v24, %v2745_v18  ;;  %v2082_v55 = vrot.slane %v2081_v1, 1  ;;  %v2074_v58 = vadd.f32 %v2073_v20, %v2072_v10 }
 0x1ee   :  { %v2114_v26 = vrot.slane %v2113_v37, 4  ;;  %v3375_v41 = vpop.f32.mrf.mxu0  ;;  %v2104_v61 = vadd.f32 %v2103_v16, %v2102_v23  ;;  %v2749_v60 = vsel %vm2720_vm9, %v2748_v47, %v2747_v6  ;;  %v1873_v34 = vrot.slane %v1872_v38, 2 }
 0x1ef   :  { %3460 = vmatprep.mubr.msk.f32.mxu1 %vm1651_vm0, %v2749_v60  ;;  %v4682_v12 = vadd.f32 %v4440_v42, %v2535_v48  ;;  %v2100_v62 = vrot.slane %v2099_v53, 1  ;;  %v2321_v28 = vrot.slane %v4537_v46, 1  ;;  %v1895_v49 = vsel %vm1651_vm0, %v3375_v41, 0.0  ;;  %v4702_v60 = vpop.permute.xlu1 %2298 }
 0x1f0   :  { %v1340_v40 = vpop.f32.mrf.mxu0  ;;  %v2115_v29 = vadd.f32 %v2114_v26, %v2113_v37  ;;  %v2105_v8 = vrot.slane %v2104_v61, 4  ;;  %v2091_v22 = vrot.slane %v2090_v63, 1  ;;  %v1884_v32 = vrot.slane %v1883_v27, 1 }
 0x1f1   :  { %v2344_v10 = vrot.slane %v4667_v19, 3  ;;  %v1886_v59 = vsel %vm1651_vm0, %v1340_v40, 0.0  ;;  %v2083_v42 = vadd.f32 %v2082_v55, %v2081_v1  ;;  %v2466_v37 = vmul.f32 %v2340_v51, %v2074_v58 }
 0x1f2   :  { %v3376_v57 = vpop.f32.mrf.mxu0  ;;  %v2116_v9 = vrot.slane %v2115_v29, 2  ;;  %v2106_v21 = vadd.f32 %v2105_v8, %v2104_v61  ;;  %v1874_v0 = vadd.f32 %v1873_v34, %v1872_v38  ;;  %v2784_v16 = vrot.slane %v4682_v12, 4 }
 0x1f3   :  { %v1896_v17 = vsel %vm1651_vm0, %v3376_v57, 0.0  ;;  %v2101_v18 = vadd.f32 %v2100_v62, %v2099_v53  ;;  %v2343_v24 = vrot.slane %v4667_v19, 2  ;;  %v2323_v31 = vrot.slane %v4537_v46, 3 }
 0x1f4   :  { %v1343_v56 = vpop.f32.mrf.mxu0  ;;  %v1897_v52 = vadd.f32 %v1896_v17, %v1895_v49  ;;  %v2117_v23 = vadd.f32 %v2116_v9, %v2115_v29  ;;  %v2107_v26 = vrot.slane %v2106_v21, 2  ;;  %v2092_v6 = vadd.f32 %v2091_v22, %v2090_v63 }
 0x1f5   :  { %v1887_v3 = vsel %vm1651_vm0, %v1343_v56, 0.0  ;;  %v1885_v47 = vadd.f32 %v1884_v32, %v1883_v27  ;;  %v2322_v48 = vrot.slane %v4537_v46, 2  ;;  %v2346_v38 = vrot.slane %v4667_v19, 5 }
 0x1f6   :  { %v4689_v15 = vpop.f32.mrf.mxu1  ;;  %v1888_v20 = vadd.f32 %v1887_v3, %v1886_v59  ;;  %v1898_v41 = vrot.slane %v1897_v52, 4  ;;  %v4696_v40 = vmul.f32 %v2341_v35, %v2083_v42  ;;  %v4699_v53 = vmul.f32 %v4425_v39, %v2466_v37 }
 0x1f7   :  { %v1875_v51 = vrot.slane %v1874_v0, 1  ;;  %v2345_v8 = vrot.slane %v4667_v19, 4  ;;  %v2469_v29 = vmul.f32 %v2342_v2, %v2101_v18  ;;  %v2325_v63 = vrot.slane %v4537_v46, 5 }
 0x1f8   :  { %v1548_v5 = vpop.f32.mrf.mxu1  ;;  %v1889_v61 = vrot.slane %v1888_v20, 4  ;;  %v2324_v27 = vrot.slane %v4537_v46, 4  ;;  %v2118_v58 = vrot.slane %v2117_v23, 1  ;;  %v2108_v34 = vadd.f32 %v2107_v26, %v2106_v21  ;;  %v4716_v21 = vld [vmem:[%s5097_s3] ss:$0 sm:$0xff] }
 0x1f9   :  { %v1899_v17 = vadd.f32 %v1898_v41, %v1897_v52  ;;  %v2468_v39 = vmul.f32 %v4667_v19, %v2092_v6  ;;  %v2445_v62 = vmul.f32 %v2321_v28, %v1885_v47  ;;  %v2347_v56 = vrot.slane %v4667_v19, 6 }
 0x1fa   :  { %v3428_v1 = vpop.f32.mrf.mxu1  ;;  %v1890_v57 = vadd.f32 %v1889_v61, %v1888_v20  ;;  %v2327_v9 = vrot.slane %v4537_v46, 7  ;;  %v1876_v2 = vadd.f32 %v1875_v51, %v1874_v0  ;;  %v2326_v22 = vrot.slane %v4537_v46, 6 }
 0x1fb   :  { %v2540_v52 = vmul.f32 %v4716_v21, %v2469_v29  ;;  %v2119_v0 = vadd.f32 %v2118_v58, %v2117_v23  ;;  %v2109_v20 = vrot.slane %v2108_v34, 1  ;;  %v1900_v18 = vrot.slane %v1899_v17, 2 }
 0x1fc   :  { %v1551_v55 = vpop.f32.mrf.mxu1  ;;  %v1891_v28 = vrot.slane %v1890_v57, 2  ;;  %v2120_v26 = vsel %vm1651_vm0, %v1548_v5, 0.0  ;;  %v2539_v41 = vmul.f32 %v4716_v21, %v2468_v39  ;;  %v2516_v61 = vmul.f32 %v4716_v21, %v2445_v62  ;;  %v4732_v5 = vld [vmem:[%s5098_s4] ss:$0 sm:$0xff] }
 0x1fd   :  { %v2121_v3 = vsel %vm1651_vm0, %v1551_v55, 0.0  ;;  %v2444_v29 = vmul.f32 %v4537_v46, %v1876_v2  ;;  %v2130_v55 = vsel %vm1651_vm0, %v3428_v1, 0.0  ;;  %v4735_v58 = vadd.f32 %v4732_v5, %v2540_v52 }
 0x1fe   :  { %v3379_v49 = vpop.f32.mrf.mxu0  ;;  %v2122_v6 = vadd.f32 %v2121_v3, %v2120_v26  ;;  %v1892_v39 = vadd.f32 %v1891_v28, %v1890_v57  ;;  %v2129_v62 = vsel %vm1651_vm0, %v4689_v15, 0.0  ;;  %v2471_v1 = vmul.f32 %v2344_v10, %v2119_v0 }
 0x1ff   :  { %v1913_v32 = vsel %vm1651_vm0, %v3379_v49, 0.0  ;;  %v2110_v49 = vadd.f32 %v2109_v20, %v2108_v34  ;;  %v1901_v26 = vadd.f32 %v1900_v18, %v1899_v17  ;;  %v2131_v37 = vadd.f32 %v2130_v55, %v2129_v62 }
 0x200   :  { %v1356_v59 = vpop.f32.mrf.mxu0  ;;  %v2123_v51 = vrot.slane %v2122_v6, 4  ;;  %v2587_v57 = vadd.f32 %v4732_v5, %v2516_v61  ;;  %v2515_v15 = vmul.f32 %v4716_v21, %v2444_v29  ;;  %v2792_v10 = vrot.slane %v4735_v58, 7  ;;  %v2982_v29 = vld [vmem:[%s5099_s9 + $0x18] sm:$0xff] }
 0x201   :  { %v1904_v42 = vsel %vm1651_vm0, %v1356_v59, 0.0  ;;  %v4750_v34 = vadd.f32 %v4732_v5, %v2539_v41  ;;  %v1893_v17 = vrot.slane %v1892_v39, 1  ;;  %v2456_v59 = vmul.f32 %v2331_v7, %v4554_v11  ;;  %v2981_v41 = vld [vmem:[%s5099_s9 + $0x10] sm:$0xff]  ;;  %3469 = vmatprep.subr.mxu1 %v2982_v29 }
 0x202   :  { %v3380_v47 = vpop.f32.mrf.mxu0  ;;  %v2542_v0 = vmul.f32 %v4716_v21, %v2471_v1  ;;  %v2470_v55 = vmul.f32 %v2343_v24, %v2110_v49  ;;  %v1902_v7 = vrot.slane %v1901_v26, 1  ;;  %v2132_v11 = vrot.slane %v2131_v37, 4  ;;  %3470 = vmatpush3.msra.mxu1 %v2982_v29  ;;  %v2980_v1 = vld [vmem:[%s5099_s9 + $0x8] sm:$0xff] }
 0x203   :  { %v1914_v23 = vsel %vm1651_vm0, %v3380_v47, 0.0  ;;  %v2586_v62 = vadd.f32 %v4732_v5, %v2515_v15  ;;  %v2527_v49 = vmul.f32 %v4716_v21, %v2456_v59  ;;  %3471 = vmatprep.subr.mxu1 %v2981_v41  ;;  %v2355_v28 = vrot.slane %v4702_v60, 7 }
 0x204   :  { %v1915_v3 = vadd.f32 %v1914_v23, %v1913_v32  ;;  %v1359_v2 = vpop.f32.mrf.mxu0  ;;  %v2124_v23 = vadd.f32 %v2123_v51, %v2122_v6  ;;  %v4776_v6 = vadd.f32 %v4732_v5, %v2542_v0  ;;  %3472 = vmatpush3.msra.mxu1 %v2981_v41 }
 0x205   :  { %v1905_v47 = vsel %vm1651_vm0, %v1359_v2, 0.0  ;;  %3473 = vmatprep.subr.mxu1 %v2980_v1 }
 0x206   :  { %v1916_v35 = vrot.slane %v1915_v3, 4  ;;  %v4743_v52 = vpop.f32.mrf.mxu1  ;;  %v1906_v32 = vadd.f32 %v1905_v47, %v1904_v42  ;;  %v2332_v42 = vrot.slane %v4546_v30, 5  ;;  %v1894_v47 = vadd.f32 %v1893_v17, %v1892_v39  ;;  %v2979_v39 = vld [vmem:[%s5099_s9] sm:$0xff]  ;;  %3474 = vmatpush3.msra.mxu1 %v2980_v1 }
 0x207   :  { %v2541_v17 = vmul.f32 %v4716_v21, %v2470_v55  ;;  %3475 = vmatprep.subr.mxu1 %v2979_v39 }
 0x208   :  { %v1917_v20 = vadd.f32 %v1916_v35, %v1915_v3  ;;  %v1907_v18 = vrot.slane %v1906_v32, 4  ;;  %v4756_v61 = vpop.f32.mrf.mxu1  ;;  %v2750_v35 = vrot.slane %v2587_v57, 7  ;;  %v2457_v24 = vmul.f32 %v2332_v42, %v4527_v25  ;;  %3476 = vmatpush3.msra.mxu1 %v2979_v39 }
 0x209   :  { %v2133_v25 = vadd.f32 %v2132_v11, %v2131_v37  ;;  %v2125_v42 = vrot.slane %v2124_v23, 2  ;;  %v2446_v41 = vmul.f32 %v2322_v48, %v1894_v47  ;;  %v4793_v37 = vmul.f32 %v4716_v21, %v4580_v14 }
 0x20a   :  { %v1908_v3 = vadd.f32 %v1907_v18, %v1906_v32  ;;  %v1918_v51 = vrot.slane %v1917_v20, 2  ;;  %v3432_v15 = vpop.f32.mrf.mxu1  ;;  %v1903_v18 = vadd.f32 %v1902_v7, %v1901_v26  ;;  %v4784_v0 = vsel %vm2702_vm4, %v2750_v35, %v2586_v62 }
 0x20b   :  { %v2354_v32 = vrot.slane %v4702_v60, 6  ;;  %v2528_v55 = vmul.f32 %v4716_v21, %v2457_v24  ;;  %v4796_v26 = vadd.f32 %v4732_v5, %v2527_v49  ;;  %v2796_v7 = vrot.slane %v4776_v6, 5 }
 0x20c   :  { %v1909_v57 = vrot.slane %v1908_v3, 2  ;;  %v1919_v11 = vadd.f32 %v1918_v51, %v1917_v20  ;;  %v1567_v62 = vpop.f32.mrf.mxu1  ;;  %v2779_v48 = vsel %vm2702_vm4, %v2778_v44, %v4598_v45  ;;  %v2447_v14 = vmul.f32 %v2323_v31, %v1903_v18 }
 0x20d   :  { %v2134_v1 = vrot.slane %v2133_v25, 2  ;;  %v2126_v47 = vadd.f32 %v2125_v42, %v2124_v23  ;;  %v2607_v51 = vadd.f32 %v4732_v5, %v4676_v4  ;;  %v2781_v36 = vsel %vm2705_vm3, %v2780_v33, %v2779_v48 }
 0x20e   :  { %v3383_v59 = vpop.f32.mrf.mxu0  ;;  %v1910_v29 = vadd.f32 %v1909_v57, %v1908_v3  ;;  %v4804_v3 = vadd.f32 %v4732_v5, %v2541_v17  ;;  %v2517_v44 = vmul.f32 %v4716_v21, %v2446_v41  ;;  %v2139_v57 = vsel %vm1651_vm0, %v1567_v62, 0.0 }
 0x20f   :  { %v1931_v49 = vsel %vm1651_vm0, %v3383_v59, 0.0  ;;  %v1920_v23 = vrot.slane %v1919_v11, 1  ;;  %v2783_v4 = vsel %vm2708_vm5, %v2782_v50, %v2781_v36  ;;  %v2135_v42 = vadd.f32 %v2134_v1, %v2133_v25 }
 0x210   :  { %v1372_v2 = vpop.f32.mrf.mxu0  ;;  %v1911_v35 = vrot.slane %v1910_v29, 1  ;;  %v2138_v43 = vsel %vm1651_vm0, %v4756_v61, 0.0  ;;  %v2127_v41 = vrot.slane %v2126_v47, 1  ;;  %v2785_v62 = vsel %vm2711_vm6, %v2784_v16, %v2783_v4 }
 0x211   :  { %v1922_v17 = vsel %vm1651_vm0, %v1372_v2, 0.0  ;;  %v2786_v2 = vrot.slane %v2607_v51, 3  ;;  %v2148_v13 = vsel %vm1651_vm0, %v3432_v15, 0.0  ;;  %v2518_v61 = vmul.f32 %v4716_v21, %v2447_v14 }
 0x212   :  { %v3384_v24 = vpop.f32.mrf.mxu0  ;;  %v1912_v45 = vadd.f32 %v1911_v35, %v1910_v29  ;;  %v2140_v35 = vadd.f32 %v2139_v57, %v2138_v43  ;;  %v2136_v12 = vrot.slane %v2135_v42, 1  ;;  %v2147_v16 = vsel %vm1651_vm0, %v4743_v52, 0.0 }
 0x213   :  { %v1932_v20 = vsel %vm1651_vm0, %v3384_v24, 0.0  ;;  %v2588_v24 = vadd.f32 %v4732_v5, %v2517_v44  ;;  %v2149_v36 = vadd.f32 %v2148_v13, %v2147_v16  ;;  %v4844_v14 = vadd.f32 %v4732_v5, %v4591_v54 }
 0x214   :  { %v1933_v31 = vadd.f32 %v1932_v20, %v1931_v49  ;;  %v1375_v39 = vpop.f32.mrf.mxu0  ;;  %v2448_v48 = vmul.f32 %v2324_v27, %v1912_v45  ;;  %v1921_v49 = vadd.f32 %v1920_v23, %v1919_v11  ;;  %v4835_v20 = vsel %vm2714_vm7, %v2786_v2, %v2785_v62 }
 0x215   :  { %v1923_v18 = vsel %vm1651_vm0, %v1375_v39, 0.0  ;;  %v2141_v15 = vrot.slane %v2140_v35, 4  ;;  %v4840_v45 = vadd.f32 %v4732_v5, %v2528_v55  ;;  %v2128_v44 = vadd.f32 %v2127_v41, %v2126_v47 }
 0x216   :  { %v1934_v33 = vrot.slane %v1933_v31, 4  ;;  %v1924_v59 = vadd.f32 %v1923_v18, %v1922_v17  ;;  %v3435_v29 = vpop.f32.mrf.mxu1  ;;  %v2519_v11 = vmul.f32 %v4716_v21, %v2448_v48  ;;  %v2794_v23 = vrot.slane %v4804_v3, 6 }
 0x217   :  { %v2589_v52 = vadd.f32 %v4732_v5, %v2518_v61  ;;  %v2752_v17 = vrot.slane %v2588_v24, 6  ;;  %v2449_v18 = vmul.f32 %v2325_v63, %v1921_v49  ;;  %v2137_v55 = vadd.f32 %v2136_v12, %v2135_v42 }
 0x218   :  { %v1935_v50 = vadd.f32 %v1934_v33, %v1933_v31  ;;  %v1925_v25 = vrot.slane %v1924_v59, 4  ;;  %v4830_v1 = vpop.f32.mrf.mxu1  ;;  %v4853_v54 = vadd.f32 %v4732_v5, %v4793_v37  ;;  %v2150_v47 = vrot.slane %v2149_v36, 4 }
 0x219   :  { %v2142_v33 = vadd.f32 %v2141_v15, %v2140_v35  ;;  %v2770_v41 = vrot.slane %v4796_v26, 4  ;;  %v2472_v62 = vmul.f32 %v2345_v8, %v2128_v44  ;;  %v2590_v2 = vadd.f32 %v4732_v5, %v2519_v11 }
 0x21a   :  { %v1936_v51 = vrot.slane %v1935_v50, 2  ;;  %v1926_v27 = vadd.f32 %v1925_v25, %v1924_v59  ;;  %v3436_v39 = vpop.f32.mrf.mxu1  ;;  %v2754_v13 = vrot.slane %v2589_v52, 5  ;;  %v2165_v37 = vsel %vm1651_vm0, %v3435_v29, 0.0 }
 0x21b   :  { %v2166_v59 = vsel %vm1651_vm0, %v3436_v39, 0.0  ;;  %v2753_v35 = vsel %vm2705_vm3, %v2752_v17, %v4784_v0  ;;  %v4866_v25 = vmul.f32 %v2346_v38, %v2137_v55  ;;  %v2151_v12 = vadd.f32 %v2150_v47, %v2149_v36 }
 0x21c   :  { %v1937_v57 = vadd.f32 %v1936_v51, %v1935_v50  ;;  %v1927_v31 = vrot.slane %v1926_v27, 2  ;;  %v2520_v50 = vmul.f32 %v4716_v21, %v2449_v18  ;;  %v2167_v24 = vadd.f32 %v2166_v59, %v2165_v37  ;;  %v1583_v51 = vpop.f32.mrf.mxu1 }
 0x21d   :  { %v2143_v16 = vrot.slane %v2142_v33, 2  ;;  %v4876_v0 = vadd.f32 %v4732_v5, %v4699_v53  ;;  %v2543_v38 = vmul.f32 %v4716_v21, %v2472_v62  ;;  %v2756_v29 = vrot.slane %v2590_v2, 4 }
 0x21e   :  { %v1938_v4 = vrot.slane %v1937_v57, 1  ;;  %v1928_v43 = vadd.f32 %v1927_v31, %v1926_v27  ;;  %v3387_v42 = vpop.f32.mrf.mxu0  ;;  %v4872_v27 = vmul.f32 %v4716_v21, %v4696_v40  ;;  %v2755_v44 = vsel %vm2708_vm5, %v2754_v13, %v2753_v35 }
 0x21f   :  { %v1949_v36 = vsel %vm1651_vm0, %v3387_v42, 0.0  ;;  %v2168_v31 = vrot.slane %v2167_v24, 4  ;;  %v2157_v39 = vsel %vm1651_vm0, %v1583_v51, 0.0  ;;  %v2152_v46 = vrot.slane %v2151_v12, 2 }
 0x220   :  { %v1939_v48 = vadd.f32 %v1938_v4, %v1937_v57  ;;  %v1929_v63 = vrot.slane %v1928_v43, 1  ;;  %v1388_v49 = vpop.f32.mrf.mxu0  ;;  %v2591_v57 = vadd.f32 %v4732_v5, %v2520_v50  ;;  %v2757_v62 = vsel %vm2711_vm6, %v2756_v29, %v2755_v44 }
 0x221   :  { %v1940_v18 = vsel %vm1651_vm0, %v1388_v49, 0.0  ;;  %v2169_v50 = vadd.f32 %v2168_v31, %v2167_v24 }
 0x222   :  { %v2451_v8 = vmul.f32 %v2327_v9, %v1939_v48  ;;  %v1930_v61 = vadd.f32 %v1929_v63, %v1928_v43  ;;  %v3388_v15 = vpop.f32.mrf.mxu0  ;;  %v2156_v43 = vsel %vm1651_vm0, %v4830_v1, 0.0  ;;  %v2758_v13 = vrot.slane %v2591_v57, 3 }
 0x223   :  { %v1950_v11 = vsel %vm1651_vm0, %v3388_v15, 0.0  ;;  %v2158_v2 = vadd.f32 %v2157_v39, %v2156_v43  ;;  %v2774_v43 = vrot.slane %v4844_v14, 2 }
 0x224   :  { %v2450_v9 = vmul.f32 %v2326_v22, %v1930_v61  ;;  %v2522_v40 = vmul.f32 %v4716_v21, %v2451_v8  ;;  %v1951_v52 = vadd.f32 %v1950_v11, %v1949_v36  ;;  %v1391_v17 = vpop.f32.mrf.mxu0  ;;  %v2144_v22 = vadd.f32 %v2143_v16, %v2142_v33 }
 0x225   :  { %v1941_v55 = vsel %vm1651_vm0, %v1391_v17, 0.0  ;;  %v4896_v33 = vadd.f32 %v4732_v5, %v2543_v38  ;;  %v2153_v8 = vadd.f32 %v2152_v46, %v2151_v12  ;;  %v2759_v49 = vsel %vm2714_vm7, %v2758_v13, %v2757_v62 }
 0x226   :  { %v2521_v53 = vmul.f32 %v4716_v21, %v2450_v9  ;;  %v3439_v4 = vpop.f32.mrf.mxu1  ;;  %v1952_v47 = vrot.slane %v1951_v52, 4  ;;  %v1942_v59 = vadd.f32 %v1941_v55, %v1940_v18  ;;  %v2593_v42 = vadd.f32 %v4732_v5, %v2522_v40 }
 0x227   :  { %v2145_v61 = vrot.slane %v2144_v22, 1  ;;  %v2183_v9 = vsel %vm1651_vm0, %v3439_v4, 0.0  ;;  %v2159_v44 = vrot.slane %v2158_v2, 4  ;;  %v2170_v40 = vrot.slane %v2169_v50, 2 }
 0x228   :  { %v1596_v48 = vpop.f32.mrf.mxu1  ;;  %v2592_v63 = vadd.f32 %v4732_v5, %v2521_v53  ;;  %v1953_v37 = vadd.f32 %v1952_v47, %v1951_v52  ;;  %v1943_v35 = vrot.slane %v1942_v59, 4  ;;  %v2762_v24 = vrot.slane %v2593_v42, 1 }
 0x229   :  { %v2174_v12 = vsel %vm1651_vm0, %v1596_v48, 0.0  ;;  %v2154_v31 = vrot.slane %v2153_v8, 1  ;;  %v2146_v18 = vadd.f32 %v2145_v61, %v2144_v22  ;;  %v2772_v4 = vrot.slane %v4840_v45, 3 }
 0x22a   :  { %v3440_v1 = vpop.f32.mrf.mxu1  ;;  %v2760_v16 = vrot.slane %v2592_v63, 2  ;;  %v1954_v51 = vrot.slane %v1953_v37, 2  ;;  %v1944_v29 = vadd.f32 %v1943_v35, %v1942_v59  ;;  %v2160_v47 = vadd.f32 %v2159_v44, %v2158_v2 }
 0x22b   :  { %v2184_v15 = vsel %vm1651_vm0, %v3440_v1, 0.0  ;;  %v2776_v48 = vrot.slane %v4853_v54, 1  ;;  %v4911_v63 = vadd.f32 %v4732_v5, %v4872_v27  ;;  %v2544_v42 = vmul.f32 %v4716_v21, %v4866_v25 }
 0x22c   :  { %v2185_v36 = vadd.f32 %v2184_v15, %v2183_v9  ;;  %v1599_v11 = vpop.f32.mrf.mxu1  ;;  %v2761_v38 = vsel %vm2717_vm8, %v2760_v16, %v2759_v49  ;;  %v1955_v57 = vadd.f32 %v1954_v51, %v1953_v37  ;;  %v1945_v39 = vrot.slane %v1944_v29, 2 }
 0x22d   :  { %v2175_v53 = vsel %vm1651_vm0, %v1599_v11, 0.0  ;;  %v2763_v46 = vsel %vm2720_vm9, %v2762_v24, %v2761_v38  ;;  %v2798_v22 = vrot.slane %v4896_v33, 4  ;;  %v2171_v13 = vadd.f32 %v2170_v40, %v2169_v50 }
 0x22e   :  { %v2176_v52 = vadd.f32 %v2175_v53, %v2174_v12  ;;  %v3391_v17 = vpop.f32.mrf.mxu0  ;;  %v2186_v55 = vrot.slane %v2185_v36, 4  ;;  %3461 = vmatmul.mubr.msk.f32.gmra.mxu1 %vm1651_vm0, %v2763_v46  ;;  %v1956_v37 = vrot.slane %v1955_v57, 1  ;;  %v2155_v35 = vadd.f32 %v2154_v31, %v2153_v8 }
 0x22f   :  { %v1946_v61 = vadd.f32 %v1945_v39, %v1944_v29  ;;  %v2788_v2 = vrot.slane %v4876_v0, 2  ;;  %v2474_v16 = vmul.f32 %v2347_v56, %v2146_v18  ;;  %v1967_v27 = vsel %vm1651_vm0, %v3391_v17, 0.0 }
 0x230   :  { %v2177_v59 = vrot.slane %v2176_v52, 4  ;;  %v1404_v62 = vpop.f32.mrf.mxu0  ;;  %v2187_v51 = vadd.f32 %v2186_v55, %v2185_v36  ;;  %v2161_v15 = vrot.slane %v2160_v47, 2  ;;  %v2790_v50 = vrot.slane %v4911_v63, 1 }
 0x231   :  { %v2172_v8 = vrot.slane %v2171_v13, 1  ;;  %v1957_v29 = vadd.f32 %v1956_v37, %v1955_v57  ;;  %v1958_v11 = vsel %vm1651_vm0, %v1404_v62, 0.0  ;;  %v5105_v38 = vrot.slane %v4667_v19, 7 }
 0x232   :  { %v2178_v1 = vadd.f32 %v2177_v59, %v2176_v52  ;;  %v3392_v49 = vpop.f32.mrf.mxu0  ;;  %v1947_v36 = vrot.slane %v1946_v61, 1  ;;  %v2545_v12 = vmul.f32 %v4716_v21, %v2474_v16  ;;  %v2188_v53 = vrot.slane %v2187_v51, 2 }
 0x233   :  { %v1968_v9 = vsel %vm1651_vm0, %v3392_v49, 0.0  ;;  %v2475_v56 = vmul.f32 %v5105_v38, %v2155_v35  ;;  %v2793_v57 = vsel %vm2702_vm4, %v2792_v10, %v4750_v34  ;;  %v4932_v46 = vadd.f32 %v4732_v5, %v2544_v42 }
 0x234   :  { %v2179_v25 = vrot.slane %v2178_v1, 2  ;;  %v1969_v44 = vadd.f32 %v1968_v9, %v1967_v27  ;;  %v1407_v33 = vpop.f32.mrf.mxu0  ;;  %v2795_v19 = vsel %vm2705_vm3, %v2794_v23, %v2793_v57  ;;  %v2173_v18 = vadd.f32 %v2172_v8, %v2171_v13 }
 0x235   :  { %v1959_v0 = vsel %vm1651_vm0, %v1407_v33, 0.0  ;;  %v2162_v55 = vadd.f32 %v2161_v15, %v2160_v47  ;;  %v5106_v59 = vrot.slane %v4546_v30, 1  ;;  %v4941_v58 = vsel %vm2717_vm8, %v2788_v2, %v4835_v20 }
 0x236   :  { %v1970_v24 = vrot.slane %v1969_v44, 4  ;;  %v1960_v40 = vadd.f32 %v1959_v0, %v1958_v11  ;;  %v2180_v31 = vadd.f32 %v2179_v25, %v2178_v1  ;;  %v3443_v39 = vpop.f32.mrf.mxu1  ;;  %v1948_v10 = vadd.f32 %v1947_v36, %v1946_v61 }
 0x237   :  { %v2453_v62 = vmul.f32 %v5106_v59, %v1957_v29  ;;  %v4944_v42 = vmul.f32 %v4716_v21, %v2475_v56  ;;  %v2189_v1 = vadd.f32 %v2188_v53, %v2187_v51  ;;  %v4947_v23 = vadd.f32 %v4732_v5, %v2545_v12 }
 0x238   :  { %v1971_v52 = vadd.f32 %v1970_v24, %v1969_v44  ;;  %v1961_v17 = vrot.slane %v1960_v40, 4  ;;  %v1612_v37 = vpop.f32.mrf.mxu1  ;;  %v2181_v3 = vrot.slane %v2180_v31, 1  ;;  %v2797_v47 = vsel %vm2708_vm5, %v2796_v7, %v2795_v19 }
 0x239   :  { %v4953_v20 = vsel %vm2711_vm6, %v2798_v22, %v2797_v47  ;;  %v2800_v61 = vrot.slane %v4932_v46, 3  ;;  %v5107_v2 = vrot.slane %v4702_v60, 1  ;;  %v2163_v51 = vrot.slane %v2162_v55, 1 }
 0x23a   :  { %v1972_v34 = vrot.slane %v1971_v52, 2  ;;  %v1962_v35 = vadd.f32 %v1961_v17, %v1960_v40  ;;  %v3444_v49 = vpop.f32.mrf.mxu1  ;;  %v2524_v9 = vmul.f32 %v4716_v21, %v2453_v62  ;;  %v2452_v6 = vmul.f32 %v4546_v30, %v1948_v10 }
 0x23b   :  { %v2477_v27 = vmul.f32 %v5107_v2, %v2173_v18  ;;  %v2202_v15 = vsel %vm1651_vm0, %v3444_v49, 0.0  ;;  %v2201_v33 = vsel %vm1651_vm0, %v3443_v39, 0.0  ;;  %v2190_v8 = vrot.slane %v2189_v1, 1 }
 0x23c   :  { %v1973_v13 = vadd.f32 %v1972_v34, %v1971_v52  ;;  %v1963_v16 = vrot.slane %v1962_v35, 2  ;;  %v1615_v25 = vpop.f32.mrf.mxu1  ;;  %v2182_v22 = vadd.f32 %v2181_v3, %v2180_v31  ;;  %v2203_v29 = vadd.f32 %v2202_v15, %v2201_v33 }
 0x23d   :  { %v2193_v11 = vsel %vm1651_vm0, %v1615_v25, 0.0  ;;  %v2192_v36 = vsel %vm1651_vm0, %v1612_v37, 0.0  ;;  %v2802_v24 = vrot.slane %v4947_v23, 2  ;;  %v2164_v40 = vadd.f32 %v2163_v51, %v2162_v55 }
 0x23e   :  { %v1974_v44 = vrot.slane %v1973_v13, 1  ;;  %v1964_v7 = vadd.f32 %v1963_v16, %v1962_v35  ;;  %v2595_v12 = vadd.f32 %v4732_v5, %v2524_v9  ;;  %v2204_v53 = vrot.slane %v2203_v29, 4 }
 0x23f   :  { %v3447_v0 = vpop.f32.mrf.mxu1  ;;  %v2194_v57 = vadd.f32 %v2193_v11, %v2192_v36  ;;  %v2548_v39 = vmul.f32 %v4716_v21, %v2477_v27  ;;  %v2523_v31 = vmul.f32 %v4716_v21, %v2452_v6  ;;  %v5108_v17 = vrot.slane %v4546_v30, 3 }
 0x240   :  { %v1975_v38 = vadd.f32 %v1974_v44, %v1973_v13  ;;  %v1965_v56 = vrot.slane %v1964_v7, 1  ;;  %v2191_v59 = vadd.f32 %v2190_v8, %v2189_v1  ;;  %v5109_v62 = vrot.slane %v4702_v60, 2 }
 0x241   :  { %v1628_v52 = vpop.f32.mrf.mxu1  ;;  %v2205_v10 = vadd.f32 %v2204_v53, %v2203_v29  ;;  %v2195_v34 = vrot.slane %v2194_v57, 4  ;;  %v5110_v3 = vrot.slane %v4546_v30, 2  ;;  %v2219_v47 = vsel %vm1651_vm0, %v3447_v0, 0.0 }
 0x242   :  { %v2455_v19 = vmul.f32 %v5108_v17, %v1975_v38  ;;  %v1966_v18 = vadd.f32 %v1965_v56, %v1964_v7  ;;  %v2478_v37 = vmul.f32 %v5109_v62, %v2182_v22  ;;  %v2764_v16 = vrot.slane %v2595_v12, 7 }
 0x243   :  { %v3448_v55 = vpop.f32.mrf.mxu1  ;;  %v2206_v2 = vrot.slane %v2205_v10, 2  ;;  %v2196_v27 = vadd.f32 %v2195_v34, %v2194_v57  ;;  %v2594_v9 = vadd.f32 %v4732_v5, %v2523_v31  ;;  %v2210_v25 = vsel %vm1651_vm0, %v1628_v52, 0.0 }
 0x244   :  { %v2526_v35 = vmul.f32 %v4716_v21, %v2455_v19  ;;  %v2454_v49 = vmul.f32 %v5110_v3, %v1966_v18  ;;  %v2220_v13 = vsel %vm1651_vm0, %v3448_v55, 0.0  ;;  %v2476_v8 = vmul.f32 %v4702_v60, %v2164_v40 }
 0x245   :  { %v2221_v51 = vadd.f32 %v2220_v13, %v2219_v47  ;;  %v1631_v1 = vpop.f32.mrf.mxu1  ;;  %v2207_v44 = vadd.f32 %v2206_v2, %v2205_v10  ;;  %v2197_v30 = vrot.slane %v2196_v27, 2  ;;  %v2549_v22 = vmul.f32 %v4716_v21, %v2478_v37 }
 0x246   :  { %v2525_v15 = vmul.f32 %v4716_v21, %v2454_v49  ;;  %v2211_v6 = vsel %vm1651_vm0, %v1631_v1, 0.0  ;;  %v2597_v29 = vadd.f32 %v4732_v5, %v2526_v35  ;;  %v2619_v12 = vadd.f32 %v4732_v5, %v2548_v39 }
 0x247   :  { %v2222_v7 = vrot.slane %v2221_v51, 4  ;;  %v2212_v33 = vadd.f32 %v2211_v6, %v2210_v25  ;;  %v2208_v0 = vrot.slane %v2207_v44, 1  ;;  %v2198_v38 = vadd.f32 %v2197_v30, %v2196_v27 }
 0x248   :  { %v2596_v11 = vadd.f32 %v4732_v5, %v2525_v15  ;;  %v5111_v53 = vrot.slane %v4702_v60, 3  ;;  %v2765_v31 = vsel %vm2702_vm4, %v2764_v16, %v2594_v9  ;;  %v2547_v62 = vmul.f32 %v4716_v21, %v2476_v8 }
 0x249   :  { %v2223_v56 = vadd.f32 %v2222_v7, %v2221_v51  ;;  %v2213_v36 = vrot.slane %v2212_v33, 4  ;;  %v2209_v17 = vadd.f32 %v2208_v0, %v2207_v44  ;;  %v2199_v40 = vrot.slane %v2198_v38, 1 }
 0x24a   :  { %v2479_v57 = vmul.f32 %v5111_v53, %v2191_v59  ;;  %v2766_v52 = vrot.slane %v2596_v11, 6  ;;  %v2620_v37 = vadd.f32 %v4732_v5, %v2549_v22  ;;  %v2768_v10 = vrot.slane %v2597_v29, 5 }
 0x24b   :  { %v2224_v19 = vrot.slane %v2223_v56, 2  ;;  %v2214_v18 = vadd.f32 %v2213_v36, %v2212_v33  ;;  %v2200_v55 = vadd.f32 %v2199_v40, %v2198_v38  ;;  %v2617_v59 = vadd.f32 %v4732_v5, %v4944_v42 }
 0x24c   :  { %v2767_v34 = vsel %vm2705_vm3, %v2766_v52, %v2765_v31  ;;  %v2550_v3 = vmul.f32 %v4716_v21, %v2479_v57  ;;  %v5112_v49 = vrot.slane %v4702_v60, 5  ;;  %v2801_v16 = vsel %vm2714_vm7, %v2800_v61, %v4953_v20  ;;  %v3210_v31 = vld [vmem:[%s5101_s7] ss:$0 sm:$0xff] }
 0x24d   :  { %v2225_v35 = vadd.f32 %v2224_v19, %v2223_v56  ;;  %v2215_v39 = vrot.slane %v2214_v18, 2  ;;  %v2769_v13 = vsel %vm2708_vm5, %v2768_v10, %v2767_v34  ;;  %v5113_v2 = vrot.slane %v4702_v60, 4 }
 0x24e   :  { %v2481_v47 = vmul.f32 %v5112_v49, %v2209_v17  ;;  %v2803_v42 = vsel %vm2717_vm8, %v2802_v24, %v2801_v16  ;;  %v2806_v9 = vrot.slane %v2619_v12, 7  ;;  %v2618_v15 = vadd.f32 %v4732_v5, %v2547_v62 }
 0x24f   :  { %v2480_v27 = vmul.f32 %v5113_v2, %v2200_v55  ;;  %v2226_v51 = vrot.slane %v2225_v35, 1  ;;  %v2216_v1 = vadd.f32 %v2215_v39, %v2214_v18  ;;  %v2808_v25 = vrot.slane %v2620_v37, 6  ;;  %v3211_v18 = vld [vmem:[%s5102_s8] ss:$0 sm:$0xff] }
 0x250   :  { %v2771_v6 = vsel %vm2711_vm6, %v2770_v41, %v2769_v13  ;;  %v2621_v23 = vadd.f32 %v4732_v5, %v2550_v3  ;;  %v2552_v24 = vmul.f32 %v4716_v21, %v2481_v47  ;;  %v2804_v7 = vrot.slane %v2617_v59, 1 }
 0x251   :  { %v2551_v46 = vmul.f32 %v4716_v21, %v2480_v27  ;;  %v2227_v20 = vadd.f32 %v2226_v51, %v2225_v35  ;;  %v2217_v61 = vrot.slane %v2216_v1, 1  ;;  %v2773_v44 = vsel %vm2714_vm7, %v2772_v4, %v2771_v6 }
 0x252   :  { %v2775_v30 = vsel %vm2717_vm8, %v2774_v43, %v2773_v44  ;;  %v2791_v14 = vsel %vm2720_vm9, %v2790_v50, %v4941_v58  ;;  %v2805_v4 = vsel %vm2720_vm9, %v2804_v7, %v2803_v42  ;;  %v2807_v43 = vsel %vm2702_vm4, %v2806_v9, %v2618_v15 }
 0x253   :  { %v2622_v26 = vadd.f32 %v4732_v5, %v2551_v46  ;;  %v2483_v41 = vmul.f32 %v2355_v28, %v2227_v20  ;;  %v2218_v33 = vadd.f32 %v2217_v61, %v2216_v1  ;;  %v2777_v45 = vsel %vm2720_vm9, %v2776_v48, %v2775_v30 }
 0x254   :  { %3463 = vmatprep.mubr.msk.f32.mxu1 %vm1651_vm0, %v2777_v45  ;;  %v2809_v48 = vsel %vm2705_vm3, %v2808_v25, %v2807_v43  ;;  %v2810_v22 = vrot.slane %v2621_v23, 5  ;;  %v2623_v63 = vadd.f32 %v4732_v5, %v2552_v24  ;;  %v3212_v45 = vld [vmem:[%s5103_s10] ss:$0 sm:$0xff] }
 0x255   :  { %v2812_v8 = vrot.slane %v2622_v26, 4  ;;  %v2482_v28 = vmul.f32 %v2354_v32, %v2218_v33  ;;  %3464 = vmatmul.mubr.msk.f32.gmra.mxu1 %vm1651_vm0, %v2791_v14  ;;  %v2554_v54 = vmul.f32 %v4716_v21, %v2483_v41 }
 0x256   :  { %3466 = vmatprep.mubr.msk.f32.mxu1 %vm1651_vm0, %v2805_v4  ;;  %v2811_v29 = vsel %vm2708_vm5, %v2810_v22, %v2809_v48  ;;  %v2814_v11 = vrot.slane %v2623_v63, 3 }
 0x257   :  { %v2553_v50 = vmul.f32 %v4716_v21, %v2482_v28  ;;  %v2625_v58 = vadd.f32 %v4732_v5, %v2554_v54  ;;  %v2813_v32 = vsel %vm2711_vm6, %v2812_v8, %v2811_v29  ;;  %v3201_v21 = vld [vmem:[%s5100_s6] ss:$0 sm:$0xff] }
 0x258   :  { %v2815_v38 = vsel %vm2714_vm7, %v2814_v11, %v2813_v32 }
 0x259   :  { %v2624_v60 = vadd.f32 %v4732_v5, %v2553_v50  ;;  %v2818_v56 = vrot.slane %v2625_v58, 1 }
 0x25b   :  { %v2816_v0 = vrot.slane %v2624_v60, 2 }
 0x25d   :  { %v2817_v36 = vsel %vm2717_vm8, %v2816_v0, %v2815_v38 }
 0x25e   :  { %v2819_v12 = vsel %vm2720_vm9, %v2818_v56, %v2817_v36 }
 0x25f   :  { %3467 = vmatmul.mubr.msk.f32.gmra.mxu1 %vm1651_vm0, %v2819_v12 }
 0x275   :  { %v3459_v53 = vpop.f32.mrf.mxu1 }
 0x276   :  { %v2908_v57 = vadd.f32 %v3459_v53, %v3201_v21 }
 0x277   :  { %v2902_v5 = vpop.f32.mrf.mxu1 }
 0x278   :  { %v2942_v52 = vmax.f32 %v2908_v57, 0.0  ;;  %v2903_v17 = vadd.f32 %v3201_v21, %v2902_v5 }
 0x27a   :  { %v2941_v40 = vmax.f32 %v2903_v17, 0.0  ;;  %v2957_v19 = vmul.f32 %v3210_v31, %v2942_v52 }
 0x27c   :  { %v2956_v62 = vmul.f32 %v3210_v31, %v2941_v40  ;;  %v2972_v10 = vadd.f32 %v3211_v18, %v2957_v19 }
 0x27e   :  { %v2971_v37 = vadd.f32 %v3211_v18, %v2956_v62 }
 0x280   :  { %3477 = vmatprep.mubr.msk.f32.mxu1 %vm1651_vm0, %v2971_v37 }
 0x281   :  { %3478 = vmatmul.mubr.msk.f32.vlgmr.msra.gmra.mxu1 %vm1651_vm0, %v2972_v10 }
 0x2ee   :  { %v3462_v34 = vpop.f32.mrf.mxu1 }
 0x2ef   :  { %v2918_v55 = vadd.f32 %v3462_v34, %v3201_v21 }
 0x2f0   :  { %v2912_v35 = vpop.f32.mrf.mxu1 }
 0x2f1   :  { %v2944_v39 = vmax.f32 %v2918_v55, 0.0  ;;  %v2913_v59 = vadd.f32 %v3201_v21, %v2912_v35 }
 0x2f3   :  { %v2943_v3 = vmax.f32 %v2913_v59, 0.0  ;;  %v2959_v49 = vmul.f32 %v3210_v31, %v2944_v39 }
 0x2f5   :  { %v2958_v47 = vmul.f32 %v3210_v31, %v2943_v3  ;;  %v2974_v16 = vadd.f32 %v3211_v18, %v2959_v49 }
 0x2f7   :  { %v2973_v13 = vadd.f32 %v3211_v18, %v2958_v47 }
 0x2f9   :  { %3480 = vmatprep.mubr.msk.f32.mxu1 %vm1651_vm0, %v2973_v13 }
 0x2fa   :  { %3481 = vmatmul.mubr.msk.f32.gmra.mxu1 %vm1651_vm0, %v2974_v16 }
 0x315   :  { %v3465_v2 = vpop.f32.mrf.mxu1 }
 0x316   :  { %v2928_v27 = vadd.f32 %v3465_v2, %v3201_v21 }
 0x317   :  { %v2922_v51 = vpop.f32.mrf.mxu1 }
 0x318   :  { %v2946_v1 = vmax.f32 %v2928_v27, 0.0  ;;  %v2923_v42 = vadd.f32 %v3201_v21, %v2922_v51 }
 0x31a   :  { %v2945_v9 = vmax.f32 %v2923_v42, 0.0  ;;  %v2961_v15 = vmul.f32 %v3210_v31, %v2946_v1 }
 0x31c   :  { %v2960_v25 = vmul.f32 %v3210_v31, %v2945_v9  ;;  %v2976_v46 = vadd.f32 %v3211_v18, %v2961_v15 }
 0x31e   :  { %v2975_v6 = vadd.f32 %v3211_v18, %v2960_v25 }
 0x31f   :  { %v3468_v20 = vpop.f32.mrf.mxu1 }
 0x320   :  { %v2938_v61 = vadd.f32 %v3468_v20, %v3201_v21  ;;  %3483 = vmatprep.mubr.msk.f32.mxu1 %vm1651_vm0, %v2975_v6 }
 0x321   :  { %3484 = vmatmul.mubr.msk.f32.gmra.mxu1 %vm1651_vm0, %v2976_v46  ;;  %v2932_v44 = vpop.f32.mrf.mxu1 }
 0x322   :  { %v2948_v23 = vmax.f32 %v2938_v61, 0.0  ;;  %v2933_v24 = vadd.f32 %v3201_v21, %v2932_v44 }
 0x324   :  { %v2947_v30 = vmax.f32 %v2933_v24, 0.0  ;;  %v2963_v7 = vmul.f32 %v3210_v31, %v2948_v23 }
 0x326   :  { %v2962_v26 = vmul.f32 %v3210_v31, %v2947_v30  ;;  %v2978_v33 = vadd.f32 %v3211_v18, %v2963_v7 }
 0x328   :  { %v2977_v41 = vadd.f32 %v3211_v18, %v2962_v26 }
 0x32a   :  { %3486 = vmatprep.mubr.msk.f32.mxu1 %vm1651_vm0, %v2977_v41 }
 0x32b   :  { %3487 = vmatmul.mubr.msk.f32.gmra.mxu1 %vm1651_vm0, %v2978_v33 }
 0x341   :  { %v3479_v14 = vpop.f32.mrf.mxu1 }
 0x342   :  { %v3086_v4 = vadd.f32 %v3479_v14, %v3212_v45 }
 0x343   :  { %v3080_v43 = vpop.f32.mrf.mxu1 }
 0x344   :  { %3120 = vst [vmem:[%s5104_s11 + $0x8] sm:$0xff] %v3086_v4  ;;  %v3081_v8 = vadd.f32 %v3212_v45, %v3080_v43 }
 0x346   :  { %3119 = vst [vmem:[%s5104_s11] sm:$0xff] %v3081_v8 }
 0x3ba   :  { %v3482_v28 = vpop.f32.mrf.mxu1 }
 0x3bb   :  { %v3096_v54 = vadd.f32 %v3482_v28, %v3212_v45 }
 0x3bc   :  { %v3090_v48 = vpop.f32.mrf.mxu1 }
 0x3bd   :  { %3122 = vst [vmem:[%s5104_s11 + $0x18] sm:$0xff] %v3096_v54  ;;  %v3091_v22 = vadd.f32 %v3212_v45, %v3090_v48 }
 0x3bf   :  { %3121 = vst [vmem:[%s5104_s11 + $0x10] sm:$0xff] %v3091_v22 }
 0x3e1   :  { %v3485_v63 = vpop.f32.mrf.mxu1 }
 0x3e2   :  { %v3106_v50 = vadd.f32 %v3485_v63, %v3212_v45 }
 0x3e3   :  { %v3100_v58 = vpop.f32.mrf.mxu1 }
 0x3e4   :  { %3124 = vst [vmem:[%s5104_s11 + $0x28] sm:$0xff] %v3106_v50  ;;  %v3101_v29 = vadd.f32 %v3212_v45, %v3100_v58 }
 0x3e6   :  { %3123 = vst [vmem:[%s5104_s11 + $0x20] sm:$0xff] %v3101_v29 }
 0x3eb   :  { %v3488_v60 = vpop.f32.mrf.mxu1 }
 0x3ec   :  { %v3116_v32 = vadd.f32 %v3488_v60, %v3212_v45 }
 0x3ed   :  { %v3110_v11 = vpop.f32.mrf.mxu1 }
 0x3ee   :  { %3126 = vst [vmem:[%s5104_s11 + $0x38] sm:$0xff] %v3116_v32  ;;  %v3111_v0 = vadd.f32 %v3212_v45, %v3110_v11 }
 0x3f0   :  { %3125 = vst [vmem:[%s5104_s11 + $0x30] sm:$0xff] %v3111_v0 }

</bundles_post_ra>
